<compile_context>
chip_gen: v7x
topology: tpu7x:2x2x1
jax: 0.10.0
libtpu: 0.0.40
codegen_flags: <defaults>
</compile_context>

<pallas_src>
import functools
import math

import jax
import jax.numpy as jnp
from jax import lax
from jax.experimental import pallas as pl
from jax.experimental.pallas import tpu as pltpu


def _round_up(x, m):
    return ((x + m - 1) // m) * m


def _device_kind():
    try:
        return jax.devices()[0].device_kind.lower()
    except Exception:
        return ""


def _gate_dtype():
    # bf16 EUP/VPU exist on v6e/v7x; keep gate nonlinearities f32 elsewhere.
    kind = _device_kind()
    if "v6" in kind or "v7" in kind:
        return jnp.bfloat16
    return jnp.float32


def _num_tensorcores():
    # Only v7x has 2 TensorCores per chip; everything else is treated as 1.
    return 2 if "v7" in _device_kind() else 1


# ----------------------------------------------------------------------------
# Pallas kernel: fused input projection + sequential LSTM recurrence
# ----------------------------------------------------------------------------
def _lstm_chunk_kernel(*refs, emit_y, tail_mask, t_valid, gate_dtype, unroll):
    """Grid = (batch_chunks [parallel], time_chunks [arbitrary, sequential]).

    Refs (emit_y=True):  x, w_ih, w_hh, bias, y, h, c
    Refs (emit_y=False): x, w_ih, w_hh, bias, h, c
      x_ref:   (Tc, Bc, Dp) bf16   layer input chunk (embeddings or prev-layer y)
      wih_ref: (Dp, 4Hp)    bf16   pre-transposed input->hidden weights
      whh_ref: (Hp, 4Hp)    bf16   pre-transposed hidden->hidden weights
      b_ref:   (1, 4Hp)     f32    combined bias (b_ih + b_hh)
      y_ref:   (Tc, Bc, Hp) bf16   per-timestep hidden output (next layer input)
      h_ref:   (Bc, Hp)     f32    final hidden state / chunk-boundary carrier
      c_ref:   (Bc, Hp)     f32    final cell state   / chunk-boundary carrier
    """
    if emit_y:
        x_ref, wih_ref, whh_ref, b_ref, y_ref, h_ref, c_ref = refs
    else:
        x_ref, wih_ref, whh_ref, b_ref, h_ref, c_ref = refs
        y_ref = None

    t = pl.program_id(1)
    Tc = x_ref.shape[0]
    Hp = h_ref.shape[-1]

    @pl.when(t == 0)
    def _():
        h_ref[...] = jnp.zeros_like(h_ref)
        c_ref[...] = jnp.zeros_like(c_ref)

    bias = b_ref[...]                                   # (1, 4Hp) f32, hoisted

    def step(i, carry):
        h, c = carry                                    # f32 (Bc, Hp), in vregs
        # Input projection (independent of h -> schedulable off the serial
        # chain) and recurrent projection; bf16 MXU matmuls, f32 accumulation.
        gx = jnp.dot(x_ref[i], wih_ref[...],
                     preferred_element_type=jnp.float32)
        gh = jnp.dot(h.astype(whh_ref.dtype), whh_ref[...],
                     preferred_element_type=jnp.float32)
        gates = (gx + gh + bias).astype(gate_dtype)     # (Bc, 4Hp)

        # PyTorch gate ordering: input | forget | cell(g) | output.
        # Hp is a multiple of 128 -> every slice is lane-aligned.
        i_g = jax.nn.sigmoid(gates[:, 0 * Hp:1 * Hp]).astype(jnp.float32)
        f_g = jax.nn.sigmoid(gates[:, 1 * Hp:2 * Hp]).astype(jnp.float32)
        g_g = jnp.tanh(gates[:, 2 * Hp:3 * Hp]).astype(jnp.float32)
        o_g = jax.nn.sigmoid(gates[:, 3 * Hp:4 * Hp]).astype(jnp.float32)

        c_new = f_g * c + i_g * g_g                     # f32 state math
        h_new = o_g * jnp.tanh(c_new.astype(gate_dtype)).astype(jnp.float32)

        if tail_mask:
            # Padded (beyond-T) timesteps must not update the state.
            live = (t * Tc + i) < t_valid
            c_new = jnp.where(live, c_new, c)
            h_new = jnp.where(live, h_new, h)

        if y_ref is not None:
            y_ref[i] = h_new.astype(y_ref.dtype)
        return h_new, c_new

    h_fin, c_fin = lax.fori_loop(0, Tc, step, (h_ref[...], c_ref[...]),
                                 unroll=unroll)
    h_ref[...] = h_fin
    c_ref[...] = c_fin


def lstm_layer(x, w_ih_t, w_hh_t, bias, *, t_valid, emit_y, time_chunk,
               gate_dtype):
    """One LSTM layer over the padded sequence.

    x: (Tp, Bp, Dp) bf16, w_ih_t: (Dp, 4Hp) bf16, w_hh_t: (Hp, 4Hp) bf16,
    bias: (1, 4Hp) f32.  Returns (y | None, h_final, c_final).
    """
    Tp, Bp, Dp = x.shape
    Hp, G4 = w_hh_t.shape
    Tc = time_chunk
    n_t = Tp // Tc

    # Batch split only pays on multi-TC hardware (v7x) and only if each core
    # keeps a full bf16 sublane tile of batch rows.
    n_b = 2 if (_num_tensorcores() >= 2 and Bp % 32 == 0 and Bp // 2 >= 16) else 1
    Bc = Bp // n_b

    # Bound the unroll when the per-step gate tensor is large (spill risk).
    gates_bytes = Bc * G4 * 4
    if gates_bytes <= 16 * 4096:                 # <= 16 vregs of gates per step
        unroll = Tc
    else:
        unroll = next(u for u in (4, 2, 1) if Tc % u == 0)

    kernel = functools.partial(
        _lstm_chunk_kernel, emit_y=emit_y, tail_mask=(t_valid != Tp),
        t_valid=t_valid, gate_dtype=gate_dtype, unroll=unroll)

    out_shape = [jax.ShapeDtypeStruct((Bp, Hp), jnp.float32),
                 jax.ShapeDtypeStruct((Bp, Hp), jnp.float32)]
    out_specs = [pl.BlockSpec((Bc, Hp), lambda b, t: (b, 0)),
                 pl.BlockSpec((Bc, Hp), lambda b, t: (b, 0))]
    if emit_y:
        out_shape = [jax.ShapeDtypeStruct((Tp, Bp, Hp), jnp.bfloat16)] + out_shape
        out_specs = [pl.BlockSpec((Tc, Bc, Hp), lambda b, t: (t, b, 0))] + out_specs

    # Explicit VMEM budget: never below the 32 MiB scoped default, never above
    # v7x's 64 MiB physical VMEM.  (Tc sizing keeps `need` small.)
    need = (2 * Tc * Bc * Dp * 2                       # x block, double-buffered
            + (2 * Tc * Bc * Hp * 2 if emit_y else 0)  # y block
            + 2 * Dp * G4 * 2 + 2 * Hp * G4 * 2        # weights (conservative x2)
            + 2 * G4 * 4                               # bias
            + 4 * Bc * Hp * 4)                         # h, c output blocks
    vmem_limit = int(max(32 << 20, min(64 << 20, 2 * need + (2 << 20))))

    cost = pl.CostEstimate(
        flops=int(2 * Tp * Bp * (Dp + Hp) * G4),
        transcendentals=int(5 * Tp * Bp * Hp),
        bytes_accessed=int(Tp * Bp * Dp * 2
                           + (Tp * Bp * Hp * 2 if emit_y else 0)
                           + Dp * G4 * 2 + Hp * G4 * 2 + G4 * 4
                           + 2 * Bp * Hp * 4))

    outs = pl.pallas_call(
        kernel,
        out_shape=tuple(out_shape),
        grid_spec=pltpu.PrefetchScalarGridSpec(
            num_scalar_prefetch=0,
            grid=(n_b, n_t),
            in_specs=[
                pl.BlockSpec((Tc, Bc, Dp), lambda b, t: (t, b, 0)),
                # TODO(synk): mark constant-index weight/bias blocks with
                # pipeline_mode=pl.Buffered(1) to drop the unused second buffer.
                pl.BlockSpec((Dp, G4), lambda b, t: (0, 0)),
                pl.BlockSpec((Hp, G4), lambda b, t: (0, 0)),
                pl.BlockSpec((1, G4), lambda b, t: (0, 0)),
            ],
            out_specs=tuple(out_specs),
        ),
        compiler_params=pltpu.CompilerParams(
            dimension_semantics=("parallel", "arbitrary"),
            vmem_limit_bytes=vmem_limit),
        cost_estimate=cost,
    )(x, w_ih_t, w_hh_t, bias)

    if emit_y:
        y, h_f, c_f = outs
    else:
        h_f, c_f = outs
        y = None
    return y, h_f, c_f


# ----------------------------------------------------------------------------
# Parameter padding helpers (gate-blocked zero padding keeps padded h/c at 0)
# ----------------------------------------------------------------------------
def _gate_block_pad_cols(w_t, H, Hp):
    """(Din, 4H) with PyTorch [i|f|g|o] gate columns -> (Din, 4Hp)."""
    if Hp == H:
        return w_t
    Din = w_t.shape[0]
    wb = w_t.reshape(Din, 4, H)
    out = jnp.zeros((Din, 4, Hp), w_t.dtype).at[:, :, :H].set(wb)
    return out.reshape(Din, 4 * Hp)


def _pad_rows(w, rows_to):
    r = w.shape[0]
    if rows_to == r:
        return w
    return jnp.pad(w, ((0, rows_to - r), (0, 0)))


def _pad_bias(b, H, Hp):
    if Hp == H:
        return b
    bb = b.reshape(4, H)
    return jnp.zeros((4, Hp), b.dtype).at[:, :H].set(bb).reshape(4 * Hp)


# ----------------------------------------------------------------------------
# Parameters + forward
# ----------------------------------------------------------------------------
def init_encoder_params(key, src_vocab_size, embed_size, hidden_size, num_layers):
    """Deterministic synthetic init matching PyTorch parameter shapes."""
    keys = jax.random.split(key, 1 + 4 * num_layers)
    params = {}
    params["embedding"] = jax.random.normal(
        keys[0], (src_vocab_size, embed_size), dtype=jnp.float32)

    bound = 1.0 / math.sqrt(hidden_size)
    layers = []
    for layer in range(num_layers):
        in_dim = embed_size if layer == 0 else hidden_size
        k = keys[1 + 4 * layer:1 + 4 * (layer + 1)]
        w_ih = jax.random.uniform(k[0], (4 * hidden_size, in_dim),
                                  minval=-bound, maxval=bound, dtype=jnp.float32)
        w_hh = jax.random.uniform(k[1], (4 * hidden_size, hidden_size),
                                  minval=-bound, maxval=bound, dtype=jnp.float32)
        b_ih = jax.random.uniform(k[2], (4 * hidden_size,),
                                  minval=-bound, maxval=bound, dtype=jnp.float32)
        b_hh = jax.random.uniform(k[3], (4 * hidden_size,),
                                  minval=-bound, maxval=bound, dtype=jnp.float32)
        layers.append({"w_ih": w_ih, "w_hh": w_hh, "b": b_ih + b_hh})
    params["lstm"] = layers
    return params


def encoder_forward(params, tokens, *, time_chunk=32):
    """tokens: (B, T) int32. Returns (hidden_state, cell_state), each
    (num_layers, B, hidden_size), matching nn.LSTM semantics (eval mode)."""
    B, T = tokens.shape
    H = params["lstm"][0]["w_hh"].shape[1]
    E = params["embedding"].shape[1]
    num_layers = len(params["lstm"])
    gate_dtype = _gate_dtype()

    Hp = _round_up(H, 128)                       # lane-aligned hidden
    Ep = _round_up(E, 128)                       # lane-aligned embed dim
    Bp = _round_up(max(B, 16), 16)               # bf16 sublane-aligned batch

    # Fixed time chunk with in-kernel tail masking (no divisibility cliff),
    # sized so the streaming x / y blocks stay within a modest VMEM budget.
    per_step_bytes = 2 * Bp * (2 * Ep + 2 * Hp)  # double-buffered bf16 x + y
    Tc = max(1, min(time_chunk, T, (12 << 20) // max(per_step_bytes, 1)))
    Tp = _round_up(T, Tc)

    # Embedding gather directly in time-major order (no activation transpose);
    # nn.Dropout is the identity in eval mode.
    x = jnp.take(params["embedding"], tokens.T, axis=0)            # (T, B, E)
    x = jnp.pad(x, ((0, Tp - T), (0, Bp - B), (0, Ep - E)))
    x = x.astype(jnp.bfloat16)                                     # (Tp, Bp, Ep)

    h_list, c_list = [], []
    for layer_idx, p in enumerate(params["lstm"]):
        Dp = Ep if layer_idx == 0 else Hp
        w_ih_t = _pad_rows(_gate_block_pad_cols(p["w_ih"].T, H, Hp), Dp)
        w_hh_t = _pad_rows(_gate_block_pad_cols(p["w_hh"].T, H, Hp), Hp)
        bias = _pad_bias(p["b"], H, Hp).reshape(1, 4 * Hp).astype(jnp.float32)

        emit_y = layer_idx < num_layers - 1      # last layer's y is never used
        y, h_f, c_f = lstm_layer(
            x, w_ih_t.astype(jnp.bfloat16), w_hh_t.astype(jnp.bfloat16), bias,
            t_valid=T, emit_y=emit_y, time_chunk=Tc, gate_dtype=gate_dtype)

        h_list.append(h_f[:B, :H])
        c_list.append(c_f[:B, :H])
        if emit_y:
            x = y        # (Tp, Bp, Hp) bf16; inter-layer dropout identity (eval)

    hidden_state = jnp.stack(h_list, axis=0)     # (num_layers, B, H)
    cell_state = jnp.stack(c_list, axis=0)       # (num_layers, B, H)
    return hidden_state, cell_state


if __name__ == "__main__":
    src_vocab_size = 50
    embed_size = 32
    hidden_size = 32
    num_layers = 2
    batch = 2
    seq_len = 8

    root_key = jax.random.PRNGKey(0)
    pkey, tkey = jax.random.split(root_key)

    params = init_encoder_params(pkey, src_vocab_size, embed_size,
                                 hidden_size, num_layers)
    tokens = jax.random.randint(tkey, (batch, seq_len), 0, src_vocab_size,
                                dtype=jnp.int32)

    fwd = jax.jit(encoder_forward)
    hidden_state, cell_state = fwd(params, tokens)
    jax.block_until_ready((hidden_state, cell_state))

    assert hidden_state.shape == (num_layers, batch, hidden_size)
    assert cell_state.shape == (num_layers, batch, hidden_size)
    assert bool(jnp.all(jnp.isfinite(hidden_state)))
    assert bool(jnp.all(jnp.isfinite(cell_state)))
    print("KERNEL_OK")
</pallas_src>

<mosaic_0001>
module attributes {stable_mosaic.version = 11 : i64} {
  func.func @_lstm_chunk_kernel(%arg0: i32, %arg1: i32, %arg2: memref<8x16x128xbf16, #tpu.memory_space<vmem>>, %arg3: memref<128x512xbf16, #tpu.memory_space<vmem>>, %arg4: memref<128x512xbf16, #tpu.memory_space<vmem>>, %arg5: memref<1x512xf32, #tpu.memory_space<vmem>>, %arg6: memref<8x16x128xbf16, #tpu.memory_space<vmem>>, %arg7: memref<16x128xf32, #tpu.memory_space<vmem>>, %arg8: memref<16x128xf32, #tpu.memory_space<vmem>>) attributes {dimension_semantics = [#tpu.dimension_semantics<parallel>, #tpu.dimension_semantics<arbitrary>], iteration_bounds = array<i64: 1, 1>, scalar_prefetch = 0 : i64, scratch_operands = 0 : i64, tpu.core_type = #tpu.core_type<tc>, window_params = [{transform_indices = @transform_0, window_bounds = array<i64: 8, 16, 128>}, {pipeline_mode = #tpu.pipeline_mode<synchronous>, transform_indices = @transform_1, window_bounds = array<i64: 128, 512>}, {pipeline_mode = #tpu.pipeline_mode<synchronous>, transform_indices = @transform_2, window_bounds = array<i64: 128, 512>}, {pipeline_mode = #tpu.pipeline_mode<synchronous>, transform_indices = @transform_3, window_bounds = array<i64: 1, 512>}, {transform_indices = @transform_4, window_bounds = array<i64: 8, 16, 128>}, {transform_indices = @transform_5, window_bounds = array<i64: 16, 128>}, {transform_indices = @transform_6, window_bounds = array<i64: 16, 128>}]} {
    %c0_i32 = arith.constant 0 : i32
    %0 = arith.cmpi eq, %arg1, %c0_i32 : i32
    %1 = arith.extui %0 : i1 to i32
    %c0_i32_0 = arith.constant 0 : i32
    %2 = arith.cmpi ne, %1, %c0_i32_0 : i32
    scf.if %2 {
      %cst_114 = arith.constant 0.000000e+00 : f32
      %336 = vector.broadcast %cst_114 : f32 to vector<16x128xf32>
      %c0_115 = arith.constant 0 : index
      %c0_116 = arith.constant 0 : index
      %337 = vector.load %arg7[%c0_115, %c0_116] : memref<16x128xf32, #tpu.memory_space<vmem>>, vector<16x128xf32>
      tpu.vector_store %arg7[%c0_115, %c0_116], %336 {strides = array<i32>} : memref<16x128xf32, #tpu.memory_space<vmem>>, vector<16x128xf32>,
      %cst_117 = arith.constant 0.000000e+00 : f32
      %338 = vector.broadcast %cst_117 : f32 to vector<16x128xf32>
      %c0_118 = arith.constant 0 : index
      %c0_119 = arith.constant 0 : index
      %339 = vector.load %arg8[%c0_118, %c0_119] : memref<16x128xf32, #tpu.memory_space<vmem>>, vector<16x128xf32>
      tpu.vector_store %arg8[%c0_118, %c0_119], %338 {strides = array<i32>} : memref<16x128xf32, #tpu.memory_space<vmem>>, vector<16x128xf32>,
    } else {
    }
    %c0 = arith.constant 0 : index
    %c0_1 = arith.constant 0 : index
    %3 = vector.load %arg5[%c0, %c0_1] : memref<1x512xf32, #tpu.memory_space<vmem>>, vector<1x512xf32>
    %c0_2 = arith.constant 0 : index
    %c0_3 = arith.constant 0 : index
    %4 = vector.load %arg7[%c0_2, %c0_3] : memref<16x128xf32, #tpu.memory_space<vmem>>, vector<16x128xf32>
    %c0_4 = arith.constant 0 : index
    %c0_5 = arith.constant 0 : index
    %5 = vector.load %arg8[%c0_4, %c0_5] : memref<16x128xf32, #tpu.memory_space<vmem>>, vector<16x128xf32>
    %c0_i32_6 = arith.constant 0 : i32
    %6 = arith.index_cast %c0_i32_6 : i32 to index
    %c0_7 = arith.constant 0 : index
    %c0_8 = arith.constant 0 : index
    %7 = vector.load %arg2[%6, %c0_7, %c0_8] : memref<8x16x128xbf16, #tpu.memory_space<vmem>>, vector<1x16x128xbf16>
    %8 = vector.shape_cast %7 : vector<1x16x128xbf16> to vector<16x128xbf16>
    %c0_9 = arith.constant 0 : index
    %c0_10 = arith.constant 0 : index
    %9 = vector.load %arg3[%c0_9, %c0_10] : memref<128x512xbf16, #tpu.memory_space<vmem>>, vector<128x512xbf16>
    %cst = arith.constant dense<0.000000e+00> : vector<16x512xf32>
    %10 = tpu.matmul %8, %9, %cst {dimension_numbers = #tpu.dot_dimension_numbers<[1], [0], [0], [1], [0, 0, 1, 1], [], []>} : vector<16x128xbf16>, vector<128x512xbf16>, vector<16x512xf32> -> vector<16x512xf32>
    %11 = arith.truncf %4 : vector<16x128xf32> to vector<16x128xbf16>
    %c0_11 = arith.constant 0 : index
    %c0_12 = arith.constant 0 : index
    %12 = vector.load %arg4[%c0_11, %c0_12] : memref<128x512xbf16, #tpu.memory_space<vmem>>, vector<128x512xbf16>
    %cst_13 = arith.constant dense<0.000000e+00> : vector<16x512xf32>
    %13 = tpu.matmul %11, %12, %cst_13 {dimension_numbers = #tpu.dot_dimension_numbers<[1], [0], [0], [1], [0, 0, 1, 1], [], []>} : vector<16x128xbf16>, vector<128x512xbf16>, vector<16x512xf32> -> vector<16x512xf32>
    %14 = arith.addf %10, %13 : vector<16x512xf32>
    %15 = vector.broadcast %3 : vector<1x512xf32> to vector<16x512xf32>
    %16 = arith.addf %14, %15 : vector<16x512xf32>
    %17 = vector.extract_strided_slice %16 {offsets = [0, 0], sizes = [16, 128], strides = [1, 1]} : vector<16x512xf32> to vector<16x128xf32>
    %18 = arith.negf %17 : vector<16x128xf32>
    %19 = math.exp %18 : vector<16x128xf32>
    %cst_14 = arith.constant 1.000000e+00 : f32
    %20 = vector.broadcast %cst_14 : f32 to vector<16x128xf32>
    %21 = arith.addf %20, %19 : vector<16x128xf32>
    %22 = arith.divf %20, %21 : vector<16x128xf32>
    %23 = vector.extract_strided_slice %16 {offsets = [0, 128], sizes = [16, 128], strides = [1, 1]} : vector<16x512xf32> to vector<16x128xf32>
    %24 = arith.negf %23 : vector<16x128xf32>
    %25 = math.exp %24 : vector<16x128xf32>
    %cst_15 = arith.constant 1.000000e+00 : f32
    %26 = vector.broadcast %cst_15 : f32 to vector<16x128xf32>
    %27 = arith.addf %26, %25 : vector<16x128xf32>
    %28 = arith.divf %26, %27 : vector<16x128xf32>
    %29 = vector.extract_strided_slice %16 {offsets = [0, 256], sizes = [16, 128], strides = [1, 1]} : vector<16x512xf32> to vector<16x128xf32>
    %30 = math.tanh %29 : vector<16x128xf32>
    %31 = vector.extract_strided_slice %16 {offsets = [0, 384], sizes = [16, 128], strides = [1, 1]} : vector<16x512xf32> to vector<16x128xf32>
    %32 = arith.negf %31 : vector<16x128xf32>
    %33 = math.exp %32 : vector<16x128xf32>
    %cst_16 = arith.constant 1.000000e+00 : f32
    %34 = vector.broadcast %cst_16 : f32 to vector<16x128xf32>
    %35 = arith.addf %34, %33 : vector<16x128xf32>
    %36 = arith.divf %34, %35 : vector<16x128xf32>
    %37 = arith.mulf %28, %5 : vector<16x128xf32>
    %38 = arith.mulf %22, %30 : vector<16x128xf32>
    %39 = arith.addf %37, %38 : vector<16x128xf32>
    %40 = math.tanh %39 : vector<16x128xf32>
    %41 = arith.mulf %36, %40 : vector<16x128xf32>
    %42 = arith.truncf %41 : vector<16x128xf32> to vector<16x128xbf16>
    %43 = arith.index_cast %c0_i32_6 : i32 to index
    %c0_17 = arith.constant 0 : index
    %c0_18 = arith.constant 0 : index
    %44 = vector.load %arg6[%43, %c0_17, %c0_18] : memref<8x16x128xbf16, #tpu.memory_space<vmem>>, vector<1x16x128xbf16>
    %45 = vector.shape_cast %44 : vector<1x16x128xbf16> to vector<16x128xbf16>
    %46 = vector.shape_cast %42 : vector<16x128xbf16> to vector<1x16x128xbf16>
    tpu.vector_store %arg6[%43, %c0_17, %c0_18], %46 {strides = array<i32>} : memref<8x16x128xbf16, #tpu.memory_space<vmem>>, vector<1x16x128xbf16>,
    %c1_i32 = arith.constant 1 : i32
    %47 = arith.index_cast %c1_i32 : i32 to index
    %c0_19 = arith.constant 0 : index
    %c0_20 = arith.constant 0 : index
    %48 = vector.load %arg2[%47, %c0_19, %c0_20] : memref<8x16x128xbf16, #tpu.memory_space<vmem>>, vector<1x16x128xbf16>
    %49 = vector.shape_cast %48 : vector<1x16x128xbf16> to vector<16x128xbf16>
    %c0_21 = arith.constant 0 : index
    %c0_22 = arith.constant 0 : index
    %50 = vector.load %arg3[%c0_21, %c0_22] : memref<128x512xbf16, #tpu.memory_space<vmem>>, vector<128x512xbf16>
    %cst_23 = arith.constant dense<0.000000e+00> : vector<16x512xf32>
    %51 = tpu.matmul %49, %50, %cst_23 {dimension_numbers = #tpu.dot_dimension_numbers<[1], [0], [0], [1], [0, 0, 1, 1], [], []>} : vector<16x128xbf16>, vector<128x512xbf16>, vector<16x512xf32> -> vector<16x512xf32>
    %52 = arith.truncf %41 : vector<16x128xf32> to vector<16x128xbf16>
    %c0_24 = arith.constant 0 : index
    %c0_25 = arith.constant 0 : index
    %53 = vector.load %arg4[%c0_24, %c0_25] : memref<128x512xbf16, #tpu.memory_space<vmem>>, vector<128x512xbf16>
    %cst_26 = arith.constant dense<0.000000e+00> : vector<16x512xf32>
    %54 = tpu.matmul %52, %53, %cst_26 {dimension_numbers = #tpu.dot_dimension_numbers<[1], [0], [0], [1], [0, 0, 1, 1], [], []>} : vector<16x128xbf16>, vector<128x512xbf16>, vector<16x512xf32> -> vector<16x512xf32>
    %55 = arith.addf %51, %54 : vector<16x512xf32>
    %56 = vector.broadcast %3 : vector<1x512xf32> to vector<16x512xf32>
    %57 = arith.addf %55, %56 : vector<16x512xf32>
    %58 = vector.extract_strided_slice %57 {offsets = [0, 0], sizes = [16, 128], strides = [1, 1]} : vector<16x512xf32> to vector<16x128xf32>
    %59 = arith.negf %58 : vector<16x128xf32>
    %60 = math.exp %59 : vector<16x128xf32>
    %cst_27 = arith.constant 1.000000e+00 : f32
    %61 = vector.broadcast %cst_27 : f32 to vector<16x128xf32>
    %62 = arith.addf %61, %60 : vector<16x128xf32>
    %63 = arith.divf %61, %62 : vector<16x128xf32>
    %64 = vector.extract_strided_slice %57 {offsets = [0, 128], sizes = [16, 128], strides = [1, 1]} : vector<16x512xf32> to vector<16x128xf32>
    %65 = arith.negf %64 : vector<16x128xf32>
    %66 = math.exp %65 : vector<16x128xf32>
    %cst_28 = arith.constant 1.000000e+00 : f32
    %67 = vector.broadcast %cst_28 : f32 to vector<16x128xf32>
    %68 = arith.addf %67, %66 : vector<16x128xf32>
    %69 = arith.divf %67, %68 : vector<16x128xf32>
    %70 = vector.extract_strided_slice %57 {offsets = [0, 256], sizes = [16, 128], strides = [1, 1]} : vector<16x512xf32> to vector<16x128xf32>
    %71 = math.tanh %70 : vector<16x128xf32>
    %72 = vector.extract_strided_slice %57 {offsets = [0, 384], sizes = [16, 128], strides = [1, 1]} : vector<16x512xf32> to vector<16x128xf32>
    %73 = arith.negf %72 : vector<16x128xf32>
    %74 = math.exp %73 : vector<16x128xf32>
    %cst_29 = arith.constant 1.000000e+00 : f32
    %75 = vector.broadcast %cst_29 : f32 to vector<16x128xf32>
    %76 = arith.addf %75, %74 : vector<16x128xf32>
    %77 = arith.divf %75, %76 : vector<16x128xf32>
    %78 = arith.mulf %69, %39 : vector<16x128xf32>
    %79 = arith.mulf %63, %71 : vector<16x128xf32>
    %80 = arith.addf %78, %79 : vector<16x128xf32>
    %81 = math.tanh %80 : vector<16x128xf32>
    %82 = arith.mulf %77, %81 : vector<16x128xf32>
    %83 = arith.truncf %82 : vector<16x128xf32> to vector<16x128xbf16>
    %84 = arith.index_cast %c1_i32 : i32 to index
    %c0_30 = arith.constant 0 : index
    %c0_31 = arith.constant 0 : index
    %85 = vector.load %arg6[%84, %c0_30, %c0_31] : memref<8x16x128xbf16, #tpu.memory_space<vmem>>, vector<1x16x128xbf16>
    %86 = vector.shape_cast %85 : vector<1x16x128xbf16> to vector<16x128xbf16>
    %87 = vector.shape_cast %83 : vector<16x128xbf16> to vector<1x16x128xbf16>
    tpu.vector_store %arg6[%84, %c0_30, %c0_31], %87 {strides = array<i32>} : memref<8x16x128xbf16, #tpu.memory_space<vmem>>, vector<1x16x128xbf16>,
    %c2_i32 = arith.constant 2 : i32
    %88 = arith.index_cast %c2_i32 : i32 to index
    %c0_32 = arith.constant 0 : index
    %c0_33 = arith.constant 0 : index
    %89 = vector.load %arg2[%88, %c0_32, %c0_33] : memref<8x16x128xbf16, #tpu.memory_space<vmem>>, vector<1x16x128xbf16>
    %90 = vector.shape_cast %89 : vector<1x16x128xbf16> to vector<16x128xbf16>
    %c0_34 = arith.constant 0 : index
    %c0_35 = arith.constant 0 : index
    %91 = vector.load %arg3[%c0_34, %c0_35] : memref<128x512xbf16, #tpu.memory_space<vmem>>, vector<128x512xbf16>
    %cst_36 = arith.constant dense<0.000000e+00> : vector<16x512xf32>
    %92 = tpu.matmul %90, %91, %cst_36 {dimension_numbers = #tpu.dot_dimension_numbers<[1], [0], [0], [1], [0, 0, 1, 1], [], []>} : vector<16x128xbf16>, vector<128x512xbf16>, vector<16x512xf32> -> vector<16x512xf32>
    %93 = arith.truncf %82 : vector<16x128xf32> to vector<16x128xbf16>
    %c0_37 = arith.constant 0 : index
    %c0_38 = arith.constant 0 : index
    %94 = vector.load %arg4[%c0_37, %c0_38] : memref<128x512xbf16, #tpu.memory_space<vmem>>, vector<128x512xbf16>
    %cst_39 = arith.constant dense<0.000000e+00> : vector<16x512xf32>
    %95 = tpu.matmul %93, %94, %cst_39 {dimension_numbers = #tpu.dot_dimension_numbers<[1], [0], [0], [1], [0, 0, 1, 1], [], []>} : vector<16x128xbf16>, vector<128x512xbf16>, vector<16x512xf32> -> vector<16x512xf32>
    %96 = arith.addf %92, %95 : vector<16x512xf32>
    %97 = vector.broadcast %3 : vector<1x512xf32> to vector<16x512xf32>
    %98 = arith.addf %96, %97 : vector<16x512xf32>
    %99 = vector.extract_strided_slice %98 {offsets = [0, 0], sizes = [16, 128], strides = [1, 1]} : vector<16x512xf32> to vector<16x128xf32>
    %100 = arith.negf %99 : vector<16x128xf32>
    %101 = math.exp %100 : vector<16x128xf32>
    %cst_40 = arith.constant 1.000000e+00 : f32
    %102 = vector.broadcast %cst_40 : f32 to vector<16x128xf32>
    %103 = arith.addf %102, %101 : vector<16x128xf32>
    %104 = arith.divf %102, %103 : vector<16x128xf32>
    %105 = vector.extract_strided_slice %98 {offsets = [0, 128], sizes = [16, 128], strides = [1, 1]} : vector<16x512xf32> to vector<16x128xf32>
    %106 = arith.negf %105 : vector<16x128xf32>
    %107 = math.exp %106 : vector<16x128xf32>
    %cst_41 = arith.constant 1.000000e+00 : f32
    %108 = vector.broadcast %cst_41 : f32 to vector<16x128xf32>
    %109 = arith.addf %108, %107 : vector<16x128xf32>
    %110 = arith.divf %108, %109 : vector<16x128xf32>
    %111 = vector.extract_strided_slice %98 {offsets = [0, 256], sizes = [16, 128], strides = [1, 1]} : vector<16x512xf32> to vector<16x128xf32>
    %112 = math.tanh %111 : vector<16x128xf32>
    %113 = vector.extract_strided_slice %98 {offsets = [0, 384], sizes = [16, 128], strides = [1, 1]} : vector<16x512xf32> to vector<16x128xf32>
    %114 = arith.negf %113 : vector<16x128xf32>
    %115 = math.exp %114 : vector<16x128xf32>
    %cst_42 = arith.constant 1.000000e+00 : f32
    %116 = vector.broadcast %cst_42 : f32 to vector<16x128xf32>
    %117 = arith.addf %116, %115 : vector<16x128xf32>
    %118 = arith.divf %116, %117 : vector<16x128xf32>
    %119 = arith.mulf %110, %80 : vector<16x128xf32>
    %120 = arith.mulf %104, %112 : vector<16x128xf32>
    %121 = arith.addf %119, %120 : vector<16x128xf32>
    %122 = math.tanh %121 : vector<16x128xf32>
    %123 = arith.mulf %118, %122 : vector<16x128xf32>
    %124 = arith.truncf %123 : vector<16x128xf32> to vector<16x128xbf16>
    %125 = arith.index_cast %c2_i32 : i32 to index
    %c0_43 = arith.constant 0 : index
    %c0_44 = arith.constant 0 : index
    %126 = vector.load %arg6[%125, %c0_43, %c0_44] : memref<8x16x128xbf16, #tpu.memory_space<vmem>>, vector<1x16x128xbf16>
    %127 = vector.shape_cast %126 : vector<1x16x128xbf16> to vector<16x128xbf16>
    %128 = vector.shape_cast %124 : vector<16x128xbf16> to vector<1x16x128xbf16>
    tpu.vector_store %arg6[%125, %c0_43, %c0_44], %128 {strides = array<i32>} : memref<8x16x128xbf16, #tpu.memory_space<vmem>>, vector<1x16x128xbf16>,
    %c3_i32 = arith.constant 3 : i32
    %129 = arith.index_cast %c3_i32 : i32 to index
    %c0_45 = arith.constant 0 : index
    %c0_46 = arith.constant 0 : index
    %130 = vector.load %arg2[%129, %c0_45, %c0_46] : memref<8x16x128xbf16, #tpu.memory_space<vmem>>, vector<1x16x128xbf16>
    %131 = vector.shape_cast %130 : vector<1x16x128xbf16> to vector<16x128xbf16>
    %c0_47 = arith.constant 0 : index
    %c0_48 = arith.constant 0 : index
    %132 = vector.load %arg3[%c0_47, %c0_48] : memref<128x512xbf16, #tpu.memory_space<vmem>>, vector<128x512xbf16>
    %cst_49 = arith.constant dense<0.000000e+00> : vector<16x512xf32>
    %133 = tpu.matmul %131, %132, %cst_49 {dimension_numbers = #tpu.dot_dimension_numbers<[1], [0], [0], [1], [0, 0, 1, 1], [], []>} : vector<16x128xbf16>, vector<128x512xbf16>, vector<16x512xf32> -> vector<16x512xf32>
    %134 = arith.truncf %123 : vector<16x128xf32> to vector<16x128xbf16>
    %c0_50 = arith.constant 0 : index
    %c0_51 = arith.constant 0 : index
    %135 = vector.load %arg4[%c0_50, %c0_51] : memref<128x512xbf16, #tpu.memory_space<vmem>>, vector<128x512xbf16>
    %cst_52 = arith.constant dense<0.000000e+00> : vector<16x512xf32>
    %136 = tpu.matmul %134, %135, %cst_52 {dimension_numbers = #tpu.dot_dimension_numbers<[1], [0], [0], [1], [0, 0, 1, 1], [], []>} : vector<16x128xbf16>, vector<128x512xbf16>, vector<16x512xf32> -> vector<16x512xf32>
    %137 = arith.addf %133, %136 : vector<16x512xf32>
    %138 = vector.broadcast %3 : vector<1x512xf32> to vector<16x512xf32>
    %139 = arith.addf %137, %138 : vector<16x512xf32>
    %140 = vector.extract_strided_slice %139 {offsets = [0, 0], sizes = [16, 128], strides = [1, 1]} : vector<16x512xf32> to vector<16x128xf32>
    %141 = arith.negf %140 : vector<16x128xf32>
    %142 = math.exp %141 : vector<16x128xf32>
    %cst_53 = arith.constant 1.000000e+00 : f32
    %143 = vector.broadcast %cst_53 : f32 to vector<16x128xf32>
    %144 = arith.addf %143, %142 : vector<16x128xf32>
    %145 = arith.divf %143, %144 : vector<16x128xf32>
    %146 = vector.extract_strided_slice %139 {offsets = [0, 128], sizes = [16, 128], strides = [1, 1]} : vector<16x512xf32> to vector<16x128xf32>
    %147 = arith.negf %146 : vector<16x128xf32>
    %148 = math.exp %147 : vector<16x128xf32>
    %cst_54 = arith.constant 1.000000e+00 : f32
    %149 = vector.broadcast %cst_54 : f32 to vector<16x128xf32>
    %150 = arith.addf %149, %148 : vector<16x128xf32>
    %151 = arith.divf %149, %150 : vector<16x128xf32>
    %152 = vector.extract_strided_slice %139 {offsets = [0, 256], sizes = [16, 128], strides = [1, 1]} : vector<16x512xf32> to vector<16x128xf32>
    %153 = math.tanh %152 : vector<16x128xf32>
    %154 = vector.extract_strided_slice %139 {offsets = [0, 384], sizes = [16, 128], strides = [1, 1]} : vector<16x512xf32> to vector<16x128xf32>
    %155 = arith.negf %154 : vector<16x128xf32>
    %156 = math.exp %155 : vector<16x128xf32>
    %cst_55 = arith.constant 1.000000e+00 : f32
    %157 = vector.broadcast %cst_55 : f32 to vector<16x128xf32>
    %158 = arith.addf %157, %156 : vector<16x128xf32>
    %159 = arith.divf %157, %158 : vector<16x128xf32>
    %160 = arith.mulf %151, %121 : vector<16x128xf32>
    %161 = arith.mulf %145, %153 : vector<16x128xf32>
    %162 = arith.addf %160, %161 : vector<16x128xf32>
    %163 = math.tanh %162 : vector<16x128xf32>
    %164 = arith.mulf %159, %163 : vector<16x128xf32>
    %165 = arith.truncf %164 : vector<16x128xf32> to vector<16x128xbf16>
    %166 = arith.index_cast %c3_i32 : i32 to index
    %c0_56 = arith.constant 0 : index
    %c0_57 = arith.constant 0 : index
    %167 = vector.load %arg6[%166, %c0_56, %c0_57] : memref<8x16x128xbf16, #tpu.memory_space<vmem>>, vector<1x16x128xbf16>
    %168 = vector.shape_cast %167 : vector<1x16x128xbf16> to vector<16x128xbf16>
    %169 = vector.shape_cast %165 : vector<16x128xbf16> to vector<1x16x128xbf16>
    tpu.vector_store %arg6[%166, %c0_56, %c0_57], %169 {strides = array<i32>} : memref<8x16x128xbf16, #tpu.memory_space<vmem>>, vector<1x16x128xbf16>,
    %c4_i32 = arith.constant 4 : i32
    %170 = arith.index_cast %c4_i32 : i32 to index
    %c0_58 = arith.constant 0 : index
    %c0_59 = arith.constant 0 : index
    %171 = vector.load %arg2[%170, %c0_58, %c0_59] : memref<8x16x128xbf16, #tpu.memory_space<vmem>>, vector<1x16x128xbf16>
    %172 = vector.shape_cast %171 : vector<1x16x128xbf16> to vector<16x128xbf16>
    %c0_60 = arith.constant 0 : index
    %c0_61 = arith.constant 0 : index
    %173 = vector.load %arg3[%c0_60, %c0_61] : memref<128x512xbf16, #tpu.memory_space<vmem>>, vector<128x512xbf16>
    %cst_62 = arith.constant dense<0.000000e+00> : vector<16x512xf32>
    %174 = tpu.matmul %172, %173, %cst_62 {dimension_numbers = #tpu.dot_dimension_numbers<[1], [0], [0], [1], [0, 0, 1, 1], [], []>} : vector<16x128xbf16>, vector<128x512xbf16>, vector<16x512xf32> -> vector<16x512xf32>
    %175 = arith.truncf %164 : vector<16x128xf32> to vector<16x128xbf16>
    %c0_63 = arith.constant 0 : index
    %c0_64 = arith.constant 0 : index
    %176 = vector.load %arg4[%c0_63, %c0_64] : memref<128x512xbf16, #tpu.memory_space<vmem>>, vector<128x512xbf16>
    %cst_65 = arith.constant dense<0.000000e+00> : vector<16x512xf32>
    %177 = tpu.matmul %175, %176, %cst_65 {dimension_numbers = #tpu.dot_dimension_numbers<[1], [0], [0], [1], [0, 0, 1, 1], [], []>} : vector<16x128xbf16>, vector<128x512xbf16>, vector<16x512xf32> -> vector<16x512xf32>
    %178 = arith.addf %174, %177 : vector<16x512xf32>
    %179 = vector.broadcast %3 : vector<1x512xf32> to vector<16x512xf32>
    %180 = arith.addf %178, %179 : vector<16x512xf32>
    %181 = vector.extract_strided_slice %180 {offsets = [0, 0], sizes = [16, 128], strides = [1, 1]} : vector<16x512xf32> to vector<16x128xf32>
    %182 = arith.negf %181 : vector<16x128xf32>
    %183 = math.exp %182 : vector<16x128xf32>
    %cst_66 = arith.constant 1.000000e+00 : f32
    %184 = vector.broadcast %cst_66 : f32 to vector<16x128xf32>
    %185 = arith.addf %184, %183 : vector<16x128xf32>
    %186 = arith.divf %184, %185 : vector<16x128xf32>
    %187 = vector.extract_strided_slice %180 {offsets = [0, 128], sizes = [16, 128], strides = [1, 1]} : vector<16x512xf32> to vector<16x128xf32>
    %188 = arith.negf %187 : vector<16x128xf32>
    %189 = math.exp %188 : vector<16x128xf32>
    %cst_67 = arith.constant 1.000000e+00 : f32
    %190 = vector.broadcast %cst_67 : f32 to vector<16x128xf32>
    %191 = arith.addf %190, %189 : vector<16x128xf32>
    %192 = arith.divf %190, %191 : vector<16x128xf32>
    %193 = vector.extract_strided_slice %180 {offsets = [0, 256], sizes = [16, 128], strides = [1, 1]} : vector<16x512xf32> to vector<16x128xf32>
    %194 = math.tanh %193 : vector<16x128xf32>
    %195 = vector.extract_strided_slice %180 {offsets = [0, 384], sizes = [16, 128], strides = [1, 1]} : vector<16x512xf32> to vector<16x128xf32>
    %196 = arith.negf %195 : vector<16x128xf32>
    %197 = math.exp %196 : vector<16x128xf32>
    %cst_68 = arith.constant 1.000000e+00 : f32
    %198 = vector.broadcast %cst_68 : f32 to vector<16x128xf32>
    %199 = arith.addf %198, %197 : vector<16x128xf32>
    %200 = arith.divf %198, %199 : vector<16x128xf32>
    %201 = arith.mulf %192, %162 : vector<16x128xf32>
    %202 = arith.mulf %186, %194 : vector<16x128xf32>
    %203 = arith.addf %201, %202 : vector<16x128xf32>
    %204 = math.tanh %203 : vector<16x128xf32>
    %205 = arith.mulf %200, %204 : vector<16x128xf32>
    %206 = arith.truncf %205 : vector<16x128xf32> to vector<16x128xbf16>
    %207 = arith.index_cast %c4_i32 : i32 to index
    %c0_69 = arith.constant 0 : index
    %c0_70 = arith.constant 0 : index
    %208 = vector.load %arg6[%207, %c0_69, %c0_70] : memref<8x16x128xbf16, #tpu.memory_space<vmem>>, vector<1x16x128xbf16>
    %209 = vector.shape_cast %208 : vector<1x16x128xbf16> to vector<16x128xbf16>
    %210 = vector.shape_cast %206 : vector<16x128xbf16> to vector<1x16x128xbf16>
    tpu.vector_store %arg6[%207, %c0_69, %c0_70], %210 {strides = array<i32>} : memref<8x16x128xbf16, #tpu.memory_space<vmem>>, vector<1x16x128xbf16>,
    %c5_i32 = arith.constant 5 : i32
    %211 = arith.index_cast %c5_i32 : i32 to index
    %c0_71 = arith.constant 0 : index
    %c0_72 = arith.constant 0 : index
    %212 = vector.load %arg2[%211, %c0_71, %c0_72] : memref<8x16x128xbf16, #tpu.memory_space<vmem>>, vector<1x16x128xbf16>
    %213 = vector.shape_cast %212 : vector<1x16x128xbf16> to vector<16x128xbf16>
    %c0_73 = arith.constant 0 : index
    %c0_74 = arith.constant 0 : index
    %214 = vector.load %arg3[%c0_73, %c0_74] : memref<128x512xbf16, #tpu.memory_space<vmem>>, vector<128x512xbf16>
    %cst_75 = arith.constant dense<0.000000e+00> : vector<16x512xf32>
    %215 = tpu.matmul %213, %214, %cst_75 {dimension_numbers = #tpu.dot_dimension_numbers<[1], [0], [0], [1], [0, 0, 1, 1], [], []>} : vector<16x128xbf16>, vector<128x512xbf16>, vector<16x512xf32> -> vector<16x512xf32>
    %216 = arith.truncf %205 : vector<16x128xf32> to vector<16x128xbf16>
    %c0_76 = arith.constant 0 : index
    %c0_77 = arith.constant 0 : index
    %217 = vector.load %arg4[%c0_76, %c0_77] : memref<128x512xbf16, #tpu.memory_space<vmem>>, vector<128x512xbf16>
    %cst_78 = arith.constant dense<0.000000e+00> : vector<16x512xf32>
    %218 = tpu.matmul %216, %217, %cst_78 {dimension_numbers = #tpu.dot_dimension_numbers<[1], [0], [0], [1], [0, 0, 1, 1], [], []>} : vector<16x128xbf16>, vector<128x512xbf16>, vector<16x512xf32> -> vector<16x512xf32>
    %219 = arith.addf %215, %218 : vector<16x512xf32>
    %220 = vector.broadcast %3 : vector<1x512xf32> to vector<16x512xf32>
    %221 = arith.addf %219, %220 : vector<16x512xf32>
    %222 = vector.extract_strided_slice %221 {offsets = [0, 0], sizes = [16, 128], strides = [1, 1]} : vector<16x512xf32> to vector<16x128xf32>
    %223 = arith.negf %222 : vector<16x128xf32>
    %224 = math.exp %223 : vector<16x128xf32>
    %cst_79 = arith.constant 1.000000e+00 : f32
    %225 = vector.broadcast %cst_79 : f32 to vector<16x128xf32>
    %226 = arith.addf %225, %224 : vector<16x128xf32>
    %227 = arith.divf %225, %226 : vector<16x128xf32>
    %228 = vector.extract_strided_slice %221 {offsets = [0, 128], sizes = [16, 128], strides = [1, 1]} : vector<16x512xf32> to vector<16x128xf32>
    %229 = arith.negf %228 : vector<16x128xf32>
    %230 = math.exp %229 : vector<16x128xf32>
    %cst_80 = arith.constant 1.000000e+00 : f32
    %231 = vector.broadcast %cst_80 : f32 to vector<16x128xf32>
    %232 = arith.addf %231, %230 : vector<16x128xf32>
    %233 = arith.divf %231, %232 : vector<16x128xf32>
    %234 = vector.extract_strided_slice %221 {offsets = [0, 256], sizes = [16, 128], strides = [1, 1]} : vector<16x512xf32> to vector<16x128xf32>
    %235 = math.tanh %234 : vector<16x128xf32>
    %236 = vector.extract_strided_slice %221 {offsets = [0, 384], sizes = [16, 128], strides = [1, 1]} : vector<16x512xf32> to vector<16x128xf32>
    %237 = arith.negf %236 : vector<16x128xf32>
    %238 = math.exp %237 : vector<16x128xf32>
    %cst_81 = arith.constant 1.000000e+00 : f32
    %239 = vector.broadcast %cst_81 : f32 to vector<16x128xf32>
    %240 = arith.addf %239, %238 : vector<16x128xf32>
    %241 = arith.divf %239, %240 : vector<16x128xf32>
    %242 = arith.mulf %233, %203 : vector<16x128xf32>
    %243 = arith.mulf %227, %235 : vector<16x128xf32>
    %244 = arith.addf %242, %243 : vector<16x128xf32>
    %245 = math.tanh %244 : vector<16x128xf32>
    %246 = arith.mulf %241, %245 : vector<16x128xf32>
    %247 = arith.truncf %246 : vector<16x128xf32> to vector<16x128xbf16>
    %248 = arith.index_cast %c5_i32 : i32 to index
    %c0_82 = arith.constant 0 : index
    %c0_83 = arith.constant 0 : index
    %249 = vector.load %arg6[%248, %c0_82, %c0_83] : memref<8x16x128xbf16, #tpu.memory_space<vmem>>, vector<1x16x128xbf16>
    %250 = vector.shape_cast %249 : vector<1x16x128xbf16> to vector<16x128xbf16>
    %251 = vector.shape_cast %247 : vector<16x128xbf16> to vector<1x16x128xbf16>
    tpu.vector_store %arg6[%248, %c0_82, %c0_83], %251 {strides = array<i32>} : memref<8x16x128xbf16, #tpu.memory_space<vmem>>, vector<1x16x128xbf16>,
    %c6_i32 = arith.constant 6 : i32
    %252 = arith.index_cast %c6_i32 : i32 to index
    %c0_84 = arith.constant 0 : index
    %c0_85 = arith.constant 0 : index
    %253 = vector.load %arg2[%252, %c0_84, %c0_85] : memref<8x16x128xbf16, #tpu.memory_space<vmem>>, vector<1x16x128xbf16>
    %254 = vector.shape_cast %253 : vector<1x16x128xbf16> to vector<16x128xbf16>
    %c0_86 = arith.constant 0 : index
    %c0_87 = arith.constant 0 : index
    %255 = vector.load %arg3[%c0_86, %c0_87] : memref<128x512xbf16, #tpu.memory_space<vmem>>, vector<128x512xbf16>
    %cst_88 = arith.constant dense<0.000000e+00> : vector<16x512xf32>
    %256 = tpu.matmul %254, %255, %cst_88 {dimension_numbers = #tpu.dot_dimension_numbers<[1], [0], [0], [1], [0, 0, 1, 1], [], []>} : vector<16x128xbf16>, vector<128x512xbf16>, vector<16x512xf32> -> vector<16x512xf32>
    %257 = arith.truncf %246 : vector<16x128xf32> to vector<16x128xbf16>
    %c0_89 = arith.constant 0 : index
    %c0_90 = arith.constant 0 : index
    %258 = vector.load %arg4[%c0_89, %c0_90] : memref<128x512xbf16, #tpu.memory_space<vmem>>, vector<128x512xbf16>
    %cst_91 = arith.constant dense<0.000000e+00> : vector<16x512xf32>
    %259 = tpu.matmul %257, %258, %cst_91 {dimension_numbers = #tpu.dot_dimension_numbers<[1], [0], [0], [1], [0, 0, 1, 1], [], []>} : vector<16x128xbf16>, vector<128x512xbf16>, vector<16x512xf32> -> vector<16x512xf32>
    %260 = arith.addf %256, %259 : vector<16x512xf32>
    %261 = vector.broadcast %3 : vector<1x512xf32> to vector<16x512xf32>
    %262 = arith.addf %260, %261 : vector<16x512xf32>
    %263 = vector.extract_strided_slice %262 {offsets = [0, 0], sizes = [16, 128], strides = [1, 1]} : vector<16x512xf32> to vector<16x128xf32>
    %264 = arith.negf %263 : vector<16x128xf32>
    %265 = math.exp %264 : vector<16x128xf32>
    %cst_92 = arith.constant 1.000000e+00 : f32
    %266 = vector.broadcast %cst_92 : f32 to vector<16x128xf32>
    %267 = arith.addf %266, %265 : vector<16x128xf32>
    %268 = arith.divf %266, %267 : vector<16x128xf32>
    %269 = vector.extract_strided_slice %262 {offsets = [0, 128], sizes = [16, 128], strides = [1, 1]} : vector<16x512xf32> to vector<16x128xf32>
    %270 = arith.negf %269 : vector<16x128xf32>
    %271 = math.exp %270 : vector<16x128xf32>
    %cst_93 = arith.constant 1.000000e+00 : f32
    %272 = vector.broadcast %cst_93 : f32 to vector<16x128xf32>
    %273 = arith.addf %272, %271 : vector<16x128xf32>
    %274 = arith.divf %272, %273 : vector<16x128xf32>
    %275 = vector.extract_strided_slice %262 {offsets = [0, 256], sizes = [16, 128], strides = [1, 1]} : vector<16x512xf32> to vector<16x128xf32>
    %276 = math.tanh %275 : vector<16x128xf32>
    %277 = vector.extract_strided_slice %262 {offsets = [0, 384], sizes = [16, 128], strides = [1, 1]} : vector<16x512xf32> to vector<16x128xf32>
    %278 = arith.negf %277 : vector<16x128xf32>
    %279 = math.exp %278 : vector<16x128xf32>
    %cst_94 = arith.constant 1.000000e+00 : f32
    %280 = vector.broadcast %cst_94 : f32 to vector<16x128xf32>
    %281 = arith.addf %280, %279 : vector<16x128xf32>
    %282 = arith.divf %280, %281 : vector<16x128xf32>
    %283 = arith.mulf %274, %244 : vector<16x128xf32>
    %284 = arith.mulf %268, %276 : vector<16x128xf32>
    %285 = arith.addf %283, %284 : vector<16x128xf32>
    %286 = math.tanh %285 : vector<16x128xf32>
    %287 = arith.mulf %282, %286 : vector<16x128xf32>
    %288 = arith.truncf %287 : vector<16x128xf32> to vector<16x128xbf16>
    %289 = arith.index_cast %c6_i32 : i32 to index
    %c0_95 = arith.constant 0 : index
    %c0_96 = arith.constant 0 : index
    %290 = vector.load %arg6[%289, %c0_95, %c0_96] : memref<8x16x128xbf16, #tpu.memory_space<vmem>>, vector<1x16x128xbf16>
    %291 = vector.shape_cast %290 : vector<1x16x128xbf16> to vector<16x128xbf16>
    %292 = vector.shape_cast %288 : vector<16x128xbf16> to vector<1x16x128xbf16>
    tpu.vector_store %arg6[%289, %c0_95, %c0_96], %292 {strides = array<i32>} : memref<8x16x128xbf16, #tpu.memory_space<vmem>>, vector<1x16x128xbf16>,
    %c7_i32 = arith.constant 7 : i32
    %293 = arith.index_cast %c7_i32 : i32 to index
    %c0_97 = arith.constant 0 : index
    %c0_98 = arith.constant 0 : index
    %294 = vector.load %arg2[%293, %c0_97, %c0_98] : memref<8x16x128xbf16, #tpu.memory_space<vmem>>, vector<1x16x128xbf16>
    %295 = vector.shape_cast %294 : vector<1x16x128xbf16> to vector<16x128xbf16>
    %c0_99 = arith.constant 0 : index
    %c0_100 = arith.constant 0 : index
    %296 = vector.load %arg3[%c0_99, %c0_100] : memref<128x512xbf16, #tpu.memory_space<vmem>>, vector<128x512xbf16>
    %cst_101 = arith.constant dense<0.000000e+00> : vector<16x512xf32>
    %297 = tpu.matmul %295, %296, %cst_101 {dimension_numbers = #tpu.dot_dimension_numbers<[1], [0], [0], [1], [0, 0, 1, 1], [], []>} : vector<16x128xbf16>, vector<128x512xbf16>, vector<16x512xf32> -> vector<16x512xf32>
    %298 = arith.truncf %287 : vector<16x128xf32> to vector<16x128xbf16>
    %c0_102 = arith.constant 0 : index
    %c0_103 = arith.constant 0 : index
    %299 = vector.load %arg4[%c0_102, %c0_103] : memref<128x512xbf16, #tpu.memory_space<vmem>>, vector<128x512xbf16>
    %cst_104 = arith.constant dense<0.000000e+00> : vector<16x512xf32>
    %300 = tpu.matmul %298, %299, %cst_104 {dimension_numbers = #tpu.dot_dimension_numbers<[1], [0], [0], [1], [0, 0, 1, 1], [], []>} : vector<16x128xbf16>, vector<128x512xbf16>, vector<16x512xf32> -> vector<16x512xf32>
    %301 = arith.addf %297, %300 : vector<16x512xf32>
    %302 = vector.broadcast %3 : vector<1x512xf32> to vector<16x512xf32>
    %303 = arith.addf %301, %302 : vector<16x512xf32>
    %304 = vector.extract_strided_slice %303 {offsets = [0, 0], sizes = [16, 128], strides = [1, 1]} : vector<16x512xf32> to vector<16x128xf32>
    %305 = arith.negf %304 : vector<16x128xf32>
    %306 = math.exp %305 : vector<16x128xf32>
    %cst_105 = arith.constant 1.000000e+00 : f32
    %307 = vector.broadcast %cst_105 : f32 to vector<16x128xf32>
    %308 = arith.addf %307, %306 : vector<16x128xf32>
    %309 = arith.divf %307, %308 : vector<16x128xf32>
    %310 = vector.extract_strided_slice %303 {offsets = [0, 128], sizes = [16, 128], strides = [1, 1]} : vector<16x512xf32> to vector<16x128xf32>
    %311 = arith.negf %310 : vector<16x128xf32>
    %312 = math.exp %311 : vector<16x128xf32>
    %cst_106 = arith.constant 1.000000e+00 : f32
    %313 = vector.broadcast %cst_106 : f32 to vector<16x128xf32>
    %314 = arith.addf %313, %312 : vector<16x128xf32>
    %315 = arith.divf %313, %314 : vector<16x128xf32>
    %316 = vector.extract_strided_slice %303 {offsets = [0, 256], sizes = [16, 128], strides = [1, 1]} : vector<16x512xf32> to vector<16x128xf32>
    %317 = math.tanh %316 : vector<16x128xf32>
    %318 = vector.extract_strided_slice %303 {offsets = [0, 384], sizes = [16, 128], strides = [1, 1]} : vector<16x512xf32> to vector<16x128xf32>
    %319 = arith.negf %318 : vector<16x128xf32>
    %320 = math.exp %319 : vector<16x128xf32>
    %cst_107 = arith.constant 1.000000e+00 : f32
    %321 = vector.broadcast %cst_107 : f32 to vector<16x128xf32>
    %322 = arith.addf %321, %320 : vector<16x128xf32>
    %323 = arith.divf %321, %322 : vector<16x128xf32>
    %324 = arith.mulf %315, %285 : vector<16x128xf32>
    %325 = arith.mulf %309, %317 : vector<16x128xf32>
    %326 = arith.addf %324, %325 : vector<16x128xf32>
    %327 = math.tanh %326 : vector<16x128xf32>
    %328 = arith.mulf %323, %327 : vector<16x128xf32>
    %329 = arith.truncf %328 : vector<16x128xf32> to vector<16x128xbf16>
    %330 = arith.index_cast %c7_i32 : i32 to index
    %c0_108 = arith.constant 0 : index
    %c0_109 = arith.constant 0 : index
    %331 = vector.load %arg6[%330, %c0_108, %c0_109] : memref<8x16x128xbf16, #tpu.memory_space<vmem>>, vector<1x16x128xbf16>
    %332 = vector.shape_cast %331 : vector<1x16x128xbf16> to vector<16x128xbf16>
    %333 = vector.shape_cast %329 : vector<16x128xbf16> to vector<1x16x128xbf16>
    tpu.vector_store %arg6[%330, %c0_108, %c0_109], %333 {strides = array<i32>} : memref<8x16x128xbf16, #tpu.memory_space<vmem>>, vector<1x16x128xbf16>,
    %c8_i32 = arith.constant 8 : i32
    %c0_110 = arith.constant 0 : index
    %c0_111 = arith.constant 0 : index
    %334 = vector.load %arg7[%c0_110, %c0_111] : memref<16x128xf32, #tpu.memory_space<vmem>>, vector<16x128xf32>
    tpu.vector_store %arg7[%c0_110, %c0_111], %328 {strides = array<i32>} : memref<16x128xf32, #tpu.memory_space<vmem>>, vector<16x128xf32>,
    %c0_112 = arith.constant 0 : index
    %c0_113 = arith.constant 0 : index
    %335 = vector.load %arg8[%c0_112, %c0_113] : memref<16x128xf32, #tpu.memory_space<vmem>>, vector<16x128xf32>
    tpu.vector_store %arg8[%c0_112, %c0_113], %326 {strides = array<i32>} : memref<16x128xf32, #tpu.memory_space<vmem>>, vector<16x128xf32>,
    return
  }
  func.func @transform_0(%arg0: i32, %arg1: i32) -> (i32, i32, i32) {
    %c0_i32 = arith.constant 0 : i32
    %c0_i32_0 = arith.constant 0 : i32
    return %arg1, %arg0, %c0_i32 : i32, i32, i32
  }
  func.func @transform_1(%arg0: i32, %arg1: i32) -> (i32, i32) {
    %c0_i32 = arith.constant 0 : i32
    %c0_i32_0 = arith.constant 0 : i32
    %c0_i32_1 = arith.constant 0 : i32
    return %c0_i32, %c0_i32_0 : i32, i32
  }
  func.func @transform_2(%arg0: i32, %arg1: i32) -> (i32, i32) {
    %c0_i32 = arith.constant 0 : i32
    %c0_i32_0 = arith.constant 0 : i32
    %c0_i32_1 = arith.constant 0 : i32
    return %c0_i32, %c0_i32_0 : i32, i32
  }
  func.func @transform_3(%arg0: i32, %arg1: i32) -> (i32, i32) {
    %c0_i32 = arith.constant 0 : i32
    %c0_i32_0 = arith.constant 0 : i32
    %c0_i32_1 = arith.constant 0 : i32
    return %c0_i32, %c0_i32_0 : i32, i32
  }
  func.func @transform_4(%arg0: i32, %arg1: i32) -> (i32, i32, i32) {
    %c0_i32 = arith.constant 0 : i32
    %c0_i32_0 = arith.constant 0 : i32
    return %arg1, %arg0, %c0_i32 : i32, i32, i32
  }
  func.func @transform_5(%arg0: i32, %arg1: i32) -> (i32, i32) {
    %c0_i32 = arith.constant 0 : i32
    %c0_i32_0 = arith.constant 0 : i32
    return %arg0, %c0_i32 : i32, i32
  }
  func.func @transform_6(%arg0: i32, %arg1: i32) -> (i32, i32) {
    %c0_i32 = arith.constant 0 : i32
    %c0_i32_0 = arith.constant 0 : i32
    return %arg0, %c0_i32 : i32, i32
  }
}

module attributes {stable_mosaic.version = 11 : i64} {
  func.func @_lstm_chunk_kernel(%arg0: i32, %arg1: i32, %arg2: memref<8x16x128xbf16, #tpu.memory_space<vmem>>, %arg3: memref<128x512xbf16, #tpu.memory_space<vmem>>, %arg4: memref<128x512xbf16, #tpu.memory_space<vmem>>, %arg5: memref<1x512xf32, #tpu.memory_space<vmem>>, %arg6: memref<16x128xf32, #tpu.memory_space<vmem>>, %arg7: memref<16x128xf32, #tpu.memory_space<vmem>>) attributes {dimension_semantics = [#tpu.dimension_semantics<parallel>, #tpu.dimension_semantics<arbitrary>], iteration_bounds = array<i64: 1, 1>, scalar_prefetch = 0 : i64, scratch_operands = 0 : i64, tpu.core_type = #tpu.core_type<tc>, window_params = [{transform_indices = @transform_0, window_bounds = array<i64: 8, 16, 128>}, {pipeline_mode = #tpu.pipeline_mode<synchronous>, transform_indices = @transform_1, window_bounds = array<i64: 128, 512>}, {pipeline_mode = #tpu.pipeline_mode<synchronous>, transform_indices = @transform_2, window_bounds = array<i64: 128, 512>}, {pipeline_mode = #tpu.pipeline_mode<synchronous>, transform_indices = @transform_3, window_bounds = array<i64: 1, 512>}, {transform_indices = @transform_4, window_bounds = array<i64: 16, 128>}, {transform_indices = @transform_5, window_bounds = array<i64: 16, 128>}]} {
    %c0_i32 = arith.constant 0 : i32
    %0 = arith.cmpi eq, %arg1, %c0_i32 : i32
    %1 = arith.extui %0 : i1 to i32
    %c0_i32_0 = arith.constant 0 : i32
    %2 = arith.cmpi ne, %1, %c0_i32_0 : i32
    scf.if %2 {
      %cst_98 = arith.constant 0.000000e+00 : f32
      %296 = vector.broadcast %cst_98 : f32 to vector<16x128xf32>
      %c0_99 = arith.constant 0 : index
      %c0_100 = arith.constant 0 : index
      %297 = vector.load %arg6[%c0_99, %c0_100] : memref<16x128xf32, #tpu.memory_space<vmem>>, vector<16x128xf32>
      tpu.vector_store %arg6[%c0_99, %c0_100], %296 {strides = array<i32>} : memref<16x128xf32, #tpu.memory_space<vmem>>, vector<16x128xf32>,
      %cst_101 = arith.constant 0.000000e+00 : f32
      %298 = vector.broadcast %cst_101 : f32 to vector<16x128xf32>
      %c0_102 = arith.constant 0 : index
      %c0_103 = arith.constant 0 : index
      %299 = vector.load %arg7[%c0_102, %c0_103] : memref<16x128xf32, #tpu.memory_space<vmem>>, vector<16x128xf32>
      tpu.vector_store %arg7[%c0_102, %c0_103], %298 {strides = array<i32>} : memref<16x128xf32, #tpu.memory_space<vmem>>, vector<16x128xf32>,
    } else {
    }
    %c0 = arith.constant 0 : index
    %c0_1 = arith.constant 0 : index
    %3 = vector.load %arg5[%c0, %c0_1] : memref<1x512xf32, #tpu.memory_space<vmem>>, vector<1x512xf32>
    %c0_2 = arith.constant 0 : index
    %c0_3 = arith.constant 0 : index
    %4 = vector.load %arg6[%c0_2, %c0_3] : memref<16x128xf32, #tpu.memory_space<vmem>>, vector<16x128xf32>
    %c0_4 = arith.constant 0 : index
    %c0_5 = arith.constant 0 : index
    %5 = vector.load %arg7[%c0_4, %c0_5] : memref<16x128xf32, #tpu.memory_space<vmem>>, vector<16x128xf32>
    %c0_i32_6 = arith.constant 0 : i32
    %6 = arith.index_cast %c0_i32_6 : i32 to index
    %c0_7 = arith.constant 0 : index
    %c0_8 = arith.constant 0 : index
    %7 = vector.load %arg2[%6, %c0_7, %c0_8] : memref<8x16x128xbf16, #tpu.memory_space<vmem>>, vector<1x16x128xbf16>
    %8 = vector.shape_cast %7 : vector<1x16x128xbf16> to vector<16x128xbf16>
    %c0_9 = arith.constant 0 : index
    %c0_10 = arith.constant 0 : index
    %9 = vector.load %arg3[%c0_9, %c0_10] : memref<128x512xbf16, #tpu.memory_space<vmem>>, vector<128x512xbf16>
    %cst = arith.constant dense<0.000000e+00> : vector<16x512xf32>
    %10 = tpu.matmul %8, %9, %cst {dimension_numbers = #tpu.dot_dimension_numbers<[1], [0], [0], [1], [0, 0, 1, 1], [], []>} : vector<16x128xbf16>, vector<128x512xbf16>, vector<16x512xf32> -> vector<16x512xf32>
    %11 = arith.truncf %4 : vector<16x128xf32> to vector<16x128xbf16>
    %c0_11 = arith.constant 0 : index
    %c0_12 = arith.constant 0 : index
    %12 = vector.load %arg4[%c0_11, %c0_12] : memref<128x512xbf16, #tpu.memory_space<vmem>>, vector<128x512xbf16>
    %cst_13 = arith.constant dense<0.000000e+00> : vector<16x512xf32>
    %13 = tpu.matmul %11, %12, %cst_13 {dimension_numbers = #tpu.dot_dimension_numbers<[1], [0], [0], [1], [0, 0, 1, 1], [], []>} : vector<16x128xbf16>, vector<128x512xbf16>, vector<16x512xf32> -> vector<16x512xf32>
    %14 = arith.addf %10, %13 : vector<16x512xf32>
    %15 = vector.broadcast %3 : vector<1x512xf32> to vector<16x512xf32>
    %16 = arith.addf %14, %15 : vector<16x512xf32>
    %17 = vector.extract_strided_slice %16 {offsets = [0, 0], sizes = [16, 128], strides = [1, 1]} : vector<16x512xf32> to vector<16x128xf32>
    %18 = arith.negf %17 : vector<16x128xf32>
    %19 = math.exp %18 : vector<16x128xf32>
    %cst_14 = arith.constant 1.000000e+00 : f32
    %20 = vector.broadcast %cst_14 : f32 to vector<16x128xf32>
    %21 = arith.addf %20, %19 : vector<16x128xf32>
    %22 = arith.divf %20, %21 : vector<16x128xf32>
    %23 = vector.extract_strided_slice %16 {offsets = [0, 128], sizes = [16, 128], strides = [1, 1]} : vector<16x512xf32> to vector<16x128xf32>
    %24 = arith.negf %23 : vector<16x128xf32>
    %25 = math.exp %24 : vector<16x128xf32>
    %cst_15 = arith.constant 1.000000e+00 : f32
    %26 = vector.broadcast %cst_15 : f32 to vector<16x128xf32>
    %27 = arith.addf %26, %25 : vector<16x128xf32>
    %28 = arith.divf %26, %27 : vector<16x128xf32>
    %29 = vector.extract_strided_slice %16 {offsets = [0, 256], sizes = [16, 128], strides = [1, 1]} : vector<16x512xf32> to vector<16x128xf32>
    %30 = math.tanh %29 : vector<16x128xf32>
    %31 = vector.extract_strided_slice %16 {offsets = [0, 384], sizes = [16, 128], strides = [1, 1]} : vector<16x512xf32> to vector<16x128xf32>
    %32 = arith.negf %31 : vector<16x128xf32>
    %33 = math.exp %32 : vector<16x128xf32>
    %cst_16 = arith.constant 1.000000e+00 : f32
    %34 = vector.broadcast %cst_16 : f32 to vector<16x128xf32>
    %35 = arith.addf %34, %33 : vector<16x128xf32>
    %36 = arith.divf %34, %35 : vector<16x128xf32>
    %37 = arith.mulf %28, %5 : vector<16x128xf32>
    %38 = arith.mulf %22, %30 : vector<16x128xf32>
    %39 = arith.addf %37, %38 : vector<16x128xf32>
    %40 = math.tanh %39 : vector<16x128xf32>
    %41 = arith.mulf %36, %40 : vector<16x128xf32>
    %c1_i32 = arith.constant 1 : i32
    %42 = arith.index_cast %c1_i32 : i32 to index
    %c0_17 = arith.constant 0 : index
    %c0_18 = arith.constant 0 : index
    %43 = vector.load %arg2[%42, %c0_17, %c0_18] : memref<8x16x128xbf16, #tpu.memory_space<vmem>>, vector<1x16x128xbf16>
    %44 = vector.shape_cast %43 : vector<1x16x128xbf16> to vector<16x128xbf16>
    %c0_19 = arith.constant 0 : index
    %c0_20 = arith.constant 0 : index
    %45 = vector.load %arg3[%c0_19, %c0_20] : memref<128x512xbf16, #tpu.memory_space<vmem>>, vector<128x512xbf16>
    %cst_21 = arith.constant dense<0.000000e+00> : vector<16x512xf32>
    %46 = tpu.matmul %44, %45, %cst_21 {dimension_numbers = #tpu.dot_dimension_numbers<[1], [0], [0], [1], [0, 0, 1, 1], [], []>} : vector<16x128xbf16>, vector<128x512xbf16>, vector<16x512xf32> -> vector<16x512xf32>
    %47 = arith.truncf %41 : vector<16x128xf32> to vector<16x128xbf16>
    %c0_22 = arith.constant 0 : index
    %c0_23 = arith.constant 0 : index
    %48 = vector.load %arg4[%c0_22, %c0_23] : memref<128x512xbf16, #tpu.memory_space<vmem>>, vector<128x512xbf16>
    %cst_24 = arith.constant dense<0.000000e+00> : vector<16x512xf32>
    %49 = tpu.matmul %47, %48, %cst_24 {dimension_numbers = #tpu.dot_dimension_numbers<[1], [0], [0], [1], [0, 0, 1, 1], [], []>} : vector<16x128xbf16>, vector<128x512xbf16>, vector<16x512xf32> -> vector<16x512xf32>
    %50 = arith.addf %46, %49 : vector<16x512xf32>
    %51 = vector.broadcast %3 : vector<1x512xf32> to vector<16x512xf32>
    %52 = arith.addf %50, %51 : vector<16x512xf32>
    %53 = vector.extract_strided_slice %52 {offsets = [0, 0], sizes = [16, 128], strides = [1, 1]} : vector<16x512xf32> to vector<16x128xf32>
    %54 = arith.negf %53 : vector<16x128xf32>
    %55 = math.exp %54 : vector<16x128xf32>
    %cst_25 = arith.constant 1.000000e+00 : f32
    %56 = vector.broadcast %cst_25 : f32 to vector<16x128xf32>
    %57 = arith.addf %56, %55 : vector<16x128xf32>
    %58 = arith.divf %56, %57 : vector<16x128xf32>
    %59 = vector.extract_strided_slice %52 {offsets = [0, 128], sizes = [16, 128], strides = [1, 1]} : vector<16x512xf32> to vector<16x128xf32>
    %60 = arith.negf %59 : vector<16x128xf32>
    %61 = math.exp %60 : vector<16x128xf32>
    %cst_26 = arith.constant 1.000000e+00 : f32
    %62 = vector.broadcast %cst_26 : f32 to vector<16x128xf32>
    %63 = arith.addf %62, %61 : vector<16x128xf32>
    %64 = arith.divf %62, %63 : vector<16x128xf32>
    %65 = vector.extract_strided_slice %52 {offsets = [0, 256], sizes = [16, 128], strides = [1, 1]} : vector<16x512xf32> to vector<16x128xf32>
    %66 = math.tanh %65 : vector<16x128xf32>
    %67 = vector.extract_strided_slice %52 {offsets = [0, 384], sizes = [16, 128], strides = [1, 1]} : vector<16x512xf32> to vector<16x128xf32>
    %68 = arith.negf %67 : vector<16x128xf32>
    %69 = math.exp %68 : vector<16x128xf32>
    %cst_27 = arith.constant 1.000000e+00 : f32
    %70 = vector.broadcast %cst_27 : f32 to vector<16x128xf32>
    %71 = arith.addf %70, %69 : vector<16x128xf32>
    %72 = arith.divf %70, %71 : vector<16x128xf32>
    %73 = arith.mulf %64, %39 : vector<16x128xf32>
    %74 = arith.mulf %58, %66 : vector<16x128xf32>
    %75 = arith.addf %73, %74 : vector<16x128xf32>
    %76 = math.tanh %75 : vector<16x128xf32>
    %77 = arith.mulf %72, %76 : vector<16x128xf32>
    %c2_i32 = arith.constant 2 : i32
    %78 = arith.index_cast %c2_i32 : i32 to index
    %c0_28 = arith.constant 0 : index
    %c0_29 = arith.constant 0 : index
    %79 = vector.load %arg2[%78, %c0_28, %c0_29] : memref<8x16x128xbf16, #tpu.memory_space<vmem>>, vector<1x16x128xbf16>
    %80 = vector.shape_cast %79 : vector<1x16x128xbf16> to vector<16x128xbf16>
    %c0_30 = arith.constant 0 : index
    %c0_31 = arith.constant 0 : index
    %81 = vector.load %arg3[%c0_30, %c0_31] : memref<128x512xbf16, #tpu.memory_space<vmem>>, vector<128x512xbf16>
    %cst_32 = arith.constant dense<0.000000e+00> : vector<16x512xf32>
    %82 = tpu.matmul %80, %81, %cst_32 {dimension_numbers = #tpu.dot_dimension_numbers<[1], [0], [0], [1], [0, 0, 1, 1], [], []>} : vector<16x128xbf16>, vector<128x512xbf16>, vector<16x512xf32> -> vector<16x512xf32>
    %83 = arith.truncf %77 : vector<16x128xf32> to vector<16x128xbf16>
    %c0_33 = arith.constant 0 : index
    %c0_34 = arith.constant 0 : index
    %84 = vector.load %arg4[%c0_33, %c0_34] : memref<128x512xbf16, #tpu.memory_space<vmem>>, vector<128x512xbf16>
    %cst_35 = arith.constant dense<0.000000e+00> : vector<16x512xf32>
    %85 = tpu.matmul %83, %84, %cst_35 {dimension_numbers = #tpu.dot_dimension_numbers<[1], [0], [0], [1], [0, 0, 1, 1], [], []>} : vector<16x128xbf16>, vector<128x512xbf16>, vector<16x512xf32> -> vector<16x512xf32>
    %86 = arith.addf %82, %85 : vector<16x512xf32>
    %87 = vector.broadcast %3 : vector<1x512xf32> to vector<16x512xf32>
    %88 = arith.addf %86, %87 : vector<16x512xf32>
    %89 = vector.extract_strided_slice %88 {offsets = [0, 0], sizes = [16, 128], strides = [1, 1]} : vector<16x512xf32> to vector<16x128xf32>
    %90 = arith.negf %89 : vector<16x128xf32>
    %91 = math.exp %90 : vector<16x128xf32>
    %cst_36 = arith.constant 1.000000e+00 : f32
    %92 = vector.broadcast %cst_36 : f32 to vector<16x128xf32>
    %93 = arith.addf %92, %91 : vector<16x128xf32>
    %94 = arith.divf %92, %93 : vector<16x128xf32>
    %95 = vector.extract_strided_slice %88 {offsets = [0, 128], sizes = [16, 128], strides = [1, 1]} : vector<16x512xf32> to vector<16x128xf32>
    %96 = arith.negf %95 : vector<16x128xf32>
    %97 = math.exp %96 : vector<16x128xf32>
    %cst_37 = arith.constant 1.000000e+00 : f32
    %98 = vector.broadcast %cst_37 : f32 to vector<16x128xf32>
    %99 = arith.addf %98, %97 : vector<16x128xf32>
    %100 = arith.divf %98, %99 : vector<16x128xf32>
    %101 = vector.extract_strided_slice %88 {offsets = [0, 256], sizes = [16, 128], strides = [1, 1]} : vector<16x512xf32> to vector<16x128xf32>
    %102 = math.tanh %101 : vector<16x128xf32>
    %103 = vector.extract_strided_slice %88 {offsets = [0, 384], sizes = [16, 128], strides = [1, 1]} : vector<16x512xf32> to vector<16x128xf32>
    %104 = arith.negf %103 : vector<16x128xf32>
    %105 = math.exp %104 : vector<16x128xf32>
    %cst_38 = arith.constant 1.000000e+00 : f32
    %106 = vector.broadcast %cst_38 : f32 to vector<16x128xf32>
    %107 = arith.addf %106, %105 : vector<16x128xf32>
    %108 = arith.divf %106, %107 : vector<16x128xf32>
    %109 = arith.mulf %100, %75 : vector<16x128xf32>
    %110 = arith.mulf %94, %102 : vector<16x128xf32>
    %111 = arith.addf %109, %110 : vector<16x128xf32>
    %112 = math.tanh %111 : vector<16x128xf32>
    %113 = arith.mulf %108, %112 : vector<16x128xf32>
    %c3_i32 = arith.constant 3 : i32
    %114 = arith.index_cast %c3_i32 : i32 to index
    %c0_39 = arith.constant 0 : index
    %c0_40 = arith.constant 0 : index
    %115 = vector.load %arg2[%114, %c0_39, %c0_40] : memref<8x16x128xbf16, #tpu.memory_space<vmem>>, vector<1x16x128xbf16>
    %116 = vector.shape_cast %115 : vector<1x16x128xbf16> to vector<16x128xbf16>
    %c0_41 = arith.constant 0 : index
    %c0_42 = arith.constant 0 : index
    %117 = vector.load %arg3[%c0_41, %c0_42] : memref<128x512xbf16, #tpu.memory_space<vmem>>, vector<128x512xbf16>
    %cst_43 = arith.constant dense<0.000000e+00> : vector<16x512xf32>
    %118 = tpu.matmul %116, %117, %cst_43 {dimension_numbers = #tpu.dot_dimension_numbers<[1], [0], [0], [1], [0, 0, 1, 1], [], []>} : vector<16x128xbf16>, vector<128x512xbf16>, vector<16x512xf32> -> vector<16x512xf32>
    %119 = arith.truncf %113 : vector<16x128xf32> to vector<16x128xbf16>
    %c0_44 = arith.constant 0 : index
    %c0_45 = arith.constant 0 : index
    %120 = vector.load %arg4[%c0_44, %c0_45] : memref<128x512xbf16, #tpu.memory_space<vmem>>, vector<128x512xbf16>
    %cst_46 = arith.constant dense<0.000000e+00> : vector<16x512xf32>
    %121 = tpu.matmul %119, %120, %cst_46 {dimension_numbers = #tpu.dot_dimension_numbers<[1], [0], [0], [1], [0, 0, 1, 1], [], []>} : vector<16x128xbf16>, vector<128x512xbf16>, vector<16x512xf32> -> vector<16x512xf32>
    %122 = arith.addf %118, %121 : vector<16x512xf32>
    %123 = vector.broadcast %3 : vector<1x512xf32> to vector<16x512xf32>
    %124 = arith.addf %122, %123 : vector<16x512xf32>
    %125 = vector.extract_strided_slice %124 {offsets = [0, 0], sizes = [16, 128], strides = [1, 1]} : vector<16x512xf32> to vector<16x128xf32>
    %126 = arith.negf %125 : vector<16x128xf32>
    %127 = math.exp %126 : vector<16x128xf32>
    %cst_47 = arith.constant 1.000000e+00 : f32
    %128 = vector.broadcast %cst_47 : f32 to vector<16x128xf32>
    %129 = arith.addf %128, %127 : vector<16x128xf32>
    %130 = arith.divf %128, %129 : vector<16x128xf32>
    %131 = vector.extract_strided_slice %124 {offsets = [0, 128], sizes = [16, 128], strides = [1, 1]} : vector<16x512xf32> to vector<16x128xf32>
    %132 = arith.negf %131 : vector<16x128xf32>
    %133 = math.exp %132 : vector<16x128xf32>
    %cst_48 = arith.constant 1.000000e+00 : f32
    %134 = vector.broadcast %cst_48 : f32 to vector<16x128xf32>
    %135 = arith.addf %134, %133 : vector<16x128xf32>
    %136 = arith.divf %134, %135 : vector<16x128xf32>
    %137 = vector.extract_strided_slice %124 {offsets = [0, 256], sizes = [16, 128], strides = [1, 1]} : vector<16x512xf32> to vector<16x128xf32>
    %138 = math.tanh %137 : vector<16x128xf32>
    %139 = vector.extract_strided_slice %124 {offsets = [0, 384], sizes = [16, 128], strides = [1, 1]} : vector<16x512xf32> to vector<16x128xf32>
    %140 = arith.negf %139 : vector<16x128xf32>
    %141 = math.exp %140 : vector<16x128xf32>
    %cst_49 = arith.constant 1.000000e+00 : f32
    %142 = vector.broadcast %cst_49 : f32 to vector<16x128xf32>
    %143 = arith.addf %142, %141 : vector<16x128xf32>
    %144 = arith.divf %142, %143 : vector<16x128xf32>
    %145 = arith.mulf %136, %111 : vector<16x128xf32>
    %146 = arith.mulf %130, %138 : vector<16x128xf32>
    %147 = arith.addf %145, %146 : vector<16x128xf32>
    %148 = math.tanh %147 : vector<16x128xf32>
    %149 = arith.mulf %144, %148 : vector<16x128xf32>
    %c4_i32 = arith.constant 4 : i32
    %150 = arith.index_cast %c4_i32 : i32 to index
    %c0_50 = arith.constant 0 : index
    %c0_51 = arith.constant 0 : index
    %151 = vector.load %arg2[%150, %c0_50, %c0_51] : memref<8x16x128xbf16, #tpu.memory_space<vmem>>, vector<1x16x128xbf16>
    %152 = vector.shape_cast %151 : vector<1x16x128xbf16> to vector<16x128xbf16>
    %c0_52 = arith.constant 0 : index
    %c0_53 = arith.constant 0 : index
    %153 = vector.load %arg3[%c0_52, %c0_53] : memref<128x512xbf16, #tpu.memory_space<vmem>>, vector<128x512xbf16>
    %cst_54 = arith.constant dense<0.000000e+00> : vector<16x512xf32>
    %154 = tpu.matmul %152, %153, %cst_54 {dimension_numbers = #tpu.dot_dimension_numbers<[1], [0], [0], [1], [0, 0, 1, 1], [], []>} : vector<16x128xbf16>, vector<128x512xbf16>, vector<16x512xf32> -> vector<16x512xf32>
    %155 = arith.truncf %149 : vector<16x128xf32> to vector<16x128xbf16>
    %c0_55 = arith.constant 0 : index
    %c0_56 = arith.constant 0 : index
    %156 = vector.load %arg4[%c0_55, %c0_56] : memref<128x512xbf16, #tpu.memory_space<vmem>>, vector<128x512xbf16>
    %cst_57 = arith.constant dense<0.000000e+00> : vector<16x512xf32>
    %157 = tpu.matmul %155, %156, %cst_57 {dimension_numbers = #tpu.dot_dimension_numbers<[1], [0], [0], [1], [0, 0, 1, 1], [], []>} : vector<16x128xbf16>, vector<128x512xbf16>, vector<16x512xf32> -> vector<16x512xf32>
    %158 = arith.addf %154, %157 : vector<16x512xf32>
    %159 = vector.broadcast %3 : vector<1x512xf32> to vector<16x512xf32>
    %160 = arith.addf %158, %159 : vector<16x512xf32>
    %161 = vector.extract_strided_slice %160 {offsets = [0, 0], sizes = [16, 128], strides = [1, 1]} : vector<16x512xf32> to vector<16x128xf32>
    %162 = arith.negf %161 : vector<16x128xf32>
    %163 = math.exp %162 : vector<16x128xf32>
    %cst_58 = arith.constant 1.000000e+00 : f32
    %164 = vector.broadcast %cst_58 : f32 to vector<16x128xf32>
    %165 = arith.addf %164, %163 : vector<16x128xf32>
    %166 = arith.divf %164, %165 : vector<16x128xf32>
    %167 = vector.extract_strided_slice %160 {offsets = [0, 128], sizes = [16, 128], strides = [1, 1]} : vector<16x512xf32> to vector<16x128xf32>
    %168 = arith.negf %167 : vector<16x128xf32>
    %169 = math.exp %168 : vector<16x128xf32>
    %cst_59 = arith.constant 1.000000e+00 : f32
    %170 = vector.broadcast %cst_59 : f32 to vector<16x128xf32>
    %171 = arith.addf %170, %169 : vector<16x128xf32>
    %172 = arith.divf %170, %171 : vector<16x128xf32>
    %173 = vector.extract_strided_slice %160 {offsets = [0, 256], sizes = [16, 128], strides = [1, 1]} : vector<16x512xf32> to vector<16x128xf32>
    %174 = math.tanh %173 : vector<16x128xf32>
    %175 = vector.extract_strided_slice %160 {offsets = [0, 384], sizes = [16, 128], strides = [1, 1]} : vector<16x512xf32> to vector<16x128xf32>
    %176 = arith.negf %175 : vector<16x128xf32>
    %177 = math.exp %176 : vector<16x128xf32>
    %cst_60 = arith.constant 1.000000e+00 : f32
    %178 = vector.broadcast %cst_60 : f32 to vector<16x128xf32>
    %179 = arith.addf %178, %177 : vector<16x128xf32>
    %180 = arith.divf %178, %179 : vector<16x128xf32>
    %181 = arith.mulf %172, %147 : vector<16x128xf32>
    %182 = arith.mulf %166, %174 : vector<16x128xf32>
    %183 = arith.addf %181, %182 : vector<16x128xf32>
    %184 = math.tanh %183 : vector<16x128xf32>
    %185 = arith.mulf %180, %184 : vector<16x128xf32>
    %c5_i32 = arith.constant 5 : i32
    %186 = arith.index_cast %c5_i32 : i32 to index
    %c0_61 = arith.constant 0 : index
    %c0_62 = arith.constant 0 : index
    %187 = vector.load %arg2[%186, %c0_61, %c0_62] : memref<8x16x128xbf16, #tpu.memory_space<vmem>>, vector<1x16x128xbf16>
    %188 = vector.shape_cast %187 : vector<1x16x128xbf16> to vector<16x128xbf16>
    %c0_63 = arith.constant 0 : index
    %c0_64 = arith.constant 0 : index
    %189 = vector.load %arg3[%c0_63, %c0_64] : memref<128x512xbf16, #tpu.memory_space<vmem>>, vector<128x512xbf16>
    %cst_65 = arith.constant dense<0.000000e+00> : vector<16x512xf32>
    %190 = tpu.matmul %188, %189, %cst_65 {dimension_numbers = #tpu.dot_dimension_numbers<[1], [0], [0], [1], [0, 0, 1, 1], [], []>} : vector<16x128xbf16>, vector<128x512xbf16>, vector<16x512xf32> -> vector<16x512xf32>
    %191 = arith.truncf %185 : vector<16x128xf32> to vector<16x128xbf16>
    %c0_66 = arith.constant 0 : index
    %c0_67 = arith.constant 0 : index
    %192 = vector.load %arg4[%c0_66, %c0_67] : memref<128x512xbf16, #tpu.memory_space<vmem>>, vector<128x512xbf16>
    %cst_68 = arith.constant dense<0.000000e+00> : vector<16x512xf32>
    %193 = tpu.matmul %191, %192, %cst_68 {dimension_numbers = #tpu.dot_dimension_numbers<[1], [0], [0], [1], [0, 0, 1, 1], [], []>} : vector<16x128xbf16>, vector<128x512xbf16>, vector<16x512xf32> -> vector<16x512xf32>
    %194 = arith.addf %190, %193 : vector<16x512xf32>
    %195 = vector.broadcast %3 : vector<1x512xf32> to vector<16x512xf32>
    %196 = arith.addf %194, %195 : vector<16x512xf32>
    %197 = vector.extract_strided_slice %196 {offsets = [0, 0], sizes = [16, 128], strides = [1, 1]} : vector<16x512xf32> to vector<16x128xf32>
    %198 = arith.negf %197 : vector<16x128xf32>
    %199 = math.exp %198 : vector<16x128xf32>
    %cst_69 = arith.constant 1.000000e+00 : f32
    %200 = vector.broadcast %cst_69 : f32 to vector<16x128xf32>
    %201 = arith.addf %200, %199 : vector<16x128xf32>
    %202 = arith.divf %200, %201 : vector<16x128xf32>
    %203 = vector.extract_strided_slice %196 {offsets = [0, 128], sizes = [16, 128], strides = [1, 1]} : vector<16x512xf32> to vector<16x128xf32>
    %204 = arith.negf %203 : vector<16x128xf32>
    %205 = math.exp %204 : vector<16x128xf32>
    %cst_70 = arith.constant 1.000000e+00 : f32
    %206 = vector.broadcast %cst_70 : f32 to vector<16x128xf32>
    %207 = arith.addf %206, %205 : vector<16x128xf32>
    %208 = arith.divf %206, %207 : vector<16x128xf32>
    %209 = vector.extract_strided_slice %196 {offsets = [0, 256], sizes = [16, 128], strides = [1, 1]} : vector<16x512xf32> to vector<16x128xf32>
    %210 = math.tanh %209 : vector<16x128xf32>
    %211 = vector.extract_strided_slice %196 {offsets = [0, 384], sizes = [16, 128], strides = [1, 1]} : vector<16x512xf32> to vector<16x128xf32>
    %212 = arith.negf %211 : vector<16x128xf32>
    %213 = math.exp %212 : vector<16x128xf32>
    %cst_71 = arith.constant 1.000000e+00 : f32
    %214 = vector.broadcast %cst_71 : f32 to vector<16x128xf32>
    %215 = arith.addf %214, %213 : vector<16x128xf32>
    %216 = arith.divf %214, %215 : vector<16x128xf32>
    %217 = arith.mulf %208, %183 : vector<16x128xf32>
    %218 = arith.mulf %202, %210 : vector<16x128xf32>
    %219 = arith.addf %217, %218 : vector<16x128xf32>
    %220 = math.tanh %219 : vector<16x128xf32>
    %221 = arith.mulf %216, %220 : vector<16x128xf32>
    %c6_i32 = arith.constant 6 : i32
    %222 = arith.index_cast %c6_i32 : i32 to index
    %c0_72 = arith.constant 0 : index
    %c0_73 = arith.constant 0 : index
    %223 = vector.load %arg2[%222, %c0_72, %c0_73] : memref<8x16x128xbf16, #tpu.memory_space<vmem>>, vector<1x16x128xbf16>
    %224 = vector.shape_cast %223 : vector<1x16x128xbf16> to vector<16x128xbf16>
    %c0_74 = arith.constant 0 : index
    %c0_75 = arith.constant 0 : index
    %225 = vector.load %arg3[%c0_74, %c0_75] : memref<128x512xbf16, #tpu.memory_space<vmem>>, vector<128x512xbf16>
    %cst_76 = arith.constant dense<0.000000e+00> : vector<16x512xf32>
    %226 = tpu.matmul %224, %225, %cst_76 {dimension_numbers = #tpu.dot_dimension_numbers<[1], [0], [0], [1], [0, 0, 1, 1], [], []>} : vector<16x128xbf16>, vector<128x512xbf16>, vector<16x512xf32> -> vector<16x512xf32>
    %227 = arith.truncf %221 : vector<16x128xf32> to vector<16x128xbf16>
    %c0_77 = arith.constant 0 : index
    %c0_78 = arith.constant 0 : index
    %228 = vector.load %arg4[%c0_77, %c0_78] : memref<128x512xbf16, #tpu.memory_space<vmem>>, vector<128x512xbf16>
    %cst_79 = arith.constant dense<0.000000e+00> : vector<16x512xf32>
    %229 = tpu.matmul %227, %228, %cst_79 {dimension_numbers = #tpu.dot_dimension_numbers<[1], [0], [0], [1], [0, 0, 1, 1], [], []>} : vector<16x128xbf16>, vector<128x512xbf16>, vector<16x512xf32> -> vector<16x512xf32>
    %230 = arith.addf %226, %229 : vector<16x512xf32>
    %231 = vector.broadcast %3 : vector<1x512xf32> to vector<16x512xf32>
    %232 = arith.addf %230, %231 : vector<16x512xf32>
    %233 = vector.extract_strided_slice %232 {offsets = [0, 0], sizes = [16, 128], strides = [1, 1]} : vector<16x512xf32> to vector<16x128xf32>
    %234 = arith.negf %233 : vector<16x128xf32>
    %235 = math.exp %234 : vector<16x128xf32>
    %cst_80 = arith.constant 1.000000e+00 : f32
    %236 = vector.broadcast %cst_80 : f32 to vector<16x128xf32>
    %237 = arith.addf %236, %235 : vector<16x128xf32>
    %238 = arith.divf %236, %237 : vector<16x128xf32>
    %239 = vector.extract_strided_slice %232 {offsets = [0, 128], sizes = [16, 128], strides = [1, 1]} : vector<16x512xf32> to vector<16x128xf32>
    %240 = arith.negf %239 : vector<16x128xf32>
    %241 = math.exp %240 : vector<16x128xf32>
    %cst_81 = arith.constant 1.000000e+00 : f32
    %242 = vector.broadcast %cst_81 : f32 to vector<16x128xf32>
    %243 = arith.addf %242, %241 : vector<16x128xf32>
    %244 = arith.divf %242, %243 : vector<16x128xf32>
    %245 = vector.extract_strided_slice %232 {offsets = [0, 256], sizes = [16, 128], strides = [1, 1]} : vector<16x512xf32> to vector<16x128xf32>
    %246 = math.tanh %245 : vector<16x128xf32>
    %247 = vector.extract_strided_slice %232 {offsets = [0, 384], sizes = [16, 128], strides = [1, 1]} : vector<16x512xf32> to vector<16x128xf32>
    %248 = arith.negf %247 : vector<16x128xf32>
    %249 = math.exp %248 : vector<16x128xf32>
    %cst_82 = arith.constant 1.000000e+00 : f32
    %250 = vector.broadcast %cst_82 : f32 to vector<16x128xf32>
    %251 = arith.addf %250, %249 : vector<16x128xf32>
    %252 = arith.divf %250, %251 : vector<16x128xf32>
    %253 = arith.mulf %244, %219 : vector<16x128xf32>
    %254 = arith.mulf %238, %246 : vector<16x128xf32>
    %255 = arith.addf %253, %254 : vector<16x128xf32>
    %256 = math.tanh %255 : vector<16x128xf32>
    %257 = arith.mulf %252, %256 : vector<16x128xf32>
    %c7_i32 = arith.constant 7 : i32
    %258 = arith.index_cast %c7_i32 : i32 to index
    %c0_83 = arith.constant 0 : index
    %c0_84 = arith.constant 0 : index
    %259 = vector.load %arg2[%258, %c0_83, %c0_84] : memref<8x16x128xbf16, #tpu.memory_space<vmem>>, vector<1x16x128xbf16>
    %260 = vector.shape_cast %259 : vector<1x16x128xbf16> to vector<16x128xbf16>
    %c0_85 = arith.constant 0 : index
    %c0_86 = arith.constant 0 : index
    %261 = vector.load %arg3[%c0_85, %c0_86] : memref<128x512xbf16, #tpu.memory_space<vmem>>, vector<128x512xbf16>
    %cst_87 = arith.constant dense<0.000000e+00> : vector<16x512xf32>
    %262 = tpu.matmul %260, %261, %cst_87 {dimension_numbers = #tpu.dot_dimension_numbers<[1], [0], [0], [1], [0, 0, 1, 1], [], []>} : vector<16x128xbf16>, vector<128x512xbf16>, vector<16x512xf32> -> vector<16x512xf32>
    %263 = arith.truncf %257 : vector<16x128xf32> to vector<16x128xbf16>
    %c0_88 = arith.constant 0 : index
    %c0_89 = arith.constant 0 : index
    %264 = vector.load %arg4[%c0_88, %c0_89] : memref<128x512xbf16, #tpu.memory_space<vmem>>, vector<128x512xbf16>
    %cst_90 = arith.constant dense<0.000000e+00> : vector<16x512xf32>
    %265 = tpu.matmul %263, %264, %cst_90 {dimension_numbers = #tpu.dot_dimension_numbers<[1], [0], [0], [1], [0, 0, 1, 1], [], []>} : vector<16x128xbf16>, vector<128x512xbf16>, vector<16x512xf32> -> vector<16x512xf32>
    %266 = arith.addf %262, %265 : vector<16x512xf32>
    %267 = vector.broadcast %3 : vector<1x512xf32> to vector<16x512xf32>
    %268 = arith.addf %266, %267 : vector<16x512xf32>
    %269 = vector.extract_strided_slice %268 {offsets = [0, 0], sizes = [16, 128], strides = [1, 1]} : vector<16x512xf32> to vector<16x128xf32>
    %270 = arith.negf %269 : vector<16x128xf32>
    %271 = math.exp %270 : vector<16x128xf32>
    %cst_91 = arith.constant 1.000000e+00 : f32
    %272 = vector.broadcast %cst_91 : f32 to vector<16x128xf32>
    %273 = arith.addf %272, %271 : vector<16x128xf32>
    %274 = arith.divf %272, %273 : vector<16x128xf32>
    %275 = vector.extract_strided_slice %268 {offsets = [0, 128], sizes = [16, 128], strides = [1, 1]} : vector<16x512xf32> to vector<16x128xf32>
    %276 = arith.negf %275 : vector<16x128xf32>
    %277 = math.exp %276 : vector<16x128xf32>
    %cst_92 = arith.constant 1.000000e+00 : f32
    %278 = vector.broadcast %cst_92 : f32 to vector<16x128xf32>
    %279 = arith.addf %278, %277 : vector<16x128xf32>
    %280 = arith.divf %278, %279 : vector<16x128xf32>
    %281 = vector.extract_strided_slice %268 {offsets = [0, 256], sizes = [16, 128], strides = [1, 1]} : vector<16x512xf32> to vector<16x128xf32>
    %282 = math.tanh %281 : vector<16x128xf32>
    %283 = vector.extract_strided_slice %268 {offsets = [0, 384], sizes = [16, 128], strides = [1, 1]} : vector<16x512xf32> to vector<16x128xf32>
    %284 = arith.negf %283 : vector<16x128xf32>
    %285 = math.exp %284 : vector<16x128xf32>
    %cst_93 = arith.constant 1.000000e+00 : f32
    %286 = vector.broadcast %cst_93 : f32 to vector<16x128xf32>
    %287 = arith.addf %286, %285 : vector<16x128xf32>
    %288 = arith.divf %286, %287 : vector<16x128xf32>
    %289 = arith.mulf %280, %255 : vector<16x128xf32>
    %290 = arith.mulf %274, %282 : vector<16x128xf32>
    %291 = arith.addf %289, %290 : vector<16x128xf32>
    %292 = math.tanh %291 : vector<16x128xf32>
    %293 = arith.mulf %288, %292 : vector<16x128xf32>
    %c8_i32 = arith.constant 8 : i32
    %c0_94 = arith.constant 0 : index
    %c0_95 = arith.constant 0 : index
    %294 = vector.load %arg6[%c0_94, %c0_95] : memref<16x128xf32, #tpu.memory_space<vmem>>, vector<16x128xf32>
    tpu.vector_store %arg6[%c0_94, %c0_95], %293 {strides = array<i32>} : memref<16x128xf32, #tpu.memory_space<vmem>>, vector<16x128xf32>,
    %c0_96 = arith.constant 0 : index
    %c0_97 = arith.constant 0 : index
    %295 = vector.load %arg7[%c0_96, %c0_97] : memref<16x128xf32, #tpu.memory_space<vmem>>, vector<16x128xf32>
    tpu.vector_store %arg7[%c0_96, %c0_97], %291 {strides = array<i32>} : memref<16x128xf32, #tpu.memory_space<vmem>>, vector<16x128xf32>,
    return
  }
  func.func @transform_0(%arg0: i32, %arg1: i32) -> (i32, i32, i32) {
    %c0_i32 = arith.constant 0 : i32
    %c0_i32_0 = arith.constant 0 : i32
    return %arg1, %arg0, %c0_i32 : i32, i32, i32
  }
  func.func @transform_1(%arg0: i32, %arg1: i32) -> (i32, i32) {
    %c0_i32 = arith.constant 0 : i32
    %c0_i32_0 = arith.constant 0 : i32
    %c0_i32_1 = arith.constant 0 : i32
    return %c0_i32, %c0_i32_0 : i32, i32
  }
  func.func @transform_2(%arg0: i32, %arg1: i32) -> (i32, i32) {
    %c0_i32 = arith.constant 0 : i32
    %c0_i32_0 = arith.constant 0 : i32
    %c0_i32_1 = arith.constant 0 : i32
    return %c0_i32, %c0_i32_0 : i32, i32
  }
  func.func @transform_3(%arg0: i32, %arg1: i32) -> (i32, i32) {
    %c0_i32 = arith.constant 0 : i32
    %c0_i32_0 = arith.constant 0 : i32
    %c0_i32_1 = arith.constant 0 : i32
    return %c0_i32, %c0_i32_0 : i32, i32
  }
  func.func @transform_4(%arg0: i32, %arg1: i32) -> (i32, i32) {
    %c0_i32 = arith.constant 0 : i32
    %c0_i32_0 = arith.constant 0 : i32
    return %arg0, %c0_i32 : i32, i32
  }
  func.func @transform_5(%arg0: i32, %arg1: i32) -> (i32, i32) {
    %c0_i32 = arith.constant 0 : i32
    %c0_i32_0 = arith.constant 0 : i32
    return %arg0, %c0_i32 : i32, i32
  }
}

</mosaic_0001>

<bundles_post_ra>
// kernel: encoder_forward.3
= control target key start
LH: loop header
LB: loop body
LE: loop exit
PB: predicated region body
PF: predicated region fallthrough
CT: control target
= control target key end

     0   :  { %v4369_v1 = vmov 0   ;;  %v2979_v39 = vmov 0.0|0.0   ;;  %s4363_s2 = inlined_call_operand.vmem [shape: bf16[128,512], index: 2, kind: input, shape index: {}]   ;;  %s4364_s1 = inlined_call_operand.vmem [shape: bf16[128,512], index: 1, kind: input, shape index: {}]   ;;  %s4365_s0 = inlined_call_operand.vmem [shape: bf16[8,16,128], index: 0, kind: input, shape index: {}]   ;;  %s4366_s3 = inlined_call_operand.vmem [shape: f32[1,512], index: 3, kind: input, shape index: {}]   ;;  %s4367_s5 = inlined_call_operand.vmem [shape: f32[16,128], index: 5, kind: output, shape index: {1}]   ;;  %s4368_s4 = inlined_call_operand.vmem [shape: f32[16,128], index: 4, kind: output, shape index: {0}]  }
   0x1   :  { %v3013_v0 = vld [vmem:[%s4363_s2 + $0x4] ss:$16 sps:$4 sm:$0xff]   ;;  %292 = vmatprep.mubr.bf16.mxu0 %v4369_v1  ;;  %335 = vmatprep.mubr.bf16.mxu1 %v4369_v1  ;;  %v3020_v2 = vld [vmem:[%s4363_s2 + $0xc] ss:$16 sps:$4 sm:$0xff]   ;;  %v3026_v3 = vld [vmem:[%s4363_s2] ss:$16 sps:$4 sm:$0xff]  }
   0x2   :  { %260 = vmatprep.subr.bf16.mxu0 %v3013_v0  ;;  %v3031_v4 = vld [vmem:[%s4363_s2 + $0x8] ss:$16 sps:$4 sm:$0xff]   ;;  %303 = vmatprep.subr.bf16.mxu1 %v3020_v2  ;;  %v3037_v5 = vld [vmem:[%s4363_s2 + $0x24] ss:$16 sps:$4 sm:$0xff]   ;;  %v3044_v6 = vld [vmem:[%s4363_s2 + $0x2c] ss:$16 sps:$4 sm:$0xff]  }
   0x3   :  { %261 = vmatpush1.bf16.msra.mxu0 %v3026_v3  ;;  %304 = vmatpush1.bf16.msra.mxu1 %v3031_v4  ;;  %v3049_v7 = vld [vmem:[%s4363_s2 + $0x20] ss:$16 sps:$4 sm:$0xff]   ;;  %v3055_v8 = vld [vmem:[%s4363_s2 + $0x28] ss:$16 sps:$4 sm:$0xff]   ;;  %v3061_v9 = vld [vmem:[%s4363_s2 + $0x44] ss:$16 sps:$4 sm:$0xff]  }
   0x4   :  { %262 = vmatprep.subr.bf16.mxu0 %v3037_v5  ;;  %305 = vmatprep.subr.bf16.mxu1 %v3044_v6  ;;  %v3066_v10 = vld [vmem:[%s4363_s2 + $0x4c] ss:$16 sps:$4 sm:$0xff]   ;;  %v3071_v11 = vld [vmem:[%s4363_s2 + $0x40] ss:$16 sps:$4 sm:$0xff]   ;;  %v3076_v12 = vld [vmem:[%s4363_s2 + $0x48] ss:$16 sps:$4 sm:$0xff]  }
   0x5   :  { %4482 = vst [vmem:[#allocation2_spill] sm:$0xff] %v3071_v11  ;;  %4483 = vst [vmem:[#allocation3_spill] sm:$0xff] %v3076_v12  ;;  %v3083_v13 = vld [vmem:[%s4363_s2 + $0x64] ss:$16 sps:$4 sm:$0xff]   ;;  %v3090_v14 = vld [vmem:[%s4363_s2 + $0x6c] ss:$16 sps:$4 sm:$0xff]  }
   0x6   :  { %4484 = vst [vmem:[#allocation4_spill] sm:$0xff] %v3083_v13  ;;  %4485 = vst [vmem:[#allocation5_spill] sm:$0xff] %v3090_v14  ;;  %v3095_v15 = vld [vmem:[%s4363_s2 + $0x60] ss:$16 sps:$4 sm:$0xff]   ;;  %v3102_v16 = vld [vmem:[%s4363_s2 + $0x68] ss:$16 sps:$4 sm:$0xff]  }
   0x7   :  { %263 = vmatpush1.bf16.msra.mxu0 %v3049_v7  ;;  %306 = vmatpush1.bf16.msra.mxu1 %v3055_v8  ;;  %4486 = vst [vmem:[#allocation6_spill] sm:$0xff] %v3095_v15  ;;  %4487 = vst [vmem:[#allocation7_spill] sm:$0xff] %v3102_v16  ;;  %v3107_v17 = vld [vmem:[%s4363_s2 + $0x84] ss:$16 sps:$4 sm:$0xff]   ;;  %v3114_v18 = vld [vmem:[%s4363_s2 + $0x8c] ss:$16 sps:$4 sm:$0xff]  }
   0x8   :  { %264 = vmatprep.subr.bf16.mxu0 %v3061_v9  ;;  %307 = vmatprep.subr.bf16.mxu1 %v3066_v10  ;;  %4488 = vst [vmem:[#allocation8_spill] sm:$0xff] %v3107_v17  ;;  %4489 = vst [vmem:[#allocation9_spill] sm:$0xff] %v3114_v18  ;;  %v3119_v19 = vld [vmem:[%s4363_s2 + $0x80] ss:$16 sps:$4 sm:$0xff]   ;;  %v3124_v20 = vld [vmem:[%s4363_s2 + $0x88] ss:$16 sps:$4 sm:$0xff]  }
   0x9   :  { %4490 = vst [vmem:[#allocation10_spill] sm:$0xff] %v3119_v19  ;;  %4491 = vst [vmem:[#allocation11_spill] sm:$0xff] %v3124_v20  ;;  %v3131_v21 = vld [vmem:[%s4363_s2 + $0xa4] ss:$16 sps:$4 sm:$0xff]   ;;  %v3138_v22 = vld [vmem:[%s4363_s2 + $0xac] ss:$16 sps:$4 sm:$0xff]  }
   0xa   :  { %4492 = vst [vmem:[#allocation12_spill] sm:$0xff] %v3131_v21  ;;  %4493 = vst [vmem:[#allocation13_spill] sm:$0xff] %v3138_v22  ;;  %v3143_v23 = vld [vmem:[%s4363_s2 + $0xa0] ss:$16 sps:$4 sm:$0xff]   ;;  %v3150_v24 = vld [vmem:[%s4363_s2 + $0xa8] ss:$16 sps:$4 sm:$0xff]  }
   0xb   :  { %265 = vmatpush1.bf16.msra.mxu0 %v3071_v11  ;;  %308 = vmatpush1.bf16.msra.mxu1 %v3076_v12  ;;  %4494 = vst [vmem:[#allocation14_spill] sm:$0xff] %v3143_v23  ;;  %4495 = vst [vmem:[#allocation15_spill] sm:$0xff] %v3150_v24  ;;  %v3155_v25 = vld [vmem:[%s4363_s2 + $0xc4] ss:$16 sps:$4 sm:$0xff]   ;;  %v3162_v26 = vld [vmem:[%s4363_s2 + $0xcc] ss:$16 sps:$4 sm:$0xff]  }
   0xc   :  { %266 = vmatprep.subr.bf16.mxu0 %v3083_v13  ;;  %309 = vmatprep.subr.bf16.mxu1 %v3090_v14  ;;  %4496 = vst [vmem:[#allocation16_spill] sm:$0xff] %v3155_v25  ;;  %4497 = vst [vmem:[#allocation17_spill] sm:$0xff] %v3162_v26  ;;  %v3167_v27 = vld [vmem:[%s4363_s2 + $0xc0] ss:$16 sps:$4 sm:$0xff]   ;;  %v3172_v28 = vld [vmem:[%s4363_s2 + $0xc8] ss:$16 sps:$4 sm:$0xff]  }
   0xd   :  { %4498 = vst [vmem:[#allocation18_spill] sm:$0xff] %v3167_v27  ;;  %4499 = vst [vmem:[#allocation19_spill] sm:$0xff] %v3172_v28  ;;  %v3179_v29 = vld [vmem:[%s4363_s2 + $0xe4] ss:$16 sps:$4 sm:$0xff]   ;;  %v3186_v30 = vld [vmem:[%s4363_s2 + $0xec] ss:$16 sps:$4 sm:$0xff]  }
   0xe   :  { %4500 = vst [vmem:[#allocation20_spill] sm:$0xff] %v3179_v29  ;;  %4501 = vst [vmem:[#allocation21_spill] sm:$0xff] %v3186_v30  ;;  %v3191_v31 = vld [vmem:[%s4363_s2 + $0xe0] ss:$16 sps:$4 sm:$0xff]   ;;  %v3198_v32 = vld [vmem:[%s4363_s2 + $0xe8] ss:$16 sps:$4 sm:$0xff]  }
   0xf   :  { %267 = vmatpush1.bf16.msra.mxu0 %v3095_v15  ;;  %310 = vmatpush1.bf16.msra.mxu1 %v3102_v16  ;;  %4502 = vst [vmem:[#allocation22_spill] sm:$0xff] %v3191_v31  ;;  %4503 = vst [vmem:[#allocation23_spill] sm:$0xff] %v3198_v32  ;;  %v3203_v33 = vld [vmem:[%s4364_s1 + $0x4] ss:$16 sps:$4 sm:$0xff]   ;;  %v3210_v34 = vld [vmem:[%s4364_s1 + $0xc] ss:$16 sps:$4 sm:$0xff]  }
  0x10   :  { %268 = vmatprep.subr.bf16.mxu0 %v3107_v17  ;;  %311 = vmatprep.subr.bf16.mxu1 %v3114_v18  ;;  %4504 = vst [vmem:[#allocation24_spill] sm:$0xff] %v3203_v33  ;;  %4505 = vst [vmem:[#allocation25_spill] sm:$0xff] %v3210_v34  ;;  %v3215_v35 = vld [vmem:[%s4364_s1] ss:$16 sps:$4 sm:$0xff]   ;;  %v3220_v36 = vld [vmem:[%s4364_s1 + $0x8] ss:$16 sps:$4 sm:$0xff]  }
  0x11   :  { %v3227_v37 = vld [vmem:[%s4364_s1 + $0x24] ss:$16 sps:$4 sm:$0xff]   ;;  %v3234_v38 = vld [vmem:[%s4364_s1 + $0x2c] ss:$16 sps:$4 sm:$0xff]   ;;  %v3239_v40 = vld [vmem:[%s4364_s1 + $0x20] ss:$16 sps:$4 sm:$0xff]  }
  0x12   :  { %v3246_v41 = vld [vmem:[%s4364_s1 + $0x28] ss:$16 sps:$4 sm:$0xff]   ;;  %v3251_v42 = vld [vmem:[%s4364_s1 + $0x44] ss:$16 sps:$4 sm:$0xff]   ;;  %v3258_v43 = vld [vmem:[%s4364_s1 + $0x4c] ss:$16 sps:$4 sm:$0xff]  }
  0x13   :  { %269 = vmatpush1.bf16.msra.mxu0 %v3119_v19  ;;  %312 = vmatpush1.bf16.msra.mxu1 %v3124_v20  ;;  %v3265_v44 = vld [vmem:[%s4364_s1 + $0x40] ss:$16 sps:$4 sm:$0xff]   ;;  %v3270_v45 = vld [vmem:[%s4364_s1 + $0x48] ss:$16 sps:$4 sm:$0xff]   ;;  %v3277_v46 = vld [vmem:[%s4364_s1 + $0x64] ss:$16 sps:$4 sm:$0xff]  }
  0x14   :  { %270 = vmatprep.subr.bf16.mxu0 %v3131_v21  ;;  %313 = vmatprep.subr.bf16.mxu1 %v3138_v22  ;;  %v3284_v47 = vld [vmem:[%s4364_s1 + $0x6c] ss:$16 sps:$4 sm:$0xff]   ;;  %v3289_v48 = vld [vmem:[%s4364_s1 + $0x60] ss:$16 sps:$4 sm:$0xff]   ;;  %v3294_v49 = vld [vmem:[%s4364_s1 + $0x68] ss:$16 sps:$4 sm:$0xff]  }
  0x15   :  { %v3299_v50 = vld [vmem:[%s4364_s1 + $0x84] ss:$16 sps:$4 sm:$0xff]   ;;  %v3304_v51 = vld [vmem:[%s4364_s1 + $0x8c] ss:$16 sps:$4 sm:$0xff]   ;;  %v3313_v52 = vld [vmem:[%s4364_s1 + $0x80] ss:$16 sps:$4 sm:$0xff]  }
  0x16   :  { %v3320_v53 = vld [vmem:[%s4364_s1 + $0x88] ss:$16 sps:$4 sm:$0xff]   ;;  %v3327_v54 = vld [vmem:[%s4364_s1 + $0xa4] ss:$16 sps:$4 sm:$0xff]   ;;  %v3332_v55 = vld [vmem:[%s4364_s1 + $0xac] ss:$16 sps:$4 sm:$0xff]  }
  0x17   :  { %271 = vmatpush1.bf16.msra.mxu0 %v3143_v23  ;;  %314 = vmatpush1.bf16.msra.mxu1 %v3150_v24  ;;  %v3339_v56 = vld [vmem:[%s4364_s1 + $0xa0] ss:$16 sps:$4 sm:$0xff]   ;;  %v3344_v57 = vld [vmem:[%s4364_s1 + $0xa8] ss:$16 sps:$4 sm:$0xff]   ;;  %v3351_v58 = vld [vmem:[%s4364_s1 + $0xc4] ss:$16 sps:$4 sm:$0xff]  }
  0x18   :  { %272 = vmatprep.subr.bf16.mxu0 %v3155_v25  ;;  %315 = vmatprep.subr.bf16.mxu1 %v3162_v26  ;;  %v3356_v59 = vld [vmem:[%s4364_s1 + $0xcc] ss:$16 sps:$4 sm:$0xff]   ;;  %v3363_v60 = vld [vmem:[%s4364_s1 + $0xc0] ss:$16 sps:$4 sm:$0xff]   ;;  %v3368_v61 = vld [vmem:[%s4364_s1 + $0xc8] ss:$16 sps:$4 sm:$0xff]  }
  0x19   :  { %4506 = vst [vmem:[#allocation26_spill] sm:$0xff] %v3363_v60  ;;  %v3375_v62 = vld [vmem:[%s4364_s1 + $0xe4] ss:$16 sps:$4 sm:$0xff]   ;;  %v3380_v63 = vld [vmem:[%s4364_s1 + $0xec] ss:$16 sps:$4 sm:$0xff]  }
  0x1a   :  { %4507 = vst [vmem:[#allocation27_spill] sm:$0xff] %v3380_v63 }
  0x1b   :  { %273 = vmatpush1.bf16.msra.mxu0 %v3167_v27  ;;  %316 = vmatpush1.bf16.msra.mxu1 %v3172_v28 }
  0x1c   :  { %274 = vmatprep.subr.bf16.mxu0 %v3179_v29  ;;  %317 = vmatprep.subr.bf16.mxu1 %v3186_v30 }
  0x1f   :  { %275 = vmatpush1.bf16.msra.mxu0 %v3191_v31  ;;  %318 = vmatpush1.bf16.msra.mxu1 %v3198_v32 }
  0x20   :  { %512 = vmatprep.subr.bf16.mxu0 %v3203_v33  ;;  %555 = vmatprep.subr.bf16.mxu1 %v3210_v34 }
  0x22   :  { %293 = vmatmul.mubr.bf16.vlgmr.msra.gmra.mrb[0].mxu0 %v2979_v39  ;;  %336 = vmatmul.mubr.bf16.vlgmr.msra.gmra.mrb[0].mxu1 %v2979_v39  ;;  %v3387_v39 = vld [vmem:[%s4364_s1 + $0xe0] ss:$16 sps:$4 sm:$0xff]  }
  0x23   :  { %513 = vmatpush1.bf16.msra.mxu0 %v3215_v35  ;;  %556 = vmatpush1.bf16.msra.mxu1 %v3220_v36 }
  0x24   :  { %514 = vmatprep.subr.bf16.mxu0 %v3227_v37  ;;  %557 = vmatprep.subr.bf16.mxu1 %v3234_v38 }
  0x25   :  { %544 = vmatprep.mubr.bf16.mxu0 %v4369_v1  ;;  %587 = vmatprep.mubr.bf16.mxu1 %v4369_v1  ;;  %v3392_v1 = vld [vmem:[%s4364_s1 + $0xe8] ss:$16 sps:$4 sm:$0xff]  }
  0x27   :  { %515 = vmatpush1.bf16.msra.mxu0 %v3239_v40  ;;  %558 = vmatpush1.bf16.msra.mxu1 %v3246_v41 }
  0x28   :  { %516 = vmatprep.subr.bf16.mxu0 %v3251_v42  ;;  %559 = vmatprep.subr.bf16.mxu1 %v3258_v43 }
  0x2b   :  { %517 = vmatpush1.bf16.msra.mxu0 %v3265_v44  ;;  %560 = vmatpush1.bf16.msra.mxu1 %v3270_v45 }
  0x2c   :  { %518 = vmatprep.subr.bf16.mxu0 %v3277_v46  ;;  %561 = vmatprep.subr.bf16.mxu1 %v3284_v47 }
  0x2f   :  { %519 = vmatpush1.bf16.msra.mxu0 %v3289_v48  ;;  %562 = vmatpush1.bf16.msra.mxu1 %v3294_v49 }
  0x30   :  { %520 = vmatprep.subr.bf16.mxu0 %v3299_v50  ;;  %563 = vmatprep.subr.bf16.mxu1 %v3304_v51 }
  0x33   :  { %521 = vmatpush1.bf16.msra.mxu0 %v3313_v52  ;;  %564 = vmatpush1.bf16.msra.mxu1 %v3320_v53 }
  0x34   :  { %522 = vmatprep.subr.bf16.mxu0 %v3327_v54  ;;  %565 = vmatprep.subr.bf16.mxu1 %v3332_v55 }
  0x37   :  { %523 = vmatpush1.bf16.msra.mxu0 %v3339_v56  ;;  %566 = vmatpush1.bf16.msra.mxu1 %v3344_v57 }
  0x38   :  { %524 = vmatprep.subr.bf16.mxu0 %v3351_v58  ;;  %567 = vmatprep.subr.bf16.mxu1 %v3356_v59 }
  0x3b   :  { %525 = vmatpush1.bf16.msra.mxu0 %v3363_v60  ;;  %568 = vmatpush1.bf16.msra.mxu1 %v3368_v61  ;;  %v2649_v60 = vld [vmem:[%s4365_s0] sm:$0xff]  }
  0x3c   :  { %526 = vmatprep.subr.bf16.mxu0 %v3375_v62  ;;  %569 = vmatprep.subr.bf16.mxu1 %v3380_v63  ;;  %v4508_v63 = vmov 0  }
  0x3f   :  { %527 = vmatpush1.bf16.msra.mxu0 %v3387_v39  ;;  %570 = vmatpush1.bf16.msra.mxu1 %v3392_v1 }
  0x40   :  { %679 = vmatprep.subr.bf16.mxu0 %v3013_v0  ;;  %722 = vmatprep.subr.bf16.mxu1 %v3020_v2 }
  0x42   :  { %545 = vmatmul.mubr.bf16.vlgmr.msra.gmra.mrb[0].mxu0 %v2649_v60  ;;  %588 = vmatmul.mubr.bf16.vlgmr.msra.gmra.mrb[0].mxu1 %v2649_v60  ;;  %v599_v60 = vlaneseq }
  0x43   :  { %680 = vmatpush1.bf16.msra.mxu0 %v3026_v3  ;;  %723 = vmatpush1.bf16.msra.mxu1 %v3031_v4 }
  0x44   :  { %681 = vmatprep.subr.bf16.mxu0 %v3037_v5  ;;  %724 = vmatprep.subr.bf16.mxu1 %v3044_v6 }
  0x45   :  { %711 = vmatprep.mubr.bf16.mxu0 %v4508_v63  ;;  %754 = vmatprep.mubr.bf16.mxu1 %v4508_v63 }
  0x47   :  { %682 = vmatpush1.bf16.msra.mxu0 %v3049_v7  ;;  %725 = vmatpush1.bf16.msra.mxu1 %v3055_v8 }
  0x48   :  { %683 = vmatprep.subr.bf16.mxu0 %v3061_v9  ;;  %726 = vmatprep.subr.bf16.mxu1 %v3066_v10 }
  0x4b   :  { %684 = vmatpush1.bf16.msra.mxu0 %v3071_v11  ;;  %727 = vmatpush1.bf16.msra.mxu1 %v3076_v12 }
  0x4c   :  { %685 = vmatprep.subr.bf16.mxu0 %v3083_v13  ;;  %728 = vmatprep.subr.bf16.mxu1 %v3090_v14 }
  0x4f   :  { %686 = vmatpush1.bf16.msra.mxu0 %v3095_v15  ;;  %729 = vmatpush1.bf16.msra.mxu1 %v3102_v16 }
  0x50   :  { %687 = vmatprep.subr.bf16.mxu0 %v3107_v17  ;;  %730 = vmatprep.subr.bf16.mxu1 %v3114_v18 }
  0x53   :  { %688 = vmatpush1.bf16.msra.mxu0 %v3119_v19  ;;  %731 = vmatpush1.bf16.msra.mxu1 %v3124_v20 }
  0x54   :  { %689 = vmatprep.subr.bf16.mxu0 %v3131_v21  ;;  %732 = vmatprep.subr.bf16.mxu1 %v3138_v22 }
  0x57   :  { %690 = vmatpush1.bf16.msra.mxu0 %v3143_v23  ;;  %733 = vmatpush1.bf16.msra.mxu1 %v3150_v24 }
  0x58   :  { %691 = vmatprep.subr.bf16.mxu0 %v3155_v25  ;;  %734 = vmatprep.subr.bf16.mxu1 %v3162_v26  ;;  %v600_v25 = vshrl.u32 %v599_v60, 7 }
  0x5a   :  { %v601_v24 = vsub.s32 0, %v600_v25  ;;  %v613_v23 = vsub.s32 3, %v600_v25  ;;  %v609_v19 = vsub.s32 2, %v600_v25 }
  0x5b   :  { %692 = vmatpush1.bf16.msra.mxu0 %v3167_v27  ;;  %735 = vmatpush1.bf16.msra.mxu1 %v3172_v28  ;;  %v28_v27 = vld [vmem:[%s4366_s3] sm:$0xf]  ;;  %v605_v28 = vsub.s32 1, %v600_v25 }
  0x5c   :  { %693 = vmatprep.subr.bf16.mxu0 %v3179_v29  ;;  %736 = vmatprep.subr.bf16.mxu1 %v3186_v30  ;;  %v3440_v26 = vrot.slane %v28_v27, %v601_v24  ;;  %v3450_v13 = vrot.slane %v28_v27, %v609_v19 }
  0x5d   :  { %v3442_v29 = vrot.slane %v28_v27, %v605_v28  ;;  %v3447_v28 = vrot.slane %v28_v27, %v613_v23 }
  0x5e   :  { %4509 = vst [vmem:[#allocation28_spill] sm:$0xff] %v3440_v26 }
  0x5f   :  { %694 = vmatpush1.bf16.msra.mxu0 %v3191_v31  ;;  %737 = vmatpush1.bf16.msra.mxu1 %v3198_v32 }
  0x60   :  { %771 = vmatprep.subr.bf16.mxu0 %v3203_v33  ;;  %814 = vmatprep.subr.bf16.mxu1 %v3210_v34 }
 0x115   :  { %v546_v30 = vpop.f32.mrb[0].mxu0  ;;  %v589_v31 = vpop.f32.mrb[0].mxu1 }
 0x116   :  { %v619_v32 = vadd.f32 %v3440_v26, %v546_v30  ;;  %v548_v33 = vpop.f32.mrb[1].mxu0  ;;  %v591_v22 = vpop.f32.mrb[1].mxu1  ;;  %v621_v25 = vadd.f32 %v3450_v13, %v589_v31 }
 0x117   :  { %v620_v34 = vadd.f32 %v3442_v29, %v548_v33  ;;  %v550_v60 = vpop.f32.mrb[2].mxu0  ;;  %v593_v21 = vpop.f32.mrb[2].mxu1  ;;  %v622_v33 = vadd.f32 %v3447_v28, %v591_v22 }
 0x118   :  { %v2418_v20 = vmul.f32 -1.442695, %v619_v32  ;;  %v623_v18 = vadd.f32 %v3440_v26, %v550_v60  ;;  %v552_v17 = vpop.f32.mrb[3].mxu0  ;;  %v595_v24 = vpop.f32.mrb[3].mxu1  ;;  %v625_v23 = vadd.f32 %v3450_v13, %v593_v21 }
 0x119   :  { %v2420_v16 = vmul.f32 -1.442695, %v620_v34  ;;  %v624_v15 = vadd.f32 %v3442_v29, %v552_v17  ;;  %v2422_v32 = vmul.f32 -1.442695, %v622_v33  ;;  %v626_v60 = vadd.f32 %v3447_v28, %v595_v24 }
 0x11a   :  { %2657 = vpow2.f32 %v2418_v20  ;;  %v2419_v14 = vmul.f32 -1.442695, %v623_v18 }
 0x11b   :  { %2659 = vpow2.f32 %v2420_v16  ;;  %v2421_v30 = vmul.f32 -1.442695, %v624_v15  ;;  %v2423_v16 = vmul.f32 -1.442695, %v626_v60 }
 0x11c   :  { %2661 = vpow2.f32 %v2419_v14 }
 0x11d   :  { %2663 = vpow2.f32 %v2421_v30 }
 0x11e   :  { %2665 = vtanh.f32 %v621_v25 }
 0x11f   :  { %2667 = vpow2.f32 %v2422_v32 }
 0x120   :  { %2669 = vtanh.f32 %v625_v23 }
 0x124   :  { %v2658_v34 = vpop.eup %2657 }
 0x125   :  { %v2660_v17 = vpop.eup %2659  ;;  %v633_v20 = vadd.f32 1.0, %v2658_v34 }
 0x126   :  { %v645_v15 = vadd.f32 1.0, %v2660_v17  ;;  %v2662_v18 = vpop.eup %2661 }
 0x127   :  { %2671 = vrcp.f32 %v633_v20  ;;  %v634_v14 = vadd.f32 1.0, %v2662_v18  ;;  %v2664_v19 = vpop.eup %2663 }
 0x128   :  { %2673 = vrcp.f32 %v645_v15  ;;  %v646_v22 = vadd.f32 1.0, %v2664_v19  ;;  %v2666_v27 = vpop.eup %2665 }
 0x129   :  { %2675 = vpow2.f32 %v2423_v16  ;;  %v2668_v31 = vpop.eup %2667 }
 0x12a   :  { %2677 = vrcp.f32 %v634_v14  ;;  %v2670_v21 = vpop.eup %2669  ;;  %v659_v34 = vadd.f32 1.0, %v2668_v31 }
 0x12b   :  { %2679 = vrcp.f32 %v646_v22 }
 0x12c   :  { %2681 = vrcp.f32 %v659_v34  ;;  %v4515_v34 = vld [vmem:[#allocation7_spill] sm:$0xff] }
 0x131   :  { %v2672_v24 = vpop.eup %2671 }
 0x132   :  { %v2674_v30 = vpop.eup %2673  ;;  %v667_v33 = vmul.f32 %v2672_v24, %v2666_v27 }
 0x133   :  { %v2676_v25 = vpop.eup %2675  ;;  %v665_v32 = vmul.f32 0.0, %v2674_v30 }
 0x134   :  { %v2678_v60 = vpop.eup %2677  ;;  %v660_v15 = vadd.f32 1.0, %v2676_v25  ;;  %v2650_v25 = vld [vmem:[%s4365_s0 + $0x8] sm:$0xff]  }
 0x135   :  { %v3456_v23 = vadd.f32 %v667_v33, %v665_v32  ;;  %v668_v17 = vmul.f32 %v2678_v60, %v2670_v21  ;;  %v2680_v20 = vpop.eup %2679  ;;  %v4510_v21 = vld [vmem:[#allocation26_spill] sm:$0xff]  ;;  %v4511_v33 = vld [vmem:[#allocation27_spill] sm:$0xff]  ;;  %v4513_v32 = vld [vmem:[#allocation5_spill] sm:$0xff] }
 0x136   :  { %v666_v18 = vmul.f32 0.0, %v2680_v20  ;;  %v2682_v14 = vpop.eup %2681  ;;  %v4514_v60 = vld [vmem:[#allocation6_spill] sm:$0xff]  ;;  %v4517_v20 = vld [vmem:[#allocation9_spill] sm:$0xff] }
 0x137   :  { %2683 = vtanh.f32 %v3456_v23 }
 0x138   :  { %v3459_v16 = vadd.f32 %v668_v17, %v666_v18  ;;  %2685 = vrcp.f32 %v660_v15  ;;  %v4516_v17 = vld [vmem:[#allocation8_spill] sm:$0xff]  ;;  %v4518_v15 = vld [vmem:[#allocation10_spill] sm:$0xff]  ;;  %v4519_v18 = vld [vmem:[#allocation11_spill] sm:$0xff] }
 0x13a   :  { %2687 = vtanh.f32 %v3459_v16 }
 0x141   :  { %v2684_v19 = vpop.eup %2683 }
 0x142   :  { %v2686_v22 = vpop.eup %2685  ;;  %v673_v24 = vmul.f32 %v2684_v19, %v2682_v14  ;;  %v4520_v14 = vld [vmem:[#allocation12_spill] sm:$0xff]  ;;  %v4521_v19 = vld [vmem:[#allocation13_spill] sm:$0xff] }
 0x144   :  { %v2688_v27 = vpop.eup %2687 }
 0x145   :  { %v674_v31 = vmul.f32 %v2688_v27, %v2686_v22  ;;  %v4522_v22 = vld [vmem:[#allocation14_spill] sm:$0xff]  ;;  %v4523_v27 = vld [vmem:[#allocation15_spill] sm:$0xff] }
 0x147   :  { %v678_v30 = vpack.c.bf16 %v674_v31, %v673_v24  ;;  %v4524_v24 = vld [vmem:[#allocation16_spill] sm:$0xff]  ;;  %v4525_v31 = vld [vmem:[#allocation17_spill] sm:$0xff] }
 0x149   :  { %712 = vmatmul.mubr.bf16.vlgmr.msra.gmra.mrb[4].mxu0 %v678_v30  ;;  %755 = vmatmul.mubr.bf16.vlgmr.msra.gmra.mrb[4].mxu1 %v678_v30  ;;  %v4526_v30 = vld [vmem:[#allocation18_spill] sm:$0xff] }
 0x14a   :  { %772 = vmatpush1.bf16.msra.mxu0 %v3215_v35  ;;  %815 = vmatpush1.bf16.msra.mxu1 %v3220_v36 }
 0x14b   :  { %773 = vmatprep.subr.bf16.mxu0 %v3227_v37  ;;  %816 = vmatprep.subr.bf16.mxu1 %v3234_v38 }
 0x14c   :  { %803 = vmatprep.mubr.bf16.mxu0 %v4508_v63  ;;  %846 = vmatprep.mubr.bf16.mxu1 %v4508_v63 }
 0x14e   :  { %774 = vmatpush1.bf16.msra.mxu0 %v3239_v40  ;;  %817 = vmatpush1.bf16.msra.mxu1 %v3246_v41 }
 0x14f   :  { %775 = vmatprep.subr.bf16.mxu0 %v3251_v42  ;;  %818 = vmatprep.subr.bf16.mxu1 %v3258_v43 }
 0x152   :  { %776 = vmatpush1.bf16.msra.mxu0 %v3265_v44  ;;  %819 = vmatpush1.bf16.msra.mxu1 %v3270_v45 }
 0x153   :  { %777 = vmatprep.subr.bf16.mxu0 %v3277_v46  ;;  %820 = vmatprep.subr.bf16.mxu1 %v3284_v47 }
 0x156   :  { %778 = vmatpush1.bf16.msra.mxu0 %v3289_v48  ;;  %821 = vmatpush1.bf16.msra.mxu1 %v3294_v49 }
 0x157   :  { %779 = vmatprep.subr.bf16.mxu0 %v3299_v50  ;;  %822 = vmatprep.subr.bf16.mxu1 %v3304_v51 }
 0x15a   :  { %780 = vmatpush1.bf16.msra.mxu0 %v3313_v52  ;;  %823 = vmatpush1.bf16.msra.mxu1 %v3320_v53 }
 0x15b   :  { %781 = vmatprep.subr.bf16.mxu0 %v3327_v54  ;;  %824 = vmatprep.subr.bf16.mxu1 %v3332_v55 }
 0x15e   :  { %782 = vmatpush1.bf16.msra.mxu0 %v3339_v56  ;;  %825 = vmatpush1.bf16.msra.mxu1 %v3344_v57 }
 0x15f   :  { %783 = vmatprep.subr.bf16.mxu0 %v3351_v58  ;;  %826 = vmatprep.subr.bf16.mxu1 %v3356_v59 }
 0x162   :  { %784 = vmatpush1.bf16.msra.mxu0 %v4510_v21  ;;  %827 = vmatpush1.bf16.msra.mxu1 %v3368_v61 }
 0x163   :  { %785 = vmatprep.subr.bf16.mxu0 %v3375_v62  ;;  %828 = vmatprep.subr.bf16.mxu1 %v4511_v33 }
 0x166   :  { %786 = vmatpush1.bf16.msra.mxu0 %v3387_v39  ;;  %829 = vmatpush1.bf16.msra.mxu1 %v3392_v1 }
 0x167   :  { %917 = vmatprep.subr.bf16.mxu0 %v3013_v0  ;;  %960 = vmatprep.subr.bf16.mxu1 %v3020_v2  ;;  %v4512_v0 = vld [vmem:[#allocation4_spill] sm:$0xff] }
 0x169   :  { %804 = vmatmul.mubr.bf16.vlgmr.msra.gmra.mrb[4].mxu0 %v2650_v25  ;;  %847 = vmatmul.mubr.bf16.vlgmr.msra.gmra.mrb[4].mxu1 %v2650_v25  ;;  %v4527_v25 = vld [vmem:[#allocation19_spill] sm:$0xff] }
 0x16a   :  { %918 = vmatpush1.bf16.msra.mxu0 %v3026_v3  ;;  %961 = vmatpush1.bf16.msra.mxu1 %v3031_v4 }
 0x16b   :  { %919 = vmatprep.subr.bf16.mxu0 %v3037_v5  ;;  %962 = vmatprep.subr.bf16.mxu1 %v3044_v6 }
 0x16c   :  { %949 = vmatprep.mubr.bf16.mxu0 %v4508_v63  ;;  %992 = vmatprep.mubr.bf16.mxu1 %v4508_v63 }
 0x16e   :  { %920 = vmatpush1.bf16.msra.mxu0 %v3049_v7  ;;  %963 = vmatpush1.bf16.msra.mxu1 %v3055_v8 }
 0x16f   :  { %921 = vmatprep.subr.bf16.mxu0 %v3061_v9  ;;  %964 = vmatprep.subr.bf16.mxu1 %v3066_v10 }
 0x172   :  { %922 = vmatpush1.bf16.msra.mxu0 %v3071_v11  ;;  %965 = vmatpush1.bf16.msra.mxu1 %v3076_v12 }
 0x173   :  { %923 = vmatprep.subr.bf16.mxu0 %v4512_v0  ;;  %966 = vmatprep.subr.bf16.mxu1 %v4513_v32 }
 0x176   :  { %924 = vmatpush1.bf16.msra.mxu0 %v4514_v60  ;;  %967 = vmatpush1.bf16.msra.mxu1 %v4515_v34 }
 0x177   :  { %925 = vmatprep.subr.bf16.mxu0 %v4516_v17  ;;  %968 = vmatprep.subr.bf16.mxu1 %v4517_v20  ;;  %v4528_v20 = vld [vmem:[#allocation20_spill] sm:$0xff] }
 0x17a   :  { %926 = vmatpush1.bf16.msra.mxu0 %v4518_v15  ;;  %969 = vmatpush1.bf16.msra.mxu1 %v4519_v18  ;;  %v4529_v15 = vld [vmem:[#allocation21_spill] sm:$0xff]  ;;  %v4530_v18 = vld [vmem:[#allocation22_spill] sm:$0xff] }
 0x17b   :  { %927 = vmatprep.subr.bf16.mxu0 %v4520_v14  ;;  %970 = vmatprep.subr.bf16.mxu1 %v4521_v19  ;;  %v4531_v14 = vld [vmem:[#allocation23_spill] sm:$0xff]  ;;  %v4532_v19 = vld [vmem:[#allocation24_spill] sm:$0xff] }
 0x17e   :  { %928 = vmatpush1.bf16.msra.mxu0 %v4522_v22  ;;  %971 = vmatpush1.bf16.msra.mxu1 %v4523_v27  ;;  %v4533_v22 = vld [vmem:[#allocation25_spill] sm:$0xff] }
 0x17f   :  { %929 = vmatprep.subr.bf16.mxu0 %v4524_v24  ;;  %972 = vmatprep.subr.bf16.mxu1 %v4525_v31 }
 0x182   :  { %930 = vmatpush1.bf16.msra.mxu0 %v4526_v30  ;;  %973 = vmatpush1.bf16.msra.mxu1 %v4527_v25 }
 0x183   :  { %931 = vmatprep.subr.bf16.mxu0 %v4528_v20  ;;  %974 = vmatprep.subr.bf16.mxu1 %v4529_v15 }
 0x186   :  { %932 = vmatpush1.bf16.msra.mxu0 %v4530_v18  ;;  %975 = vmatpush1.bf16.msra.mxu1 %v4531_v14 }
 0x187   :  { %1009 = vmatprep.subr.bf16.mxu0 %v4532_v19  ;;  %1052 = vmatprep.subr.bf16.mxu1 %v4533_v22 }
 0x23c   :  { %v805_v27 = vpop.f32.mrb[4].mxu0  ;;  %v848_v24 = vpop.f32.mrb[4].mxu1 }
 0x23d   :  { %v857_v31 = vadd.f32 %v805_v27, %v3440_v26  ;;  %v807_v17 = vpop.f32.mrb[5].mxu0  ;;  %v850_v30 = vpop.f32.mrb[5].mxu1 }
 0x23e   :  { %v858_v25 = vadd.f32 %v807_v17, %v3442_v29  ;;  %v809_v34 = vpop.f32.mrb[6].mxu0  ;;  %v852_v20 = vpop.f32.mrb[6].mxu1  ;;  %v860_v27 = vadd.f32 %v850_v30, %v3447_v28  ;;  %v859_v17 = vadd.f32 %v848_v24, %v3450_v13 }
 0x23f   :  { %v2427_v60 = vmul.f32 -1.442695, %v857_v31  ;;  %v861_v15 = vadd.f32 %v809_v34, %v3440_v26  ;;  %v811_v18 = vpop.f32.mrb[7].mxu0  ;;  %v854_v32 = vpop.f32.mrb[7].mxu1  ;;  %v863_v34 = vadd.f32 %v852_v20, %v3450_v13 }
 0x240   :  { %v2429_v14 = vmul.f32 -1.442695, %v858_v25  ;;  %v862_v19 = vadd.f32 %v811_v18, %v3442_v29  ;;  %v2431_v12 = vmul.f32 -1.442695, %v860_v27  ;;  %v864_v31 = vadd.f32 %v854_v32, %v3447_v28 }
 0x241   :  { %2689 = vpow2.f32 %v2427_v60  ;;  %v2428_v22 = vmul.f32 -1.442695, %v861_v15 }
 0x242   :  { %2691 = vpow2.f32 %v2429_v14  ;;  %v2430_v0 = vmul.f32 -1.442695, %v862_v19  ;;  %v2432_v60 = vmul.f32 -1.442695, %v864_v31 }
 0x243   :  { %2693 = vpow2.f32 %v2428_v22 }
 0x244   :  { %2695 = vpow2.f32 %v2430_v0 }
 0x245   :  { %2697 = vtanh.f32 %v859_v17 }
 0x246   :  { %2699 = vpow2.f32 %v2431_v12 }
 0x247   :  { %2701 = vtanh.f32 %v863_v34 }
 0x24b   :  { %v2690_v26 = vpop.eup %2689 }
 0x24c   :  { %v2692_v25 = vpop.eup %2691  ;;  %v871_v11 = vadd.f32 1.0, %v2690_v26 }
 0x24d   :  { %v883_v15 = vadd.f32 1.0, %v2692_v25  ;;  %v2694_v18 = vpop.eup %2693 }
 0x24e   :  { %2703 = vrcp.f32 %v871_v11  ;;  %v872_v14 = vadd.f32 1.0, %v2694_v18  ;;  %v2696_v0 = vpop.eup %2695 }
 0x24f   :  { %2705 = vrcp.f32 %v883_v15  ;;  %v884_v19 = vadd.f32 1.0, %v2696_v0  ;;  %v2698_v32 = vpop.eup %2697 }
 0x250   :  { %2707 = vpow2.f32 %v2432_v60  ;;  %v2700_v22 = vpop.eup %2699 }
 0x251   :  { %2709 = vrcp.f32 %v872_v14  ;;  %v2702_v20 = vpop.eup %2701  ;;  %v897_v31 = vadd.f32 1.0, %v2700_v22 }
 0x252   :  { %2711 = vrcp.f32 %v884_v19 }
 0x253   :  { %2713 = vrcp.f32 %v897_v31  ;;  %v4548_v31 = vld [vmem:[#allocation16_spill] sm:$0xff] }
 0x258   :  { %v2704_v24 = vpop.eup %2703 }
 0x259   :  { %v2706_v30 = vpop.eup %2705  ;;  %v905_v27 = vmul.f32 %v2704_v24, %v2698_v32 }
 0x25a   :  { %v2708_v26 = vpop.eup %2707  ;;  %v903_v12 = vmul.f32 %v2706_v30, %v3456_v23  ;;  %v4539_v30 = vld [vmem:[#allocation7_spill] sm:$0xff] }
 0x25b   :  { %v2710_v17 = vpop.eup %2709  ;;  %v898_v15 = vadd.f32 1.0, %v2708_v26  ;;  %v4545_v26 = vld [vmem:[#allocation13_spill] sm:$0xff] }
 0x25c   :  { %v3542_v34 = vadd.f32 %v905_v27, %v903_v12  ;;  %v906_v11 = vmul.f32 %v2710_v17, %v2702_v20  ;;  %v2712_v25 = vpop.eup %2711  ;;  %v3587_v20 = vld [vmem:[%s4363_s2 + $0x4] ss:$16 sps:$4 sm:$0xff]   ;;  %v4547_v17 = vld [vmem:[#allocation15_spill] sm:$0xff] }
 0x25d   :  { %v904_v60 = vmul.f32 %v2712_v25, %v3459_v16  ;;  %v2714_v14 = vpop.eup %2713  ;;  %v2651_v16 = vld [vmem:[%s4365_s0 + $0x10] sm:$0xff]   ;;  %v4546_v12 = vld [vmem:[#allocation14_spill] sm:$0xff] }
 0x25e   :  { %2715 = vtanh.f32 %v3542_v34  ;;  %v4540_v27 = vld [vmem:[#allocation8_spill] sm:$0xff]  ;;  %v4550_v25 = vld [vmem:[#allocation18_spill] sm:$0xff] }
 0x25f   :  { %v3546_v18 = vadd.f32 %v906_v11, %v904_v60  ;;  %2717 = vrcp.f32 %v898_v15  ;;  %v4549_v11 = vld [vmem:[#allocation17_spill] sm:$0xff]  ;;  %v4551_v15 = vld [vmem:[#allocation19_spill] sm:$0xff]  ;;  %v4552_v60 = vld [vmem:[#allocation20_spill] sm:$0xff] }
 0x261   :  { %2719 = vtanh.f32 %v3546_v18 }
 0x268   :  { %v2716_v0 = vpop.eup %2715 }
 0x269   :  { %v2718_v23 = vpop.eup %2717  ;;  %v911_v32 = vmul.f32 %v2716_v0, %v2714_v14  ;;  %v4553_v14 = vld [vmem:[#allocation21_spill] sm:$0xff]  ;;  %v4554_v0 = vld [vmem:[#allocation22_spill] sm:$0xff] }
 0x26b   :  { %v2720_v19 = vpop.eup %2719 }
 0x26c   :  { %v912_v22 = vmul.f32 %v2720_v19, %v2718_v23  ;;  %v4555_v23 = vld [vmem:[#allocation23_spill] sm:$0xff]  ;;  %v4556_v19 = vld [vmem:[#allocation24_spill] sm:$0xff] }
 0x26e   :  { %v916_v24 = vpack.c.bf16 %v912_v22, %v911_v32  ;;  %v4557_v32 = vld [vmem:[#allocation25_spill] sm:$0xff] }
 0x270   :  { %950 = vmatmul.mubr.bf16.vlgmr.msra.gmra.mrb[8].mxu0 %v916_v24  ;;  %993 = vmatmul.mubr.bf16.vlgmr.msra.gmra.mrb[8].mxu1 %v916_v24 }
 0x271   :  { %1010 = vmatpush1.bf16.msra.mxu0 %v3215_v35  ;;  %1053 = vmatpush1.bf16.msra.mxu1 %v3220_v36 }
 0x272   :  { %1011 = vmatprep.subr.bf16.mxu0 %v3227_v37  ;;  %1054 = vmatprep.subr.bf16.mxu1 %v3234_v38 }
 0x273   :  { %1041 = vmatprep.mubr.bf16.mxu0 %v4508_v63  ;;  %1084 = vmatprep.mubr.bf16.mxu1 %v4508_v63 }
 0x275   :  { %1012 = vmatpush1.bf16.msra.mxu0 %v3239_v40  ;;  %1055 = vmatpush1.bf16.msra.mxu1 %v3246_v41 }
 0x276   :  { %1013 = vmatprep.subr.bf16.mxu0 %v3251_v42  ;;  %1056 = vmatprep.subr.bf16.mxu1 %v3258_v43 }
 0x279   :  { %1014 = vmatpush1.bf16.msra.mxu0 %v3265_v44  ;;  %1057 = vmatpush1.bf16.msra.mxu1 %v3270_v45 }
 0x27a   :  { %1015 = vmatprep.subr.bf16.mxu0 %v3277_v46  ;;  %1058 = vmatprep.subr.bf16.mxu1 %v3284_v47 }
 0x27d   :  { %1016 = vmatpush1.bf16.msra.mxu0 %v3289_v48  ;;  %1059 = vmatpush1.bf16.msra.mxu1 %v3294_v49 }
 0x27e   :  { %1017 = vmatprep.subr.bf16.mxu0 %v3299_v50  ;;  %1060 = vmatprep.subr.bf16.mxu1 %v3304_v51 }
 0x281   :  { %1018 = vmatpush1.bf16.msra.mxu0 %v3313_v52  ;;  %1061 = vmatpush1.bf16.msra.mxu1 %v3320_v53 }
 0x282   :  { %1019 = vmatprep.subr.bf16.mxu0 %v3327_v54  ;;  %1062 = vmatprep.subr.bf16.mxu1 %v3332_v55 }
 0x285   :  { %1020 = vmatpush1.bf16.msra.mxu0 %v3339_v56  ;;  %1063 = vmatpush1.bf16.msra.mxu1 %v3344_v57 }
 0x286   :  { %1021 = vmatprep.subr.bf16.mxu0 %v3351_v58  ;;  %1064 = vmatprep.subr.bf16.mxu1 %v3356_v59 }
 0x289   :  { %1022 = vmatpush1.bf16.msra.mxu0 %v4510_v21  ;;  %1065 = vmatpush1.bf16.msra.mxu1 %v3368_v61 }
 0x28a   :  { %1023 = vmatprep.subr.bf16.mxu0 %v3375_v62  ;;  %1066 = vmatprep.subr.bf16.mxu1 %v4511_v33 }
 0x28d   :  { %1024 = vmatpush1.bf16.msra.mxu0 %v3387_v39  ;;  %1067 = vmatpush1.bf16.msra.mxu1 %v3392_v1 }
 0x28e   :  { %1155 = vmatprep.subr.bf16.mxu0 %v3587_v20  ;;  %1198 = vmatprep.subr.bf16.mxu1 %v3020_v2  ;;  %v4534_v2 = vld [vmem:[#allocation2_spill] sm:$0xff] }
 0x290   :  { %1042 = vmatmul.mubr.bf16.vlgmr.msra.gmra.mrb[8].mxu0 %v2651_v16  ;;  %1085 = vmatmul.mubr.bf16.vlgmr.msra.gmra.mrb[8].mxu1 %v2651_v16  ;;  %v4558_v16 = vld [vmem:[#allocation28_spill] sm:$0xff] }
 0x291   :  { %1156 = vmatpush1.bf16.msra.mxu0 %v3026_v3  ;;  %1199 = vmatpush1.bf16.msra.mxu1 %v3031_v4  ;;  %v4535_v3 = vld [vmem:[#allocation3_spill] sm:$0xff]  ;;  %v4536_v4 = vld [vmem:[#allocation4_spill] sm:$0xff] }
 0x292   :  { %1157 = vmatprep.subr.bf16.mxu0 %v3037_v5  ;;  %1200 = vmatprep.subr.bf16.mxu1 %v3044_v6  ;;  %v4537_v5 = vld [vmem:[#allocation5_spill] sm:$0xff]  ;;  %v4538_v6 = vld [vmem:[#allocation6_spill] sm:$0xff] }
 0x293   :  { %1187 = vmatprep.mubr.bf16.mxu0 %v4508_v63  ;;  %1230 = vmatprep.mubr.bf16.mxu1 %v4508_v63 }
 0x295   :  { %1158 = vmatpush1.bf16.msra.mxu0 %v3049_v7  ;;  %1201 = vmatpush1.bf16.msra.mxu1 %v3055_v8  ;;  %v4541_v7 = vld [vmem:[#allocation9_spill] sm:$0xff]  ;;  %v4542_v8 = vld [vmem:[#allocation10_spill] sm:$0xff] }
 0x296   :  { %1159 = vmatprep.subr.bf16.mxu0 %v3061_v9  ;;  %1202 = vmatprep.subr.bf16.mxu1 %v3066_v10  ;;  %v4543_v9 = vld [vmem:[#allocation11_spill] sm:$0xff]  ;;  %v4544_v10 = vld [vmem:[#allocation12_spill] sm:$0xff] }
 0x299   :  { %1160 = vmatpush1.bf16.msra.mxu0 %v4534_v2  ;;  %1203 = vmatpush1.bf16.msra.mxu1 %v4535_v3 }
 0x29a   :  { %1161 = vmatprep.subr.bf16.mxu0 %v4536_v4  ;;  %1204 = vmatprep.subr.bf16.mxu1 %v4537_v5 }
 0x29d   :  { %1162 = vmatpush1.bf16.msra.mxu0 %v4538_v6  ;;  %1205 = vmatpush1.bf16.msra.mxu1 %v4539_v30 }
 0x29e   :  { %1163 = vmatprep.subr.bf16.mxu0 %v4540_v27  ;;  %1206 = vmatprep.subr.bf16.mxu1 %v4541_v7 }
 0x2a1   :  { %1164 = vmatpush1.bf16.msra.mxu0 %v4542_v8  ;;  %1207 = vmatpush1.bf16.msra.mxu1 %v4543_v9 }
 0x2a2   :  { %1165 = vmatprep.subr.bf16.mxu0 %v4544_v10  ;;  %1208 = vmatprep.subr.bf16.mxu1 %v4545_v26 }
 0x2a5   :  { %1166 = vmatpush1.bf16.msra.mxu0 %v4546_v12  ;;  %1209 = vmatpush1.bf16.msra.mxu1 %v4547_v17 }
 0x2a6   :  { %1167 = vmatprep.subr.bf16.mxu0 %v4548_v31  ;;  %1210 = vmatprep.subr.bf16.mxu1 %v4549_v11 }
 0x2a9   :  { %1168 = vmatpush1.bf16.msra.mxu0 %v4550_v25  ;;  %1211 = vmatpush1.bf16.msra.mxu1 %v4551_v15 }
 0x2aa   :  { %1169 = vmatprep.subr.bf16.mxu0 %v4552_v60  ;;  %1212 = vmatprep.subr.bf16.mxu1 %v4553_v14 }
 0x2ad   :  { %1170 = vmatpush1.bf16.msra.mxu0 %v4554_v0  ;;  %1213 = vmatpush1.bf16.msra.mxu1 %v4555_v23 }
 0x2ae   :  { %1247 = vmatprep.subr.bf16.mxu0 %v4556_v19  ;;  %1290 = vmatprep.subr.bf16.mxu1 %v4557_v32 }
 0x363   :  { %v1043_v22 = vpop.f32.mrb[8].mxu0  ;;  %v1086_v24 = vpop.f32.mrb[8].mxu1 }
 0x364   :  { %v1095_v2 = vadd.f32 %v1043_v22, %v4558_v16  ;;  %v1045_v3 = vpop.f32.mrb[9].mxu0  ;;  %v1088_v4 = vpop.f32.mrb[9].mxu1  ;;  %v1097_v11 = vadd.f32 %v1086_v24, %v3450_v13 }
 0x365   :  { %v1096_v5 = vadd.f32 %v1045_v3, %v3442_v29  ;;  %v1047_v6 = vpop.f32.mrb[10].mxu0  ;;  %v1090_v30 = vpop.f32.mrb[10].mxu1  ;;  %v1098_v31 = vadd.f32 %v1088_v4, %v3447_v28 }
 0x366   :  { %v2436_v27 = vmul.f32 -1.442695, %v1095_v2  ;;  %v1099_v7 = vadd.f32 %v1047_v6, %v4558_v16  ;;  %v1049_v8 = vpop.f32.mrb[11].mxu0  ;;  %v1092_v9 = vpop.f32.mrb[11].mxu1  ;;  %v1101_v60 = vadd.f32 %v1090_v30, %v3450_v13 }
 0x367   :  { %v2438_v10 = vmul.f32 -1.442695, %v1096_v5  ;;  %v1100_v26 = vadd.f32 %v1049_v8, %v3442_v29  ;;  %v2440_v25 = vmul.f32 -1.442695, %v1098_v31  ;;  %v1102_v15 = vadd.f32 %v1092_v9, %v3447_v28 }
 0x368   :  { %2721 = vpow2.f32 %v2436_v27  ;;  %v2437_v12 = vmul.f32 -1.442695, %v1099_v7 }
 0x369   :  { %2723 = vpow2.f32 %v2438_v10  ;;  %v2439_v17 = vmul.f32 -1.442695, %v1100_v26  ;;  %v2441_v19 = vmul.f32 -1.442695, %v1102_v15 }
 0x36a   :  { %2725 = vpow2.f32 %v2437_v12 }
 0x36b   :  { %2727 = vpow2.f32 %v2439_v17 }
 0x36c   :  { %2729 = vtanh.f32 %v1097_v11 }
 0x36d   :  { %2731 = vpow2.f32 %v2440_v25 }
 0x36e   :  { %2733 = vtanh.f32 %v1101_v60 }
 0x372   :  { %v2722_v14 = vpop.eup %2721 }
 0x373   :  { %v2724_v0 = vpop.eup %2723  ;;  %v1109_v23 = vadd.f32 1.0, %v2722_v14 }
 0x374   :  { %v1121_v32 = vadd.f32 1.0, %v2724_v0  ;;  %v2726_v22 = vpop.eup %2725 }
 0x375   :  { %2735 = vrcp.f32 %v1109_v23  ;;  %v1110_v2 = vadd.f32 1.0, %v2726_v22  ;;  %v2728_v3 = vpop.eup %2727  ;;  %v3862_v22 = vld [vmem:[%s4363_s2 + $0xe8] ss:$16 sps:$4 sm:$0xff]  }
 0x376   :  { %2737 = vrcp.f32 %v1121_v32  ;;  %v1122_v24 = vadd.f32 1.0, %v2728_v3  ;;  %v2730_v4 = vpop.eup %2729  ;;  %4580 = vst [vmem:[#allocation21_spill] sm:$0xff] %v3862_v22  ;;  %v3874_v3 = vld [vmem:[%s4364_s1 + $0xc] ss:$16 sps:$4 sm:$0xff]  }
 0x377   :  { %2739 = vpow2.f32 %v2441_v19  ;;  %v2732_v5 = vpop.eup %2731  ;;  %4582 = vst [vmem:[#allocation23_spill] sm:$0xff] %v3874_v3 }
 0x378   :  { %2741 = vrcp.f32 %v1110_v2  ;;  %v2734_v6 = vpop.eup %2733  ;;  %v1135_v26 = vadd.f32 1.0, %v2732_v5  ;;  %v3868_v2 = vld [vmem:[%s4364_s1 + $0x4] ss:$16 sps:$4 sm:$0xff]  }
 0x379   :  { %2743 = vrcp.f32 %v1122_v24  ;;  %4581 = vst [vmem:[#allocation22_spill] sm:$0xff] %v3868_v2 }
 0x37a   :  { %2745 = vrcp.f32 %v1135_v26 }
 0x37f   :  { %v2736_v30 = vpop.eup %2735 }
 0x380   :  { %v2738_v27 = vpop.eup %2737  ;;  %v1143_v7 = vmul.f32 %v2736_v30, %v2730_v4 }
 0x381   :  { %v2740_v8 = vpop.eup %2739  ;;  %v1141_v9 = vmul.f32 %v2738_v27, %v3542_v34 }
 0x382   :  { %v2742_v10 = vpop.eup %2741  ;;  %v1136_v11 = vadd.f32 1.0, %v2740_v8 }
 0x383   :  { %v3634_v12 = vadd.f32 %v1143_v7, %v1141_v9  ;;  %v1144_v17 = vmul.f32 %v2742_v10, %v2734_v6  ;;  %v2744_v31 = vpop.eup %2743 }
 0x384   :  { %v1142_v25 = vmul.f32 %v2744_v31, %v3546_v18  ;;  %v2746_v60 = vpop.eup %2745  ;;  %v3856_v18 = vld [vmem:[%s4363_s2 + $0xe0] ss:$16 sps:$4 sm:$0xff]  }
 0x385   :  { %2747 = vtanh.f32 %v3634_v12  ;;  %4579 = vst [vmem:[#allocation20_spill] sm:$0xff] %v3856_v18 }
 0x386   :  { %v3638_v15 = vadd.f32 %v1144_v17, %v1142_v25  ;;  %2749 = vrcp.f32 %v1136_v11 }
 0x388   :  { %2751 = vtanh.f32 %v3638_v15 }
 0x38f   :  { %v2748_v14 = vpop.eup %2747 }
 0x390   :  { %v2750_v34 = vpop.eup %2749  ;;  %v1149_v23 = vmul.f32 %v2748_v14, %v2746_v60 }
 0x392   :  { %v2752_v0 = vpop.eup %2751 }
 0x393   :  { %v1150_v19 = vmul.f32 %v2752_v0, %v2750_v34 }
 0x395   :  { %v1154_v32 = vpack.c.bf16 %v1150_v19, %v1149_v23 }
 0x397   :  { %1188 = vmatmul.mubr.bf16.vlgmr.msra.gmra.mrb[12].mxu0 %v1154_v32  ;;  %1231 = vmatmul.mubr.bf16.vlgmr.msra.gmra.mrb[12].mxu1 %v1154_v32 }
 0x398   :  { %1248 = vmatpush1.bf16.msra.mxu0 %v3215_v35  ;;  %1291 = vmatpush1.bf16.msra.mxu1 %v3220_v36  ;;  %v2652_v35 = vld [vmem:[%s4365_s0 + $0x18] sm:$0xff]  }
 0x399   :  { %1249 = vmatprep.subr.bf16.mxu0 %v3227_v37  ;;  %1292 = vmatprep.subr.bf16.mxu1 %v3234_v38  ;;  %v3680_v36 = vld [vmem:[%s4363_s2 + $0xc] ss:$16 sps:$4 sm:$0xff]   ;;  %v3686_v37 = vld [vmem:[%s4363_s2] ss:$16 sps:$4 sm:$0xff]   ;;  %v3698_v38 = vld [vmem:[%s4363_s2 + $0x24] ss:$16 sps:$4 sm:$0xff]  }
 0x39a   :  { %1279 = vmatprep.mubr.bf16.mxu0 %v4508_v63  ;;  %1322 = vmatprep.mubr.bf16.mxu1 %v4508_v63 }
 0x39c   :  { %1250 = vmatpush1.bf16.msra.mxu0 %v3239_v40  ;;  %1293 = vmatpush1.bf16.msra.mxu1 %v3246_v41  ;;  %v3704_v40 = vld [vmem:[%s4363_s2 + $0x2c] ss:$16 sps:$4 sm:$0xff]   ;;  %v3712_v41 = vld [vmem:[%s4363_s2 + $0x20] ss:$16 sps:$4 sm:$0xff]  }
 0x39d   :  { %1251 = vmatprep.subr.bf16.mxu0 %v3251_v42  ;;  %1294 = vmatprep.subr.bf16.mxu1 %v3258_v43  ;;  %v3718_v42 = vld [vmem:[%s4363_s2 + $0x28] ss:$16 sps:$4 sm:$0xff]   ;;  %v3724_v43 = vld [vmem:[%s4363_s2 + $0x44] ss:$16 sps:$4 sm:$0xff]  }
 0x3a0   :  { %1252 = vmatpush1.bf16.msra.mxu0 %v3265_v44  ;;  %1295 = vmatpush1.bf16.msra.mxu1 %v3270_v45  ;;  %v3730_v44 = vld [vmem:[%s4363_s2 + $0x4c] ss:$16 sps:$4 sm:$0xff]   ;;  %v3736_v45 = vld [vmem:[%s4363_s2 + $0x40] ss:$16 sps:$4 sm:$0xff]  }
 0x3a1   :  { %1253 = vmatprep.subr.bf16.mxu0 %v3277_v46  ;;  %1296 = vmatprep.subr.bf16.mxu1 %v3284_v47  ;;  %4559 = vst [vmem:[#allocation26_spill] sm:$0xff] %v3736_v45  ;;  %v3742_v46 = vld [vmem:[%s4363_s2 + $0x48] ss:$16 sps:$4 sm:$0xff]   ;;  %v3748_v47 = vld [vmem:[%s4363_s2 + $0x64] ss:$16 sps:$4 sm:$0xff]  }
 0x3a2   :  { %4560 = vst [vmem:[#allocation27_spill] sm:$0xff] %v3742_v46  ;;  %4561 = vst [vmem:[#allocation2_spill] sm:$0xff] %v3748_v47 }
 0x3a4   :  { %1254 = vmatpush1.bf16.msra.mxu0 %v3289_v48  ;;  %1297 = vmatpush1.bf16.msra.mxu1 %v3294_v49  ;;  %v3754_v48 = vld [vmem:[%s4363_s2 + $0x6c] ss:$16 sps:$4 sm:$0xff]   ;;  %v3760_v49 = vld [vmem:[%s4363_s2 + $0x60] ss:$16 sps:$4 sm:$0xff]  }
 0x3a5   :  { %1255 = vmatprep.subr.bf16.mxu0 %v3299_v50  ;;  %1298 = vmatprep.subr.bf16.mxu1 %v3304_v51  ;;  %4562 = vst [vmem:[#allocation3_spill] sm:$0xff] %v3754_v48  ;;  %4563 = vst [vmem:[#allocation4_spill] sm:$0xff] %v3760_v49  ;;  %v3766_v50 = vld [vmem:[%s4363_s2 + $0x68] ss:$16 sps:$4 sm:$0xff]   ;;  %v3772_v51 = vld [vmem:[%s4363_s2 + $0x84] ss:$16 sps:$4 sm:$0xff]  }
 0x3a6   :  { %4564 = vst [vmem:[#allocation5_spill] sm:$0xff] %v3766_v50  ;;  %4565 = vst [vmem:[#allocation6_spill] sm:$0xff] %v3772_v51 }
 0x3a8   :  { %1256 = vmatpush1.bf16.msra.mxu0 %v3313_v52  ;;  %1299 = vmatpush1.bf16.msra.mxu1 %v3320_v53  ;;  %v3778_v52 = vld [vmem:[%s4363_s2 + $0x8c] ss:$16 sps:$4 sm:$0xff]   ;;  %v3784_v53 = vld [vmem:[%s4363_s2 + $0x80] ss:$16 sps:$4 sm:$0xff]  }
 0x3a9   :  { %1257 = vmatprep.subr.bf16.mxu0 %v3327_v54  ;;  %1300 = vmatprep.subr.bf16.mxu1 %v3332_v55  ;;  %4566 = vst [vmem:[#allocation7_spill] sm:$0xff] %v3778_v52  ;;  %4567 = vst [vmem:[#allocation8_spill] sm:$0xff] %v3784_v53  ;;  %v3790_v54 = vld [vmem:[%s4363_s2 + $0x88] ss:$16 sps:$4 sm:$0xff]   ;;  %v3796_v55 = vld [vmem:[%s4363_s2 + $0xa4] ss:$16 sps:$4 sm:$0xff]  }
 0x3aa   :  { %4568 = vst [vmem:[#allocation9_spill] sm:$0xff] %v3790_v54  ;;  %4569 = vst [vmem:[#allocation10_spill] sm:$0xff] %v3796_v55 }
 0x3ac   :  { %1258 = vmatpush1.bf16.msra.mxu0 %v3339_v56  ;;  %1301 = vmatpush1.bf16.msra.mxu1 %v3344_v57  ;;  %v3802_v56 = vld [vmem:[%s4363_s2 + $0xac] ss:$16 sps:$4 sm:$0xff]   ;;  %v3808_v57 = vld [vmem:[%s4363_s2 + $0xa0] ss:$16 sps:$4 sm:$0xff]  }
 0x3ad   :  { %1259 = vmatprep.subr.bf16.mxu0 %v3351_v58  ;;  %1302 = vmatprep.subr.bf16.mxu1 %v3356_v59  ;;  %4570 = vst [vmem:[#allocation11_spill] sm:$0xff] %v3802_v56  ;;  %4571 = vst [vmem:[#allocation12_spill] sm:$0xff] %v3808_v57  ;;  %v3814_v58 = vld [vmem:[%s4363_s2 + $0xa8] ss:$16 sps:$4 sm:$0xff]   ;;  %v3820_v59 = vld [vmem:[%s4363_s2 + $0xc4] ss:$16 sps:$4 sm:$0xff]  }
 0x3ae   :  { %4572 = vst [vmem:[#allocation13_spill] sm:$0xff] %v3814_v58  ;;  %4573 = vst [vmem:[#allocation14_spill] sm:$0xff] %v3820_v59 }
 0x3b0   :  { %1260 = vmatpush1.bf16.msra.mxu0 %v4510_v21  ;;  %1303 = vmatpush1.bf16.msra.mxu1 %v3368_v61  ;;  %v3826_v61 = vld [vmem:[%s4363_s2 + $0xcc] ss:$16 sps:$4 sm:$0xff]   ;;  %v3844_v21 = vld [vmem:[%s4363_s2 + $0xe4] ss:$16 sps:$4 sm:$0xff]  }
 0x3b1   :  { %1261 = vmatprep.subr.bf16.mxu0 %v3375_v62  ;;  %1304 = vmatprep.subr.bf16.mxu1 %v4511_v33  ;;  %4574 = vst [vmem:[#allocation15_spill] sm:$0xff] %v3826_v61  ;;  %v3832_v62 = vld [vmem:[%s4363_s2 + $0xc0] ss:$16 sps:$4 sm:$0xff]   ;;  %4577 = vst [vmem:[#allocation18_spill] sm:$0xff] %v3844_v21  ;;  %v3850_v33 = vld [vmem:[%s4363_s2 + $0xec] ss:$16 sps:$4 sm:$0xff]  }
 0x3b2   :  { %4575 = vst [vmem:[#allocation16_spill] sm:$0xff] %v3832_v62  ;;  %4578 = vst [vmem:[#allocation19_spill] sm:$0xff] %v3850_v33 }
 0x3b4   :  { %1262 = vmatpush1.bf16.msra.mxu0 %v3387_v39  ;;  %1305 = vmatpush1.bf16.msra.mxu1 %v3392_v1  ;;  %v3692_v1 = vld [vmem:[%s4363_s2 + $0x8] ss:$16 sps:$4 sm:$0xff]  }
 0x3b5   :  { %1393 = vmatprep.subr.bf16.mxu0 %v3587_v20  ;;  %1436 = vmatprep.subr.bf16.mxu1 %v3680_v36  ;;  %v3838_v39 = vld [vmem:[%s4363_s2 + $0xc8] ss:$16 sps:$4 sm:$0xff]  }
 0x3b6   :  { %4576 = vst [vmem:[#allocation17_spill] sm:$0xff] %v3838_v39 }
 0x3b7   :  { %1280 = vmatmul.mubr.bf16.vlgmr.msra.gmra.mrb[12].mxu0 %v2652_v35  ;;  %1323 = vmatmul.mubr.bf16.vlgmr.msra.gmra.mrb[12].mxu1 %v2652_v35 }
 0x3b8   :  { %1394 = vmatpush1.bf16.msra.mxu0 %v3686_v37  ;;  %1437 = vmatpush1.bf16.msra.mxu1 %v3692_v1 }
 0x3b9   :  { %1395 = vmatprep.subr.bf16.mxu0 %v3698_v38  ;;  %1438 = vmatprep.subr.bf16.mxu1 %v3704_v40 }
 0x3ba   :  { %1425 = vmatprep.mubr.bf16.mxu0 %v4508_v63  ;;  %1468 = vmatprep.mubr.bf16.mxu1 %v4508_v63 }
 0x3bc   :  { %1396 = vmatpush1.bf16.msra.mxu0 %v3712_v41  ;;  %1439 = vmatpush1.bf16.msra.mxu1 %v3718_v42 }
 0x3bd   :  { %1397 = vmatprep.subr.bf16.mxu0 %v3724_v43  ;;  %1440 = vmatprep.subr.bf16.mxu1 %v3730_v44 }
 0x3c0   :  { %1398 = vmatpush1.bf16.msra.mxu0 %v3736_v45  ;;  %1441 = vmatpush1.bf16.msra.mxu1 %v3742_v46 }
 0x3c1   :  { %1399 = vmatprep.subr.bf16.mxu0 %v3748_v47  ;;  %1442 = vmatprep.subr.bf16.mxu1 %v3754_v48 }
 0x3c4   :  { %1400 = vmatpush1.bf16.msra.mxu0 %v3760_v49  ;;  %1443 = vmatpush1.bf16.msra.mxu1 %v3766_v50 }
 0x3c5   :  { %1401 = vmatprep.subr.bf16.mxu0 %v3772_v51  ;;  %1444 = vmatprep.subr.bf16.mxu1 %v3778_v52 }
 0x3c8   :  { %1402 = vmatpush1.bf16.msra.mxu0 %v3784_v53  ;;  %1445 = vmatpush1.bf16.msra.mxu1 %v3790_v54 }
 0x3c9   :  { %1403 = vmatprep.subr.bf16.mxu0 %v3796_v55  ;;  %1446 = vmatprep.subr.bf16.mxu1 %v3802_v56 }
 0x3cc   :  { %1404 = vmatpush1.bf16.msra.mxu0 %v3808_v57  ;;  %1447 = vmatpush1.bf16.msra.mxu1 %v3814_v58 }
 0x3cd   :  { %1405 = vmatprep.subr.bf16.mxu0 %v3820_v59  ;;  %1448 = vmatprep.subr.bf16.mxu1 %v3826_v61 }
 0x3d0   :  { %1406 = vmatpush1.bf16.msra.mxu0 %v3832_v62  ;;  %1449 = vmatpush1.bf16.msra.mxu1 %v3838_v39 }
 0x3d1   :  { %1407 = vmatprep.subr.bf16.mxu0 %v3844_v21  ;;  %1450 = vmatprep.subr.bf16.mxu1 %v3850_v33 }
 0x3d4   :  { %1408 = vmatpush1.bf16.msra.mxu0 %v3856_v18  ;;  %1451 = vmatpush1.bf16.msra.mxu1 %v3862_v22 }
 0x3d5   :  { %1485 = vmatprep.subr.bf16.mxu0 %v3868_v2  ;;  %1528 = vmatprep.subr.bf16.mxu1 %v3874_v3 }
 0x48a   :  { %v1281_v24 = vpop.f32.mrb[12].mxu0  ;;  %v1324_v4 = vpop.f32.mrb[12].mxu1 }
 0x48b   :  { %v1333_v5 = vadd.f32 %v1281_v24, %v4558_v16  ;;  %v1283_v6 = vpop.f32.mrb[13].mxu0  ;;  %v1326_v30 = vpop.f32.mrb[13].mxu1  ;;  %v1335_v34 = vadd.f32 %v1324_v4, %v3450_v13 }
 0x48c   :  { %v1334_v27 = vadd.f32 %v1283_v6, %v3442_v29  ;;  %v1285_v7 = vpop.f32.mrb[14].mxu0  ;;  %v1328_v8 = vpop.f32.mrb[14].mxu1  ;;  %v1336_v14 = vadd.f32 %v1326_v30, %v3447_v28 }
 0x48d   :  { %v2445_v9 = vmul.f32 -1.442695, %v1333_v5  ;;  %v1337_v10 = vadd.f32 %v1285_v7, %v4558_v16  ;;  %v1287_v26 = vpop.f32.mrb[15].mxu0  ;;  %v1330_v17 = vpop.f32.mrb[15].mxu1  ;;  %v1339_v19 = vadd.f32 %v1328_v8, %v3450_v13 }
 0x48e   :  { %v2447_v31 = vmul.f32 -1.442695, %v1334_v27  ;;  %v1338_v11 = vadd.f32 %v1287_v26, %v3442_v29  ;;  %v2449_v0 = vmul.f32 -1.442695, %v1336_v14  ;;  %v1340_v23 = vadd.f32 %v1330_v17, %v3447_v28 }
 0x48f   :  { %2753 = vpow2.f32 %v2445_v9  ;;  %v2446_v25 = vmul.f32 -1.442695, %v1337_v10 }
 0x490   :  { %2755 = vpow2.f32 %v2447_v31  ;;  %v2448_v60 = vmul.f32 -1.442695, %v1338_v11  ;;  %v2450_v5 = vmul.f32 -1.442695, %v1340_v23 }
 0x491   :  { %2757 = vpow2.f32 %v2446_v25 }
 0x492   :  { %2759 = vpow2.f32 %v2448_v60 }
 0x493   :  { %2761 = vtanh.f32 %v1335_v34 }
 0x494   :  { %2763 = vpow2.f32 %v2449_v0 }
 0x495   :  { %2765 = vtanh.f32 %v1339_v19 }
 0x499   :  { %v2754_v32 = vpop.eup %2753 }
 0x49a   :  { %v2756_v35 = vpop.eup %2755  ;;  %v1347_v24 = vadd.f32 1.0, %v2754_v32 }
 0x49b   :  { %v1359_v6 = vadd.f32 1.0, %v2756_v35  ;;  %v2758_v27 = vpop.eup %2757 }
 0x49c   :  { %2767 = vrcp.f32 %v1347_v24  ;;  %v1348_v30 = vadd.f32 1.0, %v2758_v27  ;;  %v2760_v7 = vpop.eup %2759 }
 0x49d   :  { %2769 = vrcp.f32 %v1359_v6  ;;  %v1360_v4 = vadd.f32 1.0, %v2760_v7  ;;  %v2762_v9 = vpop.eup %2761 }
 0x49e   :  { %2771 = vpow2.f32 %v2450_v5  ;;  %v2764_v10 = vpop.eup %2763 }
 0x49f   :  { %2773 = vrcp.f32 %v1348_v30  ;;  %v2766_v8 = vpop.eup %2765  ;;  %v1373_v14 = vadd.f32 1.0, %v2764_v10  ;;  %v3914_v10 = vld [vmem:[%s4364_s1 + $0x2c] ss:$16 sps:$4 sm:$0xff]  }
 0x4a0   :  { %2775 = vrcp.f32 %v1360_v4  ;;  %v3902_v4 = vld [vmem:[%s4364_s1 + $0x8] ss:$16 sps:$4 sm:$0xff]  }
 0x4a1   :  { %2777 = vrcp.f32 %v1373_v14  ;;  %v3964_v14 = vld [vmem:[%s4364_s1 + $0x6c] ss:$16 sps:$4 sm:$0xff]  }
 0x4a6   :  { %v2768_v26 = vpop.eup %2767 }
 0x4a7   :  { %v2770_v17 = vpop.eup %2769  ;;  %v1381_v31 = vmul.f32 %v2768_v26, %v2762_v9  ;;  %v3908_v9 = vld [vmem:[%s4364_s1 + $0x24] ss:$16 sps:$4 sm:$0xff]   ;;  %v3928_v26 = vld [vmem:[%s4364_s1 + $0x28] ss:$16 sps:$4 sm:$0xff]  }
 0x4a8   :  { %v2772_v11 = vpop.eup %2771  ;;  %v1379_v25 = vmul.f32 %v2770_v17, %v3634_v12  ;;  %v3934_v17 = vld [vmem:[%s4364_s1 + $0x44] ss:$16 sps:$4 sm:$0xff]  }
 0x4a9   :  { %v2774_v60 = vpop.eup %2773  ;;  %v1374_v19 = vadd.f32 1.0, %v2772_v11  ;;  %v3946_v11 = vld [vmem:[%s4364_s1 + $0x40] ss:$16 sps:$4 sm:$0xff]  }
 0x4aa   :  { %v3886_v34 = vadd.f32 %v1381_v31, %v1379_v25  ;;  %v1382_v0 = vmul.f32 %v2774_v60, %v2766_v8  ;;  %v2776_v23 = vpop.eup %2775  ;;  %v3922_v8 = vld [vmem:[%s4364_s1 + $0x20] ss:$16 sps:$4 sm:$0xff]   ;;  %v3940_v31 = vld [vmem:[%s4364_s1 + $0x4c] ss:$16 sps:$4 sm:$0xff]   ;;  %v3952_v25 = vld [vmem:[%s4364_s1 + $0x48] ss:$16 sps:$4 sm:$0xff]  }
 0x4ab   :  { %v1380_v32 = vmul.f32 %v2776_v23, %v3638_v15  ;;  %v2778_v24 = vpop.eup %2777  ;;  %v3896_v15 = vld [vmem:[%s4364_s1] ss:$16 sps:$4 sm:$0xff]   ;;  %v3958_v60 = vld [vmem:[%s4364_s1 + $0x64] ss:$16 sps:$4 sm:$0xff]   ;;  %v3976_v23 = vld [vmem:[%s4364_s1 + $0x68] ss:$16 sps:$4 sm:$0xff]  }
 0x4ac   :  { %2779 = vtanh.f32 %v3886_v34 }
 0x4ad   :  { %v3890_v35 = vadd.f32 %v1382_v0, %v1380_v32  ;;  %2781 = vrcp.f32 %v1374_v19  ;;  %v3970_v0 = vld [vmem:[%s4364_s1 + $0x60] ss:$16 sps:$4 sm:$0xff]   ;;  %v3982_v19 = vld [vmem:[%s4364_s1 + $0x84] ss:$16 sps:$4 sm:$0xff]   ;;  %v3988_v32 = vld [vmem:[%s4364_s1 + $0x8c] ss:$16 sps:$4 sm:$0xff]  }
 0x4af   :  { %2783 = vtanh.f32 %v3890_v35 }
 0x4b6   :  { %v2780_v5 = vpop.eup %2779 }
 0x4b7   :  { %v2782_v12 = vpop.eup %2781  ;;  %v1387_v27 = vmul.f32 %v2780_v5, %v2778_v24  ;;  %v3994_v24 = vld [vmem:[%s4364_s1 + $0x80] ss:$16 sps:$4 sm:$0xff]   ;;  %v4000_v5 = vld [vmem:[%s4364_s1 + $0x88] ss:$16 sps:$4 sm:$0xff]  }
 0x4b9   :  { %v2784_v6 = vpop.eup %2783 }
 0x4ba   :  { %v1388_v30 = vmul.f32 %v2784_v6, %v2782_v12  ;;  %v4006_v12 = vld [vmem:[%s4364_s1 + $0xa4] ss:$16 sps:$4 sm:$0xff]   ;;  %v4012_v6 = vld [vmem:[%s4364_s1 + $0xac] ss:$16 sps:$4 sm:$0xff]  }
 0x4bb   :  { %4583 = vst [vmem:[#allocation24_spill] sm:$0xff] %v4012_v6 }
 0x4bc   :  { %v1392_v7 = vpack.c.bf16 %v1388_v30, %v1387_v27  ;;  %v4018_v27 = vld [vmem:[%s4364_s1 + $0xa0] ss:$16 sps:$4 sm:$0xff]   ;;  %v4024_v30 = vld [vmem:[%s4364_s1 + $0xa8] ss:$16 sps:$4 sm:$0xff]  }
 0x4bd   :  { %4584 = vst [vmem:[#allocation25_spill] sm:$0xff] %v4018_v27  ;;  %4585 = vst [vmem:[#allocation29_spill] sm:$0xff] %v4024_v30 }
 0x4be   :  { %1426 = vmatmul.mubr.bf16.vlgmr.msra.gmra.mrb[16].mxu0 %v1392_v7  ;;  %1469 = vmatmul.mubr.bf16.vlgmr.msra.gmra.mrb[16].mxu1 %v1392_v7  ;;  %v4030_v7 = vld [vmem:[%s4364_s1 + $0xc4] ss:$16 sps:$4 sm:$0xff]  }
 0x4bf   :  { %1486 = vmatpush1.bf16.msra.mxu0 %v3896_v15  ;;  %1529 = vmatpush1.bf16.msra.mxu1 %v3902_v4  ;;  %4586 = vst [vmem:[#allocation30_spill] sm:$0xff] %v4030_v7 }
 0x4c0   :  { %1487 = vmatprep.subr.bf16.mxu0 %v3908_v9  ;;  %1530 = vmatprep.subr.bf16.mxu1 %v3914_v10 }
 0x4c1   :  { %1517 = vmatprep.mubr.bf16.mxu0 %v4508_v63  ;;  %1560 = vmatprep.mubr.bf16.mxu1 %v4508_v63 }
 0x4c3   :  { %1488 = vmatpush1.bf16.msra.mxu0 %v3922_v8  ;;  %1531 = vmatpush1.bf16.msra.mxu1 %v3928_v26 }
 0x4c4   :  { %1489 = vmatprep.subr.bf16.mxu0 %v3934_v17  ;;  %1532 = vmatprep.subr.bf16.mxu1 %v3940_v31 }
 0x4c7   :  { %1490 = vmatpush1.bf16.msra.mxu0 %v3946_v11  ;;  %1533 = vmatpush1.bf16.msra.mxu1 %v3952_v25 }
 0x4c8   :  { %1491 = vmatprep.subr.bf16.mxu0 %v3958_v60  ;;  %1534 = vmatprep.subr.bf16.mxu1 %v3964_v14 }
 0x4cb   :  { %1492 = vmatpush1.bf16.msra.mxu0 %v3970_v0  ;;  %1535 = vmatpush1.bf16.msra.mxu1 %v3976_v23 }
 0x4cc   :  { %1493 = vmatprep.subr.bf16.mxu0 %v3982_v19  ;;  %1536 = vmatprep.subr.bf16.mxu1 %v3988_v32 }
 0x4cf   :  { %1494 = vmatpush1.bf16.msra.mxu0 %v3994_v24  ;;  %1537 = vmatpush1.bf16.msra.mxu1 %v4000_v5 }
 0x4d0   :  { %1495 = vmatprep.subr.bf16.mxu0 %v4006_v12  ;;  %1538 = vmatprep.subr.bf16.mxu1 %v4012_v6  ;;  %v4036_v6 = vld [vmem:[%s4364_s1 + $0xcc] ss:$16 sps:$4 sm:$0xff]  }
 0x4d1   :  { %4587 = vst [vmem:[#allocation31_spill] sm:$0xff] %v4036_v6 }
 0x4d3   :  { %1496 = vmatpush1.bf16.msra.mxu0 %v4018_v27  ;;  %1539 = vmatpush1.bf16.msra.mxu1 %v4024_v30  ;;  %v4042_v27 = vld [vmem:[%s4364_s1 + $0xc0] ss:$16 sps:$4 sm:$0xff]   ;;  %v4048_v30 = vld [vmem:[%s4364_s1 + $0xc8] ss:$16 sps:$4 sm:$0xff]  }
 0x4d4   :  { %1497 = vmatprep.subr.bf16.mxu0 %v4030_v7  ;;  %1540 = vmatprep.subr.bf16.mxu1 %v4036_v6  ;;  %4588 = vst [vmem:[#allocation32_spill] sm:$0xff] %v4042_v27  ;;  %4589 = vst [vmem:[#allocation33_spill] sm:$0xff] %v4048_v30  ;;  %v4054_v7 = vld [vmem:[%s4364_s1 + $0xe4] ss:$16 sps:$4 sm:$0xff]   ;;  %v4060_v6 = vld [vmem:[%s4364_s1 + $0xec] ss:$16 sps:$4 sm:$0xff]  }
 0x4d5   :  { %4590 = vst [vmem:[#allocation34_spill] sm:$0xff] %v4054_v7 }
 0x4d7   :  { %1498 = vmatpush1.bf16.msra.mxu0 %v4042_v27  ;;  %1541 = vmatpush1.bf16.msra.mxu1 %v4048_v30  ;;  %v2653_v27 = vld [vmem:[%s4365_s0 + $0x20] sm:$0xff]  }
 0x4d8   :  { %1499 = vmatprep.subr.bf16.mxu0 %v4054_v7  ;;  %1542 = vmatprep.subr.bf16.mxu1 %v4060_v6  ;;  %v4069_v30 = vld [vmem:[%s4364_s1 + $0xe0] ss:$16 sps:$4 sm:$0xff]   ;;  %v4075_v7 = vld [vmem:[%s4364_s1 + $0xe8] ss:$16 sps:$4 sm:$0xff]  }
 0x4db   :  { %1500 = vmatpush1.bf16.msra.mxu0 %v4069_v30  ;;  %1543 = vmatpush1.bf16.msra.mxu1 %v4075_v7 }
 0x4dc   :  { %1631 = vmatprep.subr.bf16.mxu0 %v3587_v20  ;;  %1674 = vmatprep.subr.bf16.mxu1 %v3680_v36 }
 0x4de   :  { %1518 = vmatmul.mubr.bf16.vlgmr.msra.gmra.mrb[16].mxu0 %v2653_v27  ;;  %1561 = vmatmul.mubr.bf16.vlgmr.msra.gmra.mrb[16].mxu1 %v2653_v27 }
 0x4df   :  { %1632 = vmatpush1.bf16.msra.mxu0 %v3686_v37  ;;  %1675 = vmatpush1.bf16.msra.mxu1 %v3692_v1 }
 0x4e0   :  { %1633 = vmatprep.subr.bf16.mxu0 %v3698_v38  ;;  %1676 = vmatprep.subr.bf16.mxu1 %v3704_v40 }
 0x4e1   :  { %1663 = vmatprep.mubr.bf16.mxu0 %v4508_v63  ;;  %1706 = vmatprep.mubr.bf16.mxu1 %v4508_v63 }
 0x4e3   :  { %1634 = vmatpush1.bf16.msra.mxu0 %v3712_v41  ;;  %1677 = vmatpush1.bf16.msra.mxu1 %v3718_v42 }
 0x4e4   :  { %1635 = vmatprep.subr.bf16.mxu0 %v3724_v43  ;;  %1678 = vmatprep.subr.bf16.mxu1 %v3730_v44 }
 0x4e7   :  { %1636 = vmatpush1.bf16.msra.mxu0 %v3736_v45  ;;  %1679 = vmatpush1.bf16.msra.mxu1 %v3742_v46 }
 0x4e8   :  { %1637 = vmatprep.subr.bf16.mxu0 %v3748_v47  ;;  %1680 = vmatprep.subr.bf16.mxu1 %v3754_v48 }
 0x4eb   :  { %1638 = vmatpush1.bf16.msra.mxu0 %v3760_v49  ;;  %1681 = vmatpush1.bf16.msra.mxu1 %v3766_v50 }
 0x4ec   :  { %1639 = vmatprep.subr.bf16.mxu0 %v3772_v51  ;;  %1682 = vmatprep.subr.bf16.mxu1 %v3778_v52 }
 0x4ef   :  { %1640 = vmatpush1.bf16.msra.mxu0 %v3784_v53  ;;  %1683 = vmatpush1.bf16.msra.mxu1 %v3790_v54 }
 0x4f0   :  { %1641 = vmatprep.subr.bf16.mxu0 %v3796_v55  ;;  %1684 = vmatprep.subr.bf16.mxu1 %v3802_v56 }
 0x4f3   :  { %1642 = vmatpush1.bf16.msra.mxu0 %v3808_v57  ;;  %1685 = vmatpush1.bf16.msra.mxu1 %v3814_v58 }
 0x4f4   :  { %1643 = vmatprep.subr.bf16.mxu0 %v3820_v59  ;;  %1686 = vmatprep.subr.bf16.mxu1 %v3826_v61 }
 0x4f7   :  { %1644 = vmatpush1.bf16.msra.mxu0 %v3832_v62  ;;  %1687 = vmatpush1.bf16.msra.mxu1 %v3838_v39 }
 0x4f8   :  { %1645 = vmatprep.subr.bf16.mxu0 %v3844_v21  ;;  %1688 = vmatprep.subr.bf16.mxu1 %v3850_v33 }
 0x4fb   :  { %1646 = vmatpush1.bf16.msra.mxu0 %v3856_v18  ;;  %1689 = vmatpush1.bf16.msra.mxu1 %v3862_v22 }
 0x4fc   :  { %1723 = vmatprep.subr.bf16.mxu0 %v3868_v2  ;;  %1766 = vmatprep.subr.bf16.mxu1 %v3874_v3 }
 0x5b1   :  { %v1519_v27 = vpop.f32.mrb[16].mxu0  ;;  %v1562_v59 = vpop.f32.mrb[16].mxu1 }
 0x5b2   :  { %v1571_v61 = vadd.f32 %v1519_v27, %v4558_v16  ;;  %v1521_v58 = vpop.f32.mrb[17].mxu0  ;;  %v1564_v62 = vpop.f32.mrb[17].mxu1 }
 0x5b3   :  { %v1572_v39 = vadd.f32 %v1521_v58, %v3442_v29  ;;  %v1523_v57 = vpop.f32.mrb[18].mxu0  ;;  %v1566_v21 = vpop.f32.mrb[18].mxu1  ;;  %v1574_v27 = vadd.f32 %v1564_v62, %v3447_v28  ;;  %v1573_v58 = vadd.f32 %v1562_v59, %v3450_v13 }
 0x5b4   :  { %v2454_v56 = vmul.f32 -1.442695, %v1571_v61  ;;  %v1575_v33 = vadd.f32 %v1523_v57, %v4558_v16  ;;  %v1525_v18 = vpop.f32.mrb[19].mxu0  ;;  %v1568_v55 = vpop.f32.mrb[19].mxu1  ;;  %v1577_v57 = vadd.f32 %v1566_v21, %v3450_v13 }
 0x5b5   :  { %v2456_v22 = vmul.f32 -1.442695, %v1572_v39  ;;  %v1576_v2 = vadd.f32 %v1525_v18, %v3442_v29  ;;  %v2458_v53 = vmul.f32 -1.442695, %v1574_v27  ;;  %v1578_v61 = vadd.f32 %v1568_v55, %v3447_v28 }
 0x5b6   :  { %2785 = vpow2.f32 %v2454_v56  ;;  %v2455_v3 = vmul.f32 -1.442695, %v1575_v33 }
 0x5b7   :  { %2787 = vpow2.f32 %v2456_v22  ;;  %v2457_v54 = vmul.f32 -1.442695, %v1576_v2  ;;  %v2459_v56 = vmul.f32 -1.442695, %v1578_v61 }
 0x5b8   :  { %2789 = vpow2.f32 %v2455_v3 }
 0x5b9   :  { %2791 = vpow2.f32 %v2457_v54 }
 0x5ba   :  { %2793 = vtanh.f32 %v1573_v58 }
 0x5bb   :  { %2795 = vpow2.f32 %v2458_v53 }
 0x5bc   :  { %2797 = vtanh.f32 %v1577_v57 }
 0x5c0   :  { %v2786_v16 = vpop.eup %2785 }
 0x5c1   :  { %v2788_v39 = vpop.eup %2787  ;;  %v1585_v52 = vadd.f32 1.0, %v2786_v16 }
 0x5c2   :  { %v1597_v33 = vadd.f32 1.0, %v2788_v39  ;;  %v2790_v18 = vpop.eup %2789 }
 0x5c3   :  { %2799 = vrcp.f32 %v1585_v52  ;;  %v1586_v62 = vadd.f32 1.0, %v2790_v18  ;;  %v2792_v54 = vpop.eup %2791 }
 0x5c4   :  { %2801 = vrcp.f32 %v1597_v33  ;;  %v1598_v59 = vadd.f32 1.0, %v2792_v54  ;;  %v2794_v55 = vpop.eup %2793 }
 0x5c5   :  { %2803 = vpow2.f32 %v2459_v56  ;;  %v2796_v22 = vpop.eup %2795 }
 0x5c6   :  { %2805 = vrcp.f32 %v1586_v62  ;;  %v2798_v21 = vpop.eup %2797  ;;  %v1611_v61 = vadd.f32 1.0, %v2796_v22 }
 0x5c7   :  { %2807 = vrcp.f32 %v1598_v59 }
 0x5c8   :  { %2809 = vrcp.f32 %v1611_v61  ;;  %v4598_v61 = vld [vmem:[#allocation34_spill] sm:$0xff] }
 0x5cd   :  { %v2800_v2 = vpop.eup %2799 }
 0x5ce   :  { %v2802_v3 = vpop.eup %2801  ;;  %v1619_v27 = vmul.f32 %v2800_v2, %v2794_v55 }
 0x5cf   :  { %v2804_v16 = vpop.eup %2803  ;;  %v1617_v53 = vmul.f32 %v2802_v3, %v3886_v34  ;;  %v4593_v3 = vld [vmem:[#allocation29_spill] sm:$0xff] }
 0x5d0   :  { %v2806_v58 = vpop.eup %2805  ;;  %v1612_v33 = vadd.f32 1.0, %v2804_v16  ;;  %v4595_v16 = vld [vmem:[#allocation31_spill] sm:$0xff] }
 0x5d1   :  { %v4123_v57 = vadd.f32 %v1619_v27, %v1617_v53  ;;  %v1620_v52 = vmul.f32 %v2806_v58, %v2798_v21  ;;  %v2808_v39 = vpop.eup %2807  ;;  %v4592_v21 = vld [vmem:[#allocation25_spill] sm:$0xff]  ;;  %v4594_v27 = vld [vmem:[#allocation30_spill] sm:$0xff]  ;;  %v4596_v53 = vld [vmem:[#allocation32_spill] sm:$0xff] }
 0x5d2   :  { %v1618_v56 = vmul.f32 %v2808_v39, %v3890_v35  ;;  %v2810_v62 = vpop.eup %2809  ;;  %v4591_v35 = vld [vmem:[#allocation24_spill] sm:$0xff]  ;;  %v4597_v58 = vld [vmem:[#allocation33_spill] sm:$0xff] }
 0x5d3   :  { %2811 = vtanh.f32 %v4123_v57  ;;  %v4600_v39 = vld [vmem:[#allocation8_spill] sm:$0xff] }
 0x5d4   :  { %v4127_v18 = vadd.f32 %v1620_v52, %v1618_v56  ;;  %2813 = vrcp.f32 %v1612_v33  ;;  %v2654_v52 = vld [vmem:[%s4365_s0 + $0x28] sm:$0xff]   ;;  %v4601_v33 = vld [vmem:[#allocation9_spill] sm:$0xff]  ;;  %v4602_v56 = vld [vmem:[#allocation10_spill] sm:$0xff] }
 0x5d6   :  { %2815 = vtanh.f32 %v4127_v18 }
 0x5dd   :  { %v2812_v54 = vpop.eup %2811 }
 0x5de   :  { %v2814_v34 = vpop.eup %2813  ;;  %v1625_v55 = vmul.f32 %v2812_v54, %v2810_v62  ;;  %v4603_v62 = vld [vmem:[#allocation11_spill] sm:$0xff]  ;;  %v4604_v54 = vld [vmem:[#allocation12_spill] sm:$0xff] }
 0x5e0   :  { %v2816_v59 = vpop.eup %2815 }
 0x5e1   :  { %v1626_v22 = vmul.f32 %v2816_v59, %v2814_v34  ;;  %v4605_v34 = vld [vmem:[#allocation13_spill] sm:$0xff]  ;;  %v4606_v59 = vld [vmem:[#allocation14_spill] sm:$0xff] }
 0x5e3   :  { %v1630_v2 = vpack.c.bf16 %v1626_v22, %v1625_v55  ;;  %v4607_v55 = vld [vmem:[#allocation15_spill] sm:$0xff]  ;;  %v4608_v22 = vld [vmem:[#allocation16_spill] sm:$0xff] }
 0x5e5   :  { %1664 = vmatmul.mubr.bf16.vlgmr.msra.gmra.mrb[20].mxu0 %v1630_v2  ;;  %1707 = vmatmul.mubr.bf16.vlgmr.msra.gmra.mrb[20].mxu1 %v1630_v2  ;;  %v4609_v2 = vld [vmem:[#allocation17_spill] sm:$0xff] }
 0x5e6   :  { %1724 = vmatpush1.bf16.msra.mxu0 %v3896_v15  ;;  %1767 = vmatpush1.bf16.msra.mxu1 %v3902_v4 }
 0x5e7   :  { %1725 = vmatprep.subr.bf16.mxu0 %v3908_v9  ;;  %1768 = vmatprep.subr.bf16.mxu1 %v3914_v10 }
 0x5e8   :  { %1755 = vmatprep.mubr.bf16.mxu0 %v4508_v63  ;;  %1798 = vmatprep.mubr.bf16.mxu1 %v4508_v63 }
 0x5ea   :  { %1726 = vmatpush1.bf16.msra.mxu0 %v3922_v8  ;;  %1769 = vmatpush1.bf16.msra.mxu1 %v3928_v26 }
 0x5eb   :  { %1727 = vmatprep.subr.bf16.mxu0 %v3934_v17  ;;  %1770 = vmatprep.subr.bf16.mxu1 %v3940_v31 }
 0x5ee   :  { %1728 = vmatpush1.bf16.msra.mxu0 %v3946_v11  ;;  %1771 = vmatpush1.bf16.msra.mxu1 %v3952_v25 }
 0x5ef   :  { %1729 = vmatprep.subr.bf16.mxu0 %v3958_v60  ;;  %1772 = vmatprep.subr.bf16.mxu1 %v3964_v14 }
 0x5f2   :  { %1730 = vmatpush1.bf16.msra.mxu0 %v3970_v0  ;;  %1773 = vmatpush1.bf16.msra.mxu1 %v3976_v23 }
 0x5f3   :  { %1731 = vmatprep.subr.bf16.mxu0 %v3982_v19  ;;  %1774 = vmatprep.subr.bf16.mxu1 %v3988_v32 }
 0x5f6   :  { %1732 = vmatpush1.bf16.msra.mxu0 %v3994_v24  ;;  %1775 = vmatpush1.bf16.msra.mxu1 %v4000_v5 }
 0x5f7   :  { %1733 = vmatprep.subr.bf16.mxu0 %v4006_v12  ;;  %1776 = vmatprep.subr.bf16.mxu1 %v4591_v35 }
 0x5fa   :  { %1734 = vmatpush1.bf16.msra.mxu0 %v4592_v21  ;;  %1777 = vmatpush1.bf16.msra.mxu1 %v4593_v3 }
 0x5fb   :  { %1735 = vmatprep.subr.bf16.mxu0 %v4594_v27  ;;  %1778 = vmatprep.subr.bf16.mxu1 %v4595_v16 }
 0x5fe   :  { %1736 = vmatpush1.bf16.msra.mxu0 %v4596_v53  ;;  %1779 = vmatpush1.bf16.msra.mxu1 %v4597_v58 }
 0x5ff   :  { %1737 = vmatprep.subr.bf16.mxu0 %v4598_v61  ;;  %1780 = vmatprep.subr.bf16.mxu1 %v4060_v6 }
 0x602   :  { %1738 = vmatpush1.bf16.msra.mxu0 %v4069_v30  ;;  %1781 = vmatpush1.bf16.msra.mxu1 %v4075_v7 }
 0x603   :  { %1869 = vmatprep.subr.bf16.mxu0 %v3587_v20  ;;  %1912 = vmatprep.subr.bf16.mxu1 %v3680_v36  ;;  %v4599_v20 = vld [vmem:[#allocation7_spill] sm:$0xff] }
 0x605   :  { %1756 = vmatmul.mubr.bf16.vlgmr.msra.gmra.mrb[20].mxu0 %v2654_v52  ;;  %1799 = vmatmul.mubr.bf16.vlgmr.msra.gmra.mrb[20].mxu1 %v2654_v52  ;;  %v4610_v52 = vld [vmem:[#allocation18_spill] sm:$0xff] }
 0x606   :  { %1870 = vmatpush1.bf16.msra.mxu0 %v3686_v37  ;;  %1913 = vmatpush1.bf16.msra.mxu1 %v3692_v1 }
 0x607   :  { %1871 = vmatprep.subr.bf16.mxu0 %v3698_v38  ;;  %1914 = vmatprep.subr.bf16.mxu1 %v3704_v40 }
 0x608   :  { %1901 = vmatprep.mubr.bf16.mxu0 %v4508_v63  ;;  %1944 = vmatprep.mubr.bf16.mxu1 %v4508_v63 }
 0x60a   :  { %1872 = vmatpush1.bf16.msra.mxu0 %v3712_v41  ;;  %1915 = vmatpush1.bf16.msra.mxu1 %v3718_v42 }
 0x60b   :  { %1873 = vmatprep.subr.bf16.mxu0 %v3724_v43  ;;  %1916 = vmatprep.subr.bf16.mxu1 %v3730_v44 }
 0x60e   :  { %1874 = vmatpush1.bf16.msra.mxu0 %v3736_v45  ;;  %1917 = vmatpush1.bf16.msra.mxu1 %v3742_v46 }
 0x60f   :  { %1875 = vmatprep.subr.bf16.mxu0 %v3748_v47  ;;  %1918 = vmatprep.subr.bf16.mxu1 %v3754_v48 }
 0x612   :  { %1876 = vmatpush1.bf16.msra.mxu0 %v3760_v49  ;;  %1919 = vmatpush1.bf16.msra.mxu1 %v3766_v50 }
 0x613   :  { %1877 = vmatprep.subr.bf16.mxu0 %v3772_v51  ;;  %1920 = vmatprep.subr.bf16.mxu1 %v4599_v20  ;;  %v4616_v20 = vld [vmem:[#allocation28_spill] sm:$0xff] }
 0x616   :  { %1878 = vmatpush1.bf16.msra.mxu0 %v4600_v39  ;;  %1921 = vmatpush1.bf16.msra.mxu1 %v4601_v33  ;;  %v4611_v39 = vld [vmem:[#allocation19_spill] sm:$0xff]  ;;  %v4612_v33 = vld [vmem:[#allocation20_spill] sm:$0xff] }
 0x617   :  { %1879 = vmatprep.subr.bf16.mxu0 %v4602_v56  ;;  %1922 = vmatprep.subr.bf16.mxu1 %v4603_v62  ;;  %v4613_v56 = vld [vmem:[#allocation21_spill] sm:$0xff]  ;;  %v4614_v62 = vld [vmem:[#allocation22_spill] sm:$0xff] }
 0x61a   :  { %1880 = vmatpush1.bf16.msra.mxu0 %v4604_v54  ;;  %1923 = vmatpush1.bf16.msra.mxu1 %v4605_v34  ;;  %v4615_v54 = vld [vmem:[#allocation23_spill] sm:$0xff] }
 0x61b   :  { %1881 = vmatprep.subr.bf16.mxu0 %v4606_v59  ;;  %1924 = vmatprep.subr.bf16.mxu1 %v4607_v55 }
 0x61e   :  { %1882 = vmatpush1.bf16.msra.mxu0 %v4608_v22  ;;  %1925 = vmatpush1.bf16.msra.mxu1 %v4609_v2 }
 0x61f   :  { %1883 = vmatprep.subr.bf16.mxu0 %v4610_v52  ;;  %1926 = vmatprep.subr.bf16.mxu1 %v4611_v39 }
 0x622   :  { %1884 = vmatpush1.bf16.msra.mxu0 %v4612_v33  ;;  %1927 = vmatpush1.bf16.msra.mxu1 %v4613_v56 }
 0x623   :  { %1961 = vmatprep.subr.bf16.mxu0 %v4614_v62  ;;  %2004 = vmatprep.subr.bf16.mxu1 %v4615_v54 }
 0x6d8   :  { %v1757_v34 = vpop.f32.mrb[20].mxu0  ;;  %v1800_v59 = vpop.f32.mrb[20].mxu1 }
 0x6d9   :  { %v1809_v55 = vadd.f32 %v1757_v34, %v4616_v20  ;;  %v1759_v51 = vpop.f32.mrb[21].mxu0  ;;  %v1802_v22 = vpop.f32.mrb[21].mxu1 }
 0x6da   :  { %v1810_v2 = vadd.f32 %v1759_v51, %v3442_v29  ;;  %v1761_v50 = vpop.f32.mrb[22].mxu0  ;;  %v1804_v52 = vpop.f32.mrb[22].mxu1  ;;  %v1812_v34 = vadd.f32 %v1802_v22, %v3447_v28  ;;  %v1811_v51 = vadd.f32 %v1800_v59, %v3450_v13 }
 0x6db   :  { %v2463_v49 = vmul.f32 -1.442695, %v1809_v55  ;;  %v1813_v39 = vadd.f32 %v1761_v50, %v4616_v20  ;;  %v1763_v33 = vpop.f32.mrb[23].mxu0  ;;  %v1806_v48 = vpop.f32.mrb[23].mxu1  ;;  %v1815_v50 = vadd.f32 %v1804_v52, %v3450_v13 }
 0x6dc   :  { %v2465_v56 = vmul.f32 -1.442695, %v1810_v2  ;;  %v1814_v62 = vadd.f32 %v1763_v33, %v3442_v29  ;;  %v2467_v46 = vmul.f32 -1.442695, %v1812_v34  ;;  %v1816_v55 = vadd.f32 %v1806_v48, %v3447_v28 }
 0x6dd   :  { %2817 = vpow2.f32 %v2463_v49  ;;  %v2464_v54 = vmul.f32 -1.442695, %v1813_v39 }
 0x6de   :  { %2819 = vpow2.f32 %v2465_v56  ;;  %v2466_v47 = vmul.f32 -1.442695, %v1814_v62  ;;  %v2468_v49 = vmul.f32 -1.442695, %v1816_v55 }
 0x6df   :  { %2821 = vpow2.f32 %v2464_v54 }
 0x6e0   :  { %2823 = vpow2.f32 %v2466_v47 }
 0x6e1   :  { %2825 = vtanh.f32 %v1811_v51 }
 0x6e2   :  { %2827 = vpow2.f32 %v2467_v46 }
 0x6e3   :  { %2829 = vtanh.f32 %v1815_v50 }
 0x6e7   :  { %v2818_v20 = vpop.eup %2817 }
 0x6e8   :  { %v2820_v2 = vpop.eup %2819  ;;  %v1823_v45 = vadd.f32 1.0, %v2818_v20 }
 0x6e9   :  { %v1835_v39 = vadd.f32 1.0, %v2820_v2  ;;  %v2822_v33 = vpop.eup %2821 }
 0x6ea   :  { %2831 = vrcp.f32 %v1823_v45  ;;  %v1824_v56 = vadd.f32 1.0, %v2822_v33  ;;  %v2824_v47 = vpop.eup %2823 }
 0x6eb   :  { %2833 = vrcp.f32 %v1835_v39  ;;  %v1836_v62 = vadd.f32 1.0, %v2824_v47  ;;  %v2826_v48 = vpop.eup %2825 }
 0x6ec   :  { %2835 = vpow2.f32 %v2468_v49  ;;  %v2828_v54 = vpop.eup %2827 }
 0x6ed   :  { %2837 = vrcp.f32 %v1824_v56  ;;  %v2830_v59 = vpop.eup %2829  ;;  %v1849_v55 = vadd.f32 1.0, %v2828_v54 }
 0x6ee   :  { %2839 = vrcp.f32 %v1836_v62 }
 0x6ef   :  { %2841 = vrcp.f32 %v1849_v55  ;;  %v4631_v55 = vld [vmem:[#allocation14_spill] sm:$0xff] }
 0x6f4   :  { %v2832_v22 = vpop.eup %2831 }
 0x6f5   :  { %v2834_v52 = vpop.eup %2833  ;;  %v1857_v34 = vmul.f32 %v2832_v22, %v2826_v48 }
 0x6f6   :  { %v2836_v20 = vpop.eup %2835  ;;  %v1855_v46 = vmul.f32 %v2834_v52, %v4123_v57  ;;  %v4622_v52 = vld [vmem:[#allocation5_spill] sm:$0xff] }
 0x6f7   :  { %v2838_v51 = vpop.eup %2837  ;;  %v1850_v39 = vadd.f32 1.0, %v2836_v20  ;;  %v4628_v20 = vld [vmem:[#allocation11_spill] sm:$0xff] }
 0x6f8   :  { %v4210_v50 = vadd.f32 %v1857_v34, %v1855_v46  ;;  %v1858_v45 = vmul.f32 %v2838_v51, %v2830_v59  ;;  %v2840_v2 = vpop.eup %2839  ;;  %v2977_v59 = vld [vmem:[%s4363_s2 + $0x4] ss:$16 sps:$4 sm:$0xff]   ;;  %v4630_v51 = vld [vmem:[#allocation13_spill] sm:$0xff] }
 0x6f9   :  { %v1856_v49 = vmul.f32 %v2840_v2, %v4127_v18  ;;  %v2842_v56 = vpop.eup %2841  ;;  %v2655_v18 = vld [vmem:[%s4365_s0 + $0x30] sm:$0xff]   ;;  %v4623_v34 = vld [vmem:[#allocation6_spill] sm:$0xff] }
 0x6fa   :  { %2843 = vtanh.f32 %v4210_v50  ;;  %v4629_v46 = vld [vmem:[#allocation12_spill] sm:$0xff] }
 0x6fb   :  { %v4214_v33 = vadd.f32 %v1858_v45, %v1856_v49  ;;  %2845 = vrcp.f32 %v1850_v39  ;;  %v4632_v45 = vld [vmem:[#allocation15_spill] sm:$0xff]  ;;  %v4633_v2 = vld [vmem:[#allocation16_spill] sm:$0xff]  ;;  %v4634_v39 = vld [vmem:[#allocation17_spill] sm:$0xff] }
 0x6fc   :  { %v4635_v49 = vld [vmem:[#allocation18_spill] sm:$0xff] }
 0x6fd   :  { %2847 = vtanh.f32 %v4214_v33 }
 0x704   :  { %v2844_v47 = vpop.eup %2843 }
 0x705   :  { %v2846_v57 = vpop.eup %2845  ;;  %v1863_v48 = vmul.f32 %v2844_v47, %v2842_v56  ;;  %v4636_v56 = vld [vmem:[#allocation19_spill] sm:$0xff]  ;;  %v4637_v47 = vld [vmem:[#allocation20_spill] sm:$0xff] }
 0x707   :  { %v2848_v62 = vpop.eup %2847 }
 0x708   :  { %v1864_v54 = vmul.f32 %v2848_v62, %v2846_v57  ;;  %v4638_v57 = vld [vmem:[#allocation21_spill] sm:$0xff]  ;;  %v4639_v62 = vld [vmem:[#allocation22_spill] sm:$0xff] }
 0x70a   :  { %v1868_v22 = vpack.c.bf16 %v1864_v54, %v1863_v48  ;;  %v4640_v48 = vld [vmem:[#allocation23_spill] sm:$0xff] }
 0x70c   :  { %1902 = vmatmul.mubr.bf16.vlgmr.msra.gmra.mrb[24].mxu0 %v1868_v22  ;;  %1945 = vmatmul.mubr.bf16.vlgmr.msra.gmra.mrb[24].mxu1 %v1868_v22 }
 0x70d   :  { %1962 = vmatpush1.bf16.msra.mxu0 %v3896_v15  ;;  %2005 = vmatpush1.bf16.msra.mxu1 %v3902_v4 }
 0x70e   :  { %1963 = vmatprep.subr.bf16.mxu0 %v3908_v9  ;;  %2006 = vmatprep.subr.bf16.mxu1 %v3914_v10 }
 0x70f   :  { %1993 = vmatprep.mubr.bf16.mxu0 %v4508_v63  ;;  %2036 = vmatprep.mubr.bf16.mxu1 %v4508_v63 }
 0x711   :  { %1964 = vmatpush1.bf16.msra.mxu0 %v3922_v8  ;;  %2007 = vmatpush1.bf16.msra.mxu1 %v3928_v26 }
 0x712   :  { %1965 = vmatprep.subr.bf16.mxu0 %v3934_v17  ;;  %2008 = vmatprep.subr.bf16.mxu1 %v3940_v31 }
 0x715   :  { %1966 = vmatpush1.bf16.msra.mxu0 %v3946_v11  ;;  %2009 = vmatpush1.bf16.msra.mxu1 %v3952_v25 }
 0x716   :  { %1967 = vmatprep.subr.bf16.mxu0 %v3958_v60  ;;  %2010 = vmatprep.subr.bf16.mxu1 %v3964_v14 }
 0x719   :  { %1968 = vmatpush1.bf16.msra.mxu0 %v3970_v0  ;;  %2011 = vmatpush1.bf16.msra.mxu1 %v3976_v23 }
 0x71a   :  { %1969 = vmatprep.subr.bf16.mxu0 %v3982_v19  ;;  %2012 = vmatprep.subr.bf16.mxu1 %v3988_v32 }
 0x71d   :  { %1970 = vmatpush1.bf16.msra.mxu0 %v3994_v24  ;;  %2013 = vmatpush1.bf16.msra.mxu1 %v4000_v5 }
 0x71e   :  { %1971 = vmatprep.subr.bf16.mxu0 %v4006_v12  ;;  %2014 = vmatprep.subr.bf16.mxu1 %v4591_v35 }
 0x721   :  { %1972 = vmatpush1.bf16.msra.mxu0 %v4592_v21  ;;  %2015 = vmatpush1.bf16.msra.mxu1 %v4593_v3 }
 0x722   :  { %1973 = vmatprep.subr.bf16.mxu0 %v4594_v27  ;;  %2016 = vmatprep.subr.bf16.mxu1 %v4595_v16 }
 0x725   :  { %1974 = vmatpush1.bf16.msra.mxu0 %v4596_v53  ;;  %2017 = vmatpush1.bf16.msra.mxu1 %v4597_v58 }
 0x726   :  { %1975 = vmatprep.subr.bf16.mxu0 %v4598_v61  ;;  %2018 = vmatprep.subr.bf16.mxu1 %v4060_v6 }
 0x729   :  { %1976 = vmatpush1.bf16.msra.mxu0 %v4069_v30  ;;  %2019 = vmatpush1.bf16.msra.mxu1 %v4075_v7 }
 0x72a   :  { %2107 = vmatprep.subr.bf16.mxu0 %v2977_v59  ;;  %2150 = vmatprep.subr.bf16.mxu1 %v3680_v36  ;;  %v4617_v36 = vld [vmem:[#allocation26_spill] sm:$0xff] }
 0x72c   :  { %1994 = vmatmul.mubr.bf16.vlgmr.msra.gmra.mrb[24].mxu0 %v2655_v18  ;;  %2037 = vmatmul.mubr.bf16.vlgmr.msra.gmra.mrb[24].mxu1 %v2655_v18  ;;  %v4641_v18 = vld [vmem:[#allocation28_spill] sm:$0xff] }
 0x72d   :  { %2108 = vmatpush1.bf16.msra.mxu0 %v3686_v37  ;;  %2151 = vmatpush1.bf16.msra.mxu1 %v3692_v1  ;;  %v4618_v37 = vld [vmem:[#allocation27_spill] sm:$0xff]  ;;  %v4619_v1 = vld [vmem:[#allocation2_spill] sm:$0xff] }
 0x72e   :  { %2109 = vmatprep.subr.bf16.mxu0 %v3698_v38  ;;  %2152 = vmatprep.subr.bf16.mxu1 %v3704_v40  ;;  %v4620_v38 = vld [vmem:[#allocation3_spill] sm:$0xff]  ;;  %v4621_v40 = vld [vmem:[#allocation4_spill] sm:$0xff] }
 0x72f   :  { %2139 = vmatprep.mubr.bf16.mxu0 %v4508_v63  ;;  %2182 = vmatprep.mubr.bf16.mxu1 %v4508_v63 }
 0x731   :  { %2110 = vmatpush1.bf16.msra.mxu0 %v3712_v41  ;;  %2153 = vmatpush1.bf16.msra.mxu1 %v3718_v42  ;;  %v4624_v41 = vld [vmem:[#allocation7_spill] sm:$0xff]  ;;  %v4625_v42 = vld [vmem:[#allocation8_spill] sm:$0xff] }
 0x732   :  { %2111 = vmatprep.subr.bf16.mxu0 %v3724_v43  ;;  %2154 = vmatprep.subr.bf16.mxu1 %v3730_v44  ;;  %v4626_v43 = vld [vmem:[#allocation9_spill] sm:$0xff]  ;;  %v4627_v44 = vld [vmem:[#allocation10_spill] sm:$0xff] }
 0x735   :  { %2112 = vmatpush1.bf16.msra.mxu0 %v4617_v36  ;;  %2155 = vmatpush1.bf16.msra.mxu1 %v4618_v37 }
 0x736   :  { %2113 = vmatprep.subr.bf16.mxu0 %v4619_v1  ;;  %2156 = vmatprep.subr.bf16.mxu1 %v4620_v38 }
 0x739   :  { %2114 = vmatpush1.bf16.msra.mxu0 %v4621_v40  ;;  %2157 = vmatpush1.bf16.msra.mxu1 %v4622_v52 }
 0x73a   :  { %2115 = vmatprep.subr.bf16.mxu0 %v4623_v34  ;;  %2158 = vmatprep.subr.bf16.mxu1 %v4624_v41 }
 0x73d   :  { %2116 = vmatpush1.bf16.msra.mxu0 %v4625_v42  ;;  %2159 = vmatpush1.bf16.msra.mxu1 %v4626_v43 }
 0x73e   :  { %2117 = vmatprep.subr.bf16.mxu0 %v4627_v44  ;;  %2160 = vmatprep.subr.bf16.mxu1 %v4628_v20 }
 0x741   :  { %2118 = vmatpush1.bf16.msra.mxu0 %v4629_v46  ;;  %2161 = vmatpush1.bf16.msra.mxu1 %v4630_v51 }
 0x742   :  { %2119 = vmatprep.subr.bf16.mxu0 %v4631_v55  ;;  %2162 = vmatprep.subr.bf16.mxu1 %v4632_v45 }
 0x745   :  { %2120 = vmatpush1.bf16.msra.mxu0 %v4633_v2  ;;  %2163 = vmatpush1.bf16.msra.mxu1 %v4634_v39 }
 0x746   :  { %2121 = vmatprep.subr.bf16.mxu0 %v4635_v49  ;;  %2164 = vmatprep.subr.bf16.mxu1 %v4636_v56 }
 0x749   :  { %2122 = vmatpush1.bf16.msra.mxu0 %v4637_v47  ;;  %2165 = vmatpush1.bf16.msra.mxu1 %v4638_v57 }
 0x74a   :  { %2199 = vmatprep.subr.bf16.mxu0 %v4639_v62  ;;  %2242 = vmatprep.subr.bf16.mxu1 %v4640_v48 }
 0x7ff   :  { %v1995_v54 = vpop.f32.mrb[24].mxu0  ;;  %v2038_v22 = vpop.f32.mrb[24].mxu1 }
 0x800   :  { %v2047_v59 = vadd.f32 %v1995_v54, %v4641_v18  ;;  %v1997_v36 = vpop.f32.mrb[25].mxu0  ;;  %v2040_v37 = vpop.f32.mrb[25].mxu1  ;;  %v2049_v55 = vadd.f32 %v2038_v22, %v3450_v13 }
 0x801   :  { %v2048_v1 = vadd.f32 %v1997_v36, %v3442_v29  ;;  %v1999_v38 = vpop.f32.mrb[26].mxu0  ;;  %v2042_v40 = vpop.f32.mrb[26].mxu1  ;;  %v2050_v51 = vadd.f32 %v2040_v37, %v3447_v28 }
 0x802   :  { %v2472_v52 = vmul.f32 -1.442695, %v2047_v59  ;;  %v2051_v34 = vadd.f32 %v1999_v38, %v4641_v18  ;;  %v2001_v41 = vpop.f32.mrb[27].mxu0  ;;  %v2044_v42 = vpop.f32.mrb[27].mxu1  ;;  %v2053_v39 = vadd.f32 %v2042_v40, %v3450_v13 }
 0x803   :  { %v2474_v43 = vmul.f32 -1.442695, %v2048_v1  ;;  %v2052_v44 = vadd.f32 %v2001_v41, %v3442_v29  ;;  %v2476_v45 = vmul.f32 -1.442695, %v2050_v51  ;;  %v2054_v2 = vadd.f32 %v2044_v42, %v3447_v28 }
 0x804   :  { %2849 = vpow2.f32 %v2472_v52  ;;  %v2473_v20 = vmul.f32 -1.442695, %v2051_v34 }
 0x805   :  { %2851 = vpow2.f32 %v2474_v43  ;;  %v2475_v46 = vmul.f32 -1.442695, %v2052_v44  ;;  %v2477_v57 = vmul.f32 -1.442695, %v2054_v2 }
 0x806   :  { %2853 = vpow2.f32 %v2473_v20 }
 0x807   :  { %2855 = vpow2.f32 %v2475_v46 }
 0x808   :  { %2857 = vtanh.f32 %v2049_v55 }
 0x809   :  { %2859 = vpow2.f32 %v2476_v45 }
 0x80a   :  { %2861 = vtanh.f32 %v2053_v39 }
 0x80e   :  { %v2850_v49 = vpop.eup %2849 }
 0x80f   :  { %v2852_v56 = vpop.eup %2851  ;;  %v2061_v47 = vadd.f32 1.0, %v2850_v49 }
 0x810   :  { %v2073_v62 = vadd.f32 1.0, %v2852_v56  ;;  %v2854_v48 = vpop.eup %2853 }
 0x811   :  { %2863 = vrcp.f32 %v2061_v47  ;;  %v2062_v54 = vadd.f32 1.0, %v2854_v48  ;;  %v2856_v59 = vpop.eup %2855 }
 0x812   :  { %2865 = vrcp.f32 %v2073_v62  ;;  %v2074_v22 = vadd.f32 1.0, %v2856_v59  ;;  %v2858_v36 = vpop.eup %2857 }
 0x813   :  { %2867 = vpow2.f32 %v2477_v57  ;;  %v2860_v37 = vpop.eup %2859 }
 0x814   :  { %2869 = vrcp.f32 %v2062_v54  ;;  %v2862_v1 = vpop.eup %2861  ;;  %v2087_v43 = vadd.f32 1.0, %v2860_v37 }
 0x815   :  { %2871 = vrcp.f32 %v2074_v22 }
 0x816   :  { %2873 = vrcp.f32 %v2087_v43 }
 0x81b   :  { %v2864_v38 = vpop.eup %2863 }
 0x81c   :  { %v2866_v40 = vpop.eup %2865  ;;  %v2095_v52 = vmul.f32 %v2864_v38, %v2858_v36 }
 0x81d   :  { %v2868_v34 = vpop.eup %2867  ;;  %v2093_v41 = vmul.f32 %v2866_v40, %v4210_v50 }
 0x81e   :  { %v2870_v42 = vpop.eup %2869  ;;  %v2088_v51 = vadd.f32 1.0, %v2868_v34 }
 0x81f   :  { %v4299_v44 = vadd.f32 %v2095_v52, %v2093_v41  ;;  %v2096_v20 = vmul.f32 %v2870_v42, %v2862_v1  ;;  %v2872_v46 = vpop.eup %2871 }
 0x820   :  { %v2094_v55 = vmul.f32 %v2872_v46, %v4214_v33  ;;  %v2874_v2 = vpop.eup %2873 }
 0x821   :  { %2875 = vtanh.f32 %v4299_v44 }
 0x822   :  { %v4303_v45 = vadd.f32 %v2096_v20, %v2094_v55  ;;  %2877 = vrcp.f32 %v2088_v51 }
 0x824   :  { %2879 = vtanh.f32 %v4303_v45 }
 0x82b   :  { %v2876_v39 = vpop.eup %2875 }
 0x82c   :  { %v2878_v50 = vpop.eup %2877  ;;  %v2101_v56 = vmul.f32 %v2876_v39, %v2874_v2 }
 0x82e   :  { %v2880_v49 = vpop.eup %2879 }
 0x82f   :  { %v2102_v47 = vmul.f32 %v2880_v49, %v2878_v50 }
 0x831   :  { %v2106_v57 = vpack.c.bf16 %v2102_v47, %v2101_v56 }
 0x833   :  { %2140 = vmatmul.mubr.bf16.vlgmr.msra.gmra.mrb[28].mxu0 %v2106_v57  ;;  %2183 = vmatmul.mubr.bf16.vlgmr.msra.gmra.mrb[28].mxu1 %v2106_v57 }
 0x834   :  { %2200 = vmatpush1.bf16.msra.mxu0 %v3896_v15  ;;  %2243 = vmatpush1.bf16.msra.mxu1 %v3902_v4 }
 0x835   :  { %2201 = vmatprep.subr.bf16.mxu0 %v3908_v9  ;;  %2244 = vmatprep.subr.bf16.mxu1 %v3914_v10 }
 0x836   :  { %2231 = vmatprep.mubr.bf16.mxu0 %v4508_v63  ;;  %2274 = vmatprep.mubr.bf16.mxu1 %v4508_v63  ;;  %v2656_v63 = vld [vmem:[%s4365_s0 + $0x38] sm:$0xff]  }
 0x838   :  { %2202 = vmatpush1.bf16.msra.mxu0 %v3922_v8  ;;  %2245 = vmatpush1.bf16.msra.mxu1 %v3928_v26 }
 0x839   :  { %2203 = vmatprep.subr.bf16.mxu0 %v3934_v17  ;;  %2246 = vmatprep.subr.bf16.mxu1 %v3940_v31 }
 0x83c   :  { %2204 = vmatpush1.bf16.msra.mxu0 %v3946_v11  ;;  %2247 = vmatpush1.bf16.msra.mxu1 %v3952_v25 }
 0x83d   :  { %2205 = vmatprep.subr.bf16.mxu0 %v3958_v60  ;;  %2248 = vmatprep.subr.bf16.mxu1 %v3964_v14 }
 0x840   :  { %2206 = vmatpush1.bf16.msra.mxu0 %v3970_v0  ;;  %2249 = vmatpush1.bf16.msra.mxu1 %v3976_v23 }
 0x841   :  { %2207 = vmatprep.subr.bf16.mxu0 %v3982_v19  ;;  %2250 = vmatprep.subr.bf16.mxu1 %v3988_v32 }
 0x844   :  { %2208 = vmatpush1.bf16.msra.mxu0 %v3994_v24  ;;  %2251 = vmatpush1.bf16.msra.mxu1 %v4000_v5 }
 0x845   :  { %2209 = vmatprep.subr.bf16.mxu0 %v4006_v12  ;;  %2252 = vmatprep.subr.bf16.mxu1 %v4591_v35 }
 0x848   :  { %2210 = vmatpush1.bf16.msra.mxu0 %v4592_v21  ;;  %2253 = vmatpush1.bf16.msra.mxu1 %v4593_v3 }
 0x849   :  { %2211 = vmatprep.subr.bf16.mxu0 %v4594_v27  ;;  %2254 = vmatprep.subr.bf16.mxu1 %v4595_v16 }
 0x84c   :  { %2212 = vmatpush1.bf16.msra.mxu0 %v4596_v53  ;;  %2255 = vmatpush1.bf16.msra.mxu1 %v4597_v58 }
 0x84d   :  { %2213 = vmatprep.subr.bf16.mxu0 %v4598_v61  ;;  %2256 = vmatprep.subr.bf16.mxu1 %v4060_v6 }
 0x850   :  { %2214 = vmatpush1.bf16.msra.mxu0 %v4069_v30  ;;  %2257 = vmatpush1.bf16.msra.mxu1 %v4075_v7 }
 0x853   :  { %2232 = vmatmul.mubr.bf16.vlgmr.msra.gmra.mrb[28].mxu0 %v2656_v63  ;;  %2275 = vmatmul.mubr.bf16.vlgmr.msra.gmra.mrb[28].mxu1 %v2656_v63 }
 0x926   :  { %v2233_v15 = vpop.f32.mrb[28].mxu0  ;;  %v2276_v4 = vpop.f32.mrb[28].mxu1 }
 0x927   :  { %v2285_v9 = vadd.f32 %v2233_v15, %v4641_v18  ;;  %v2235_v10 = vpop.f32.mrb[29].mxu0  ;;  %v2278_v8 = vpop.f32.mrb[29].mxu1  ;;  %v2287_v5 = vadd.f32 %v2276_v4, %v3450_v13 }
 0x928   :  { %v2286_v26 = vadd.f32 %v2235_v10, %v3442_v29  ;;  %v2237_v17 = vpop.f32.mrb[30].mxu0  ;;  %v2280_v31 = vpop.f32.mrb[30].mxu1  ;;  %v2288_v24 = vadd.f32 %v2278_v8, %v3447_v28 }
 0x929   :  { %v2481_v11 = vmul.f32 -1.442695, %v2285_v9  ;;  %v2289_v25 = vadd.f32 %v2237_v17, %v4641_v18  ;;  %v2239_v60 = vpop.f32.mrb[31].mxu0  ;;  %v2282_v14 = vpop.f32.mrb[31].mxu1  ;;  %v2291_v30 = vadd.f32 %v2280_v31, %v3450_v13 }
 0x92a   :  { %v2483_v0 = vmul.f32 -1.442695, %v2286_v26  ;;  %v2290_v23 = vadd.f32 %v2239_v60, %v3442_v29  ;;  %v2485_v12 = vmul.f32 -1.442695, %v2288_v24  ;;  %v2292_v6 = vadd.f32 %v2282_v14, %v3447_v28 }
 0x92b   :  { %2881 = vpow2.f32 %v2481_v11  ;;  %v2482_v19 = vmul.f32 -1.442695, %v2289_v25 }
 0x92c   :  { %2883 = vpow2.f32 %v2483_v0  ;;  %v2484_v32 = vmul.f32 -1.442695, %v2290_v23  ;;  %v2486_v29 = vmul.f32 -1.442695, %v2292_v6 }
 0x92d   :  { %2885 = vpow2.f32 %v2482_v19 }
 0x92e   :  { %2887 = vpow2.f32 %v2484_v32 }
 0x92f   :  { %2889 = vtanh.f32 %v2287_v5 }
 0x930   :  { %2891 = vpow2.f32 %v2485_v12 }
 0x931   :  { %2893 = vtanh.f32 %v2291_v30 }
 0x935   :  { %v2882_v7 = vpop.eup %2881 }
 0x936   :  { %v2884_v35 = vpop.eup %2883  ;;  %v2299_v21 = vadd.f32 1.0, %v2882_v7 }
 0x937   :  { %v2311_v3 = vadd.f32 1.0, %v2884_v35  ;;  %v2886_v27 = vpop.eup %2885 }
 0x938   :  { %2895 = vrcp.f32 %v2299_v21  ;;  %v2300_v16 = vadd.f32 1.0, %v2886_v27  ;;  %v2888_v53 = vpop.eup %2887 }
 0x939   :  { %2897 = vrcp.f32 %v2311_v3  ;;  %v2312_v58 = vadd.f32 1.0, %v2888_v53  ;;  %v2890_v28 = vpop.eup %2889 }
 0x93a   :  { %2899 = vpow2.f32 %v2486_v29  ;;  %v2892_v61 = vpop.eup %2891 }
 0x93b   :  { %2901 = vrcp.f32 %v2300_v16  ;;  %v2894_v13 = vpop.eup %2893  ;;  %v2325_v48 = vadd.f32 1.0, %v2892_v61 }
 0x93c   :  { %2903 = vrcp.f32 %v2312_v58 }
 0x93d   :  { %2905 = vrcp.f32 %v2325_v48 }
 0x942   :  { %v2896_v33 = vpop.eup %2895 }
 0x943   :  { %v2898_v18 = vpop.eup %2897  ;;  %v2333_v62 = vmul.f32 %v2896_v33, %v2890_v28 }
 0x944   :  { %v2900_v54 = vpop.eup %2899  ;;  %v2331_v59 = vmul.f32 %v2898_v18, %v4299_v44 }
 0x945   :  { %v2902_v22 = vpop.eup %2901  ;;  %v2326_v38 = vadd.f32 1.0, %v2900_v54 }
 0x946   :  { %v2335_v36 = vadd.f32 %v2333_v62, %v2331_v59  ;;  %v2334_v37 = vmul.f32 %v2902_v22, %v2894_v13  ;;  %v2904_v1 = vpop.eup %2903 }
 0x947   :  { %v2332_v40 = vmul.f32 %v2904_v1, %v4303_v45  ;;  %v2906_v34 = vpop.eup %2905 }
 0x948   :  { %2907 = vtanh.f32 %v2335_v36  ;;  %2343 = vst [vmem:[%s4367_s5] sm:$0xff] %v2335_v36 }
 0x949   :  { %v2336_v52 = vadd.f32 %v2334_v37, %v2332_v40  ;;  %2909 = vrcp.f32 %v2326_v38 }
 0x94b   :  { %2911 = vtanh.f32 %v2336_v52  ;;  %2344 = vst [vmem:[%s4367_s5 + $0x8] sm:$0xff] %v2336_v52 }
 0x952   :  { %v2908_v41 = vpop.eup %2907 }
 0x953   :  { %v2339_v42 = vmul.f32 %v2908_v41, %v2906_v34  ;;  %v2910_v43 = vpop.eup %2909 }
 0x955   :  { %2341 = vst [vmem:[%s4368_s4] sm:$0xff] %v2339_v42  ;;  %v2912_v44 = vpop.eup %2911 }
 0x956   :  { %v2340_v20 = vmul.f32 %v2912_v44, %v2910_v43 }
 0x958   :  { %2342 = vst [vmem:[%s4368_s4 + $0x8] sm:$0xff] %v2340_v20 }

// kernel: encoder_forward.2
= control target key start
LH: loop header
LB: loop body
LE: loop exit
PB: predicated region body
PF: predicated region fallthrough
CT: control target
= control target key end

     0   :  { %v8574_v1 = vmov 0   ;;  %v6516_v39 = vmov 0.0|0.0   ;;  %s8567_s2 = inlined_call_operand.vmem [shape: bf16[128,512], index: 2, kind: input, shape index: {}]   ;;  %s8568_s1 = inlined_call_operand.vmem [shape: bf16[128,512], index: 1, kind: input, shape index: {}]   ;;  %s8569_s0 = inlined_call_operand.vmem [shape: bf16[8,16,128], index: 0, kind: input, shape index: {}]   ;;  %s8570_s3 = inlined_call_operand.vmem [shape: f32[1,512], index: 3, kind: input, shape index: {}]   ;;  %s8571_s4 = inlined_call_operand.vmem [shape: bf16[8,16,128], index: 4, kind: output, shape index: {0}]   ;;  %s8572_s6 = inlined_call_operand.vmem [shape: f32[16,128], index: 6, kind: output, shape index: {2}]   ;;  %s8573_s5 = inlined_call_operand.vmem [shape: f32[16,128], index: 5, kind: output, shape index: {1}]  }
   0x1   :  { %v6555_v0 = vld [vmem:[%s8567_s2 + $0x4] ss:$16 sps:$4 sm:$0xff]   ;;  %293 = vmatprep.mubr.bf16.mxu0 %v8574_v1  ;;  %336 = vmatprep.mubr.bf16.mxu1 %v8574_v1  ;;  %v6562_v2 = vld [vmem:[%s8567_s2 + $0xc] ss:$16 sps:$4 sm:$0xff]   ;;  %v6568_v3 = vld [vmem:[%s8567_s2] ss:$16 sps:$4 sm:$0xff]  }
   0x2   :  { %261 = vmatprep.subr.bf16.mxu0 %v6555_v0  ;;  %v6573_v4 = vld [vmem:[%s8567_s2 + $0x8] ss:$16 sps:$4 sm:$0xff]   ;;  %304 = vmatprep.subr.bf16.mxu1 %v6562_v2  ;;  %v6579_v5 = vld [vmem:[%s8567_s2 + $0x24] ss:$16 sps:$4 sm:$0xff]   ;;  %v6586_v6 = vld [vmem:[%s8567_s2 + $0x2c] ss:$16 sps:$4 sm:$0xff]  }
   0x3   :  { %262 = vmatpush1.bf16.msra.mxu0 %v6568_v3  ;;  %305 = vmatpush1.bf16.msra.mxu1 %v6573_v4  ;;  %v6591_v7 = vld [vmem:[%s8567_s2 + $0x20] ss:$16 sps:$4 sm:$0xff]   ;;  %v6597_v8 = vld [vmem:[%s8567_s2 + $0x28] ss:$16 sps:$4 sm:$0xff]   ;;  %v6603_v9 = vld [vmem:[%s8567_s2 + $0x44] ss:$16 sps:$4 sm:$0xff]  }
   0x4   :  { %263 = vmatprep.subr.bf16.mxu0 %v6579_v5  ;;  %306 = vmatprep.subr.bf16.mxu1 %v6586_v6  ;;  %v6608_v10 = vld [vmem:[%s8567_s2 + $0x4c] ss:$16 sps:$4 sm:$0xff]   ;;  %v6613_v11 = vld [vmem:[%s8567_s2 + $0x40] ss:$16 sps:$4 sm:$0xff]   ;;  %v6618_v12 = vld [vmem:[%s8567_s2 + $0x48] ss:$16 sps:$4 sm:$0xff]  }
   0x5   :  { %v6625_v13 = vld [vmem:[%s8567_s2 + $0x64] ss:$16 sps:$4 sm:$0xff]   ;;  %v6632_v14 = vld [vmem:[%s8567_s2 + $0x6c] ss:$16 sps:$4 sm:$0xff]   ;;  %v6637_v15 = vld [vmem:[%s8567_s2 + $0x60] ss:$16 sps:$4 sm:$0xff]  }
   0x6   :  { %v6644_v16 = vld [vmem:[%s8567_s2 + $0x68] ss:$16 sps:$4 sm:$0xff]   ;;  %v6649_v17 = vld [vmem:[%s8567_s2 + $0x84] ss:$16 sps:$4 sm:$0xff]   ;;  %v6656_v18 = vld [vmem:[%s8567_s2 + $0x8c] ss:$16 sps:$4 sm:$0xff]  }
   0x7   :  { %264 = vmatpush1.bf16.msra.mxu0 %v6591_v7  ;;  %307 = vmatpush1.bf16.msra.mxu1 %v6597_v8  ;;  %v6661_v19 = vld [vmem:[%s8567_s2 + $0x80] ss:$16 sps:$4 sm:$0xff]   ;;  %v6666_v20 = vld [vmem:[%s8567_s2 + $0x88] ss:$16 sps:$4 sm:$0xff]   ;;  %v6673_v21 = vld [vmem:[%s8567_s2 + $0xa4] ss:$16 sps:$4 sm:$0xff]  }
   0x8   :  { %265 = vmatprep.subr.bf16.mxu0 %v6603_v9  ;;  %308 = vmatprep.subr.bf16.mxu1 %v6608_v10  ;;  %v6680_v22 = vld [vmem:[%s8567_s2 + $0xac] ss:$16 sps:$4 sm:$0xff]   ;;  %v6685_v23 = vld [vmem:[%s8567_s2 + $0xa0] ss:$16 sps:$4 sm:$0xff]   ;;  %v6692_v24 = vld [vmem:[%s8567_s2 + $0xa8] ss:$16 sps:$4 sm:$0xff]  }
   0x9   :  { %v6697_v25 = vld [vmem:[%s8567_s2 + $0xc4] ss:$16 sps:$4 sm:$0xff]   ;;  %v6704_v26 = vld [vmem:[%s8567_s2 + $0xcc] ss:$16 sps:$4 sm:$0xff]   ;;  %v6709_v27 = vld [vmem:[%s8567_s2 + $0xc0] ss:$16 sps:$4 sm:$0xff]  }
   0xa   :  { %v6714_v28 = vld [vmem:[%s8567_s2 + $0xc8] ss:$16 sps:$4 sm:$0xff]   ;;  %v6721_v29 = vld [vmem:[%s8567_s2 + $0xe4] ss:$16 sps:$4 sm:$0xff]   ;;  %v6728_v30 = vld [vmem:[%s8567_s2 + $0xec] ss:$16 sps:$4 sm:$0xff]  }
   0xb   :  { %266 = vmatpush1.bf16.msra.mxu0 %v6613_v11  ;;  %309 = vmatpush1.bf16.msra.mxu1 %v6618_v12  ;;  %v6733_v31 = vld [vmem:[%s8567_s2 + $0xe0] ss:$16 sps:$4 sm:$0xff]   ;;  %v6738_v32 = vld [vmem:[%s8567_s2 + $0xe8] ss:$16 sps:$4 sm:$0xff]   ;;  %v6745_v33 = vld [vmem:[%s8568_s1 + $0x4] ss:$16 sps:$4 sm:$0xff]  }
   0xc   :  { %267 = vmatprep.subr.bf16.mxu0 %v6625_v13  ;;  %310 = vmatprep.subr.bf16.mxu1 %v6632_v14  ;;  %v6752_v34 = vld [vmem:[%s8568_s1 + $0xc] ss:$16 sps:$4 sm:$0xff]   ;;  %v6757_v35 = vld [vmem:[%s8568_s1] ss:$16 sps:$4 sm:$0xff]   ;;  %v6762_v36 = vld [vmem:[%s8568_s1 + $0x8] ss:$16 sps:$4 sm:$0xff]  }
   0xd   :  { %v6769_v37 = vld [vmem:[%s8568_s1 + $0x24] ss:$16 sps:$4 sm:$0xff]   ;;  %v6776_v38 = vld [vmem:[%s8568_s1 + $0x2c] ss:$16 sps:$4 sm:$0xff]   ;;  %v6781_v40 = vld [vmem:[%s8568_s1 + $0x20] ss:$16 sps:$4 sm:$0xff]  }
   0xe   :  { %v6786_v41 = vld [vmem:[%s8568_s1 + $0x28] ss:$16 sps:$4 sm:$0xff]   ;;  %v6793_v42 = vld [vmem:[%s8568_s1 + $0x44] ss:$16 sps:$4 sm:$0xff]   ;;  %v6800_v43 = vld [vmem:[%s8568_s1 + $0x4c] ss:$16 sps:$4 sm:$0xff]  }
   0xf   :  { %268 = vmatpush1.bf16.msra.mxu0 %v6637_v15  ;;  %311 = vmatpush1.bf16.msra.mxu1 %v6644_v16  ;;  %v6807_v44 = vld [vmem:[%s8568_s1 + $0x40] ss:$16 sps:$4 sm:$0xff]   ;;  %v6812_v45 = vld [vmem:[%s8568_s1 + $0x48] ss:$16 sps:$4 sm:$0xff]   ;;  %v6819_v46 = vld [vmem:[%s8568_s1 + $0x64] ss:$16 sps:$4 sm:$0xff]  }
  0x10   :  { %269 = vmatprep.subr.bf16.mxu0 %v6649_v17  ;;  %312 = vmatprep.subr.bf16.mxu1 %v6656_v18  ;;  %v6826_v47 = vld [vmem:[%s8568_s1 + $0x6c] ss:$16 sps:$4 sm:$0xff]   ;;  %v6831_v48 = vld [vmem:[%s8568_s1 + $0x60] ss:$16 sps:$4 sm:$0xff]   ;;  %v6836_v49 = vld [vmem:[%s8568_s1 + $0x68] ss:$16 sps:$4 sm:$0xff]  }
  0x11   :  { %v6841_v50 = vld [vmem:[%s8568_s1 + $0x84] ss:$16 sps:$4 sm:$0xff]   ;;  %v6846_v51 = vld [vmem:[%s8568_s1 + $0x8c] ss:$16 sps:$4 sm:$0xff]   ;;  %v6855_v52 = vld [vmem:[%s8568_s1 + $0x80] ss:$16 sps:$4 sm:$0xff]  }
  0x12   :  { %v6860_v53 = vld [vmem:[%s8568_s1 + $0x88] ss:$16 sps:$4 sm:$0xff]   ;;  %v6865_v54 = vld [vmem:[%s8568_s1 + $0xa4] ss:$16 sps:$4 sm:$0xff]   ;;  %v6870_v55 = vld [vmem:[%s8568_s1 + $0xac] ss:$16 sps:$4 sm:$0xff]  }
  0x13   :  { %270 = vmatpush1.bf16.msra.mxu0 %v6661_v19  ;;  %313 = vmatpush1.bf16.msra.mxu1 %v6666_v20  ;;  %v6879_v56 = vld [vmem:[%s8568_s1 + $0xa0] ss:$16 sps:$4 sm:$0xff]   ;;  %v6884_v57 = vld [vmem:[%s8568_s1 + $0xa8] ss:$16 sps:$4 sm:$0xff]   ;;  %v6889_v58 = vld [vmem:[%s8568_s1 + $0xc4] ss:$16 sps:$4 sm:$0xff]  }
  0x14   :  { %271 = vmatprep.subr.bf16.mxu0 %v6673_v21  ;;  %314 = vmatprep.subr.bf16.mxu1 %v6680_v22  ;;  %v6894_v59 = vld [vmem:[%s8568_s1 + $0xcc] ss:$16 sps:$4 sm:$0xff]   ;;  %v6903_v60 = vld [vmem:[%s8568_s1 + $0xc0] ss:$16 sps:$4 sm:$0xff]   ;;  %v6908_v61 = vld [vmem:[%s8568_s1 + $0xc8] ss:$16 sps:$4 sm:$0xff]  }
  0x15   :  { %8602 = vst [vmem:[#allocation2_spill] sm:$0xff] %v6894_v59  ;;  %v6913_v62 = vld [vmem:[%s8568_s1 + $0xe4] ss:$16 sps:$4 sm:$0xff]   ;;  %v6918_v63 = vld [vmem:[%s8568_s1 + $0xec] ss:$16 sps:$4 sm:$0xff]  }
  0x16   :  { %8603 = vst [vmem:[#allocation3_spill] sm:$0xff] %v6918_v63 }
  0x17   :  { %272 = vmatpush1.bf16.msra.mxu0 %v6685_v23  ;;  %315 = vmatpush1.bf16.msra.mxu1 %v6692_v24 }
  0x18   :  { %273 = vmatprep.subr.bf16.mxu0 %v6697_v25  ;;  %316 = vmatprep.subr.bf16.mxu1 %v6704_v26 }
  0x1b   :  { %274 = vmatpush1.bf16.msra.mxu0 %v6709_v27  ;;  %317 = vmatpush1.bf16.msra.mxu1 %v6714_v28 }
  0x1c   :  { %275 = vmatprep.subr.bf16.mxu0 %v6721_v29  ;;  %318 = vmatprep.subr.bf16.mxu1 %v6728_v30 }
  0x1f   :  { %276 = vmatpush1.bf16.msra.mxu0 %v6733_v31  ;;  %319 = vmatpush1.bf16.msra.mxu1 %v6738_v32 }
  0x20   :  { %513 = vmatprep.subr.bf16.mxu0 %v6745_v33  ;;  %556 = vmatprep.subr.bf16.mxu1 %v6752_v34 }
  0x22   :  { %294 = vmatmul.mubr.bf16.vlgmr.msra.gmra.mrb[0].mxu0 %v6516_v39  ;;  %337 = vmatmul.mubr.bf16.vlgmr.msra.gmra.mrb[0].mxu1 %v6516_v39  ;;  %v6927_v39 = vld [vmem:[%s8568_s1 + $0xe0] ss:$16 sps:$4 sm:$0xff]  }
  0x23   :  { %514 = vmatpush1.bf16.msra.mxu0 %v6757_v35  ;;  %557 = vmatpush1.bf16.msra.mxu1 %v6762_v36 }
  0x24   :  { %515 = vmatprep.subr.bf16.mxu0 %v6769_v37  ;;  %558 = vmatprep.subr.bf16.mxu1 %v6776_v38 }
  0x25   :  { %545 = vmatprep.mubr.bf16.mxu0 %v8574_v1  ;;  %588 = vmatprep.mubr.bf16.mxu1 %v8574_v1  ;;  %v6932_v1 = vld [vmem:[%s8568_s1 + $0xe8] ss:$16 sps:$4 sm:$0xff]  }
  0x27   :  { %516 = vmatpush1.bf16.msra.mxu0 %v6781_v40  ;;  %559 = vmatpush1.bf16.msra.mxu1 %v6786_v41 }
  0x28   :  { %517 = vmatprep.subr.bf16.mxu0 %v6793_v42  ;;  %560 = vmatprep.subr.bf16.mxu1 %v6800_v43 }
  0x2b   :  { %518 = vmatpush1.bf16.msra.mxu0 %v6807_v44  ;;  %561 = vmatpush1.bf16.msra.mxu1 %v6812_v45 }
  0x2c   :  { %519 = vmatprep.subr.bf16.mxu0 %v6819_v46  ;;  %562 = vmatprep.subr.bf16.mxu1 %v6826_v47 }
  0x2f   :  { %520 = vmatpush1.bf16.msra.mxu0 %v6831_v48  ;;  %563 = vmatpush1.bf16.msra.mxu1 %v6836_v49 }
  0x30   :  { %521 = vmatprep.subr.bf16.mxu0 %v6841_v50  ;;  %564 = vmatprep.subr.bf16.mxu1 %v6846_v51 }
  0x33   :  { %522 = vmatpush1.bf16.msra.mxu0 %v6855_v52  ;;  %565 = vmatpush1.bf16.msra.mxu1 %v6860_v53 }
  0x34   :  { %523 = vmatprep.subr.bf16.mxu0 %v6865_v54  ;;  %566 = vmatprep.subr.bf16.mxu1 %v6870_v55 }
  0x37   :  { %524 = vmatpush1.bf16.msra.mxu0 %v6879_v56  ;;  %567 = vmatpush1.bf16.msra.mxu1 %v6884_v57 }
  0x38   :  { %525 = vmatprep.subr.bf16.mxu0 %v6889_v58  ;;  %568 = vmatprep.subr.bf16.mxu1 %v6894_v59  ;;  %v5963_v59 = vld [vmem:[%s8569_s0] sm:$0xff]  }
  0x3b   :  { %526 = vmatpush1.bf16.msra.mxu0 %v6903_v60  ;;  %569 = vmatpush1.bf16.msra.mxu1 %v6908_v61 }
  0x3c   :  { %527 = vmatprep.subr.bf16.mxu0 %v6913_v62  ;;  %570 = vmatprep.subr.bf16.mxu1 %v6918_v63  ;;  %v8604_v63 = vmov 0  }
  0x3f   :  { %528 = vmatpush1.bf16.msra.mxu0 %v6927_v39  ;;  %571 = vmatpush1.bf16.msra.mxu1 %v6932_v1 }
  0x40   :  { %913 = vmatprep.subr.bf16.mxu0 %v6555_v0  ;;  %956 = vmatprep.subr.bf16.mxu1 %v6562_v2  ;;  %v600_v0 = vlaneseq }
  0x42   :  { %546 = vmatmul.mubr.bf16.vlgmr.msra.gmra.mrb[0].mxu0 %v5963_v59  ;;  %589 = vmatmul.mubr.bf16.vlgmr.msra.gmra.mrb[0].mxu1 %v5963_v59  ;;  %v601_v2 = vshrl.u32 %v600_v0, 7 }
  0x43   :  { %914 = vmatpush1.bf16.msra.mxu0 %v6568_v3  ;;  %957 = vmatpush1.bf16.msra.mxu1 %v6573_v4  ;;  %v29_v4 = vld [vmem:[%s8570_s3] sm:$0xf] }
  0x44   :  { %915 = vmatprep.subr.bf16.mxu0 %v6579_v5  ;;  %958 = vmatprep.subr.bf16.mxu1 %v6586_v6  ;;  %v602_v3 = vsub.s32 0, %v601_v2  ;;  %v606_v5 = vsub.s32 1, %v601_v2 }
  0x45   :  { %945 = vmatprep.mubr.bf16.mxu0 %v8604_v63  ;;  %988 = vmatprep.mubr.bf16.mxu1 %v8604_v63 }
  0x46   :  { %v6982_v6 = vrot.slane %v29_v4, %v602_v3 }
  0x47   :  { %916 = vmatpush1.bf16.msra.mxu0 %v6591_v7  ;;  %959 = vmatpush1.bf16.msra.mxu1 %v6597_v8  ;;  %v6984_v7 = vrot.slane %v29_v4, %v606_v5 }
  0x48   :  { %917 = vmatprep.subr.bf16.mxu0 %v6603_v9  ;;  %960 = vmatprep.subr.bf16.mxu1 %v6608_v10  ;;  %v614_v10 = vsub.s32 3, %v601_v2 }
  0x4b   :  { %918 = vmatpush1.bf16.msra.mxu0 %v6613_v11  ;;  %961 = vmatpush1.bf16.msra.mxu1 %v6618_v12 }
  0x4c   :  { %919 = vmatprep.subr.bf16.mxu0 %v6625_v13  ;;  %962 = vmatprep.subr.bf16.mxu1 %v6632_v14 }
  0x4f   :  { %920 = vmatpush1.bf16.msra.mxu0 %v6637_v15  ;;  %963 = vmatpush1.bf16.msra.mxu1 %v6644_v16 }
  0x50   :  { %921 = vmatprep.subr.bf16.mxu0 %v6649_v17  ;;  %964 = vmatprep.subr.bf16.mxu1 %v6656_v18  ;;  %v610_v18 = vsub.s32 2, %v601_v2 }
  0x53   :  { %922 = vmatpush1.bf16.msra.mxu0 %v6661_v19  ;;  %965 = vmatpush1.bf16.msra.mxu1 %v6666_v20 }
  0x54   :  { %923 = vmatprep.subr.bf16.mxu0 %v6673_v21  ;;  %966 = vmatprep.subr.bf16.mxu1 %v6680_v22 }
  0x57   :  { %924 = vmatpush1.bf16.msra.mxu0 %v6685_v23  ;;  %967 = vmatpush1.bf16.msra.mxu1 %v6692_v24  ;;  %v6989_v23 = vrot.slane %v29_v4, %v614_v10 }
  0x58   :  { %925 = vmatprep.subr.bf16.mxu0 %v6697_v25  ;;  %968 = vmatprep.subr.bf16.mxu1 %v6704_v26 }
  0x5b   :  { %926 = vmatpush1.bf16.msra.mxu0 %v6709_v27  ;;  %969 = vmatpush1.bf16.msra.mxu1 %v6714_v28  ;;  %v6992_v27 = vrot.slane %v29_v4, %v610_v18 }
  0x5c   :  { %927 = vmatprep.subr.bf16.mxu0 %v6721_v29  ;;  %970 = vmatprep.subr.bf16.mxu1 %v6728_v30 }
  0x5f   :  { %928 = vmatpush1.bf16.msra.mxu0 %v6733_v31  ;;  %971 = vmatpush1.bf16.msra.mxu1 %v6738_v32 }
  0x60   :  { %1165 = vmatprep.subr.bf16.mxu0 %v6745_v33  ;;  %1208 = vmatprep.subr.bf16.mxu1 %v6752_v34 }
 0x115   :  { %v547_v8 = vpop.f32.mrb[0].mxu0  ;;  %v590_v9 = vpop.f32.mrb[0].mxu1 }
 0x116   :  { %v620_v11 = vadd.f32 %v6982_v6, %v547_v8  ;;  %v549_v12 = vpop.f32.mrb[1].mxu0  ;;  %v592_v13 = vpop.f32.mrb[1].mxu1  ;;  %v622_v29 = vadd.f32 %v6992_v27, %v590_v9 }
 0x117   :  { %v621_v14 = vadd.f32 %v6984_v7, %v549_v12  ;;  %v551_v15 = vpop.f32.mrb[2].mxu0  ;;  %v594_v16 = vpop.f32.mrb[2].mxu1  ;;  %v623_v28 = vadd.f32 %v6989_v23, %v592_v13 }
 0x118   :  { %v5191_v17 = vmul.f32 -1.442695, %v620_v11  ;;  %v624_v19 = vadd.f32 %v6982_v6, %v551_v15  ;;  %v553_v20 = vpop.f32.mrb[3].mxu0  ;;  %v596_v21 = vpop.f32.mrb[3].mxu1  ;;  %v626_v32 = vadd.f32 %v6992_v27, %v594_v16 }
 0x119   :  { %v5193_v22 = vmul.f32 -1.442695, %v621_v14  ;;  %v625_v24 = vadd.f32 %v6984_v7, %v553_v20  ;;  %v5195_v30 = vmul.f32 -1.442695, %v623_v28  ;;  %v627_v31 = vadd.f32 %v6989_v23, %v596_v21 }
 0x11a   :  { %6259 = vpow2.f32 %v5191_v17  ;;  %v5192_v25 = vmul.f32 -1.442695, %v624_v19 }
 0x11b   :  { %6261 = vpow2.f32 %v5193_v22  ;;  %v5194_v26 = vmul.f32 -1.442695, %v625_v24  ;;  %v5196_v0 = vmul.f32 -1.442695, %v627_v31 }
 0x11c   :  { %6263 = vpow2.f32 %v5192_v25 }
 0x11d   :  { %6265 = vpow2.f32 %v5194_v26 }
 0x11e   :  { %6267 = vtanh.f32 %v622_v29 }
 0x11f   :  { %6269 = vpow2.f32 %v5195_v30 }
 0x120   :  { %6271 = vtanh.f32 %v626_v32 }
 0x124   :  { %v6260_v33 = vpop.eup %6259 }
 0x125   :  { %v6262_v34 = vpop.eup %6261  ;;  %v634_v59 = vadd.f32 1.0, %v6260_v33 }
 0x126   :  { %v646_v2 = vadd.f32 1.0, %v6262_v34  ;;  %v6264_v3 = vpop.eup %6263  ;;  %v7193_v34 = vld [vmem:[%s8567_s2 + $0xcc] ss:$16 sps:$4 sm:$0xff]  }
 0x127   :  { %6273 = vrcp.f32 %v634_v59  ;;  %v635_v4 = vadd.f32 1.0, %v6264_v3  ;;  %v6266_v5 = vpop.eup %6265  ;;  %v7201_v59 = vld [vmem:[%s8567_s2 + $0xc0] ss:$16 sps:$4 sm:$0xff]   ;;  %v7218_v3 = vld [vmem:[%s8567_s2 + $0xec] ss:$16 sps:$4 sm:$0xff]  }
 0x128   :  { %6275 = vrcp.f32 %v646_v2  ;;  %v647_v8 = vadd.f32 1.0, %v6266_v5  ;;  %v6268_v9 = vpop.eup %6267  ;;  %v7213_v2 = vld [vmem:[%s8567_s2 + $0xe4] ss:$16 sps:$4 sm:$0xff]   ;;  %v7230_v5 = vld [vmem:[%s8567_s2 + $0xe8] ss:$16 sps:$4 sm:$0xff]  }
 0x129   :  { %6277 = vpow2.f32 %v5196_v0  ;;  %v6270_v10 = vpop.eup %6269  ;;  %v7206_v0 = vld [vmem:[%s8567_s2 + $0xc8] ss:$16 sps:$4 sm:$0xff]  }
 0x12a   :  { %6279 = vrcp.f32 %v635_v4  ;;  %v6272_v11 = vpop.eup %6271  ;;  %v660_v18 = vadd.f32 1.0, %v6270_v10  ;;  %v7225_v4 = vld [vmem:[%s8567_s2 + $0xe0] ss:$16 sps:$4 sm:$0xff]  }
 0x12b   :  { %6281 = vrcp.f32 %v647_v8  ;;  %v7237_v8 = vld [vmem:[%s8568_s1 + $0x4] ss:$16 sps:$4 sm:$0xff]  }
 0x12c   :  { %6283 = vrcp.f32 %v660_v18 }
 0x131   :  { %v6274_v12 = vpop.eup %6273 }
 0x132   :  { %v6276_v13 = vpop.eup %6275  ;;  %v668_v14 = vmul.f32 %v6274_v12, %v6268_v9  ;;  %v7242_v9 = vld [vmem:[%s8568_s1 + $0xc] ss:$16 sps:$4 sm:$0xff]  }
 0x133   :  { %v6278_v15 = vpop.eup %6277  ;;  %v666_v16 = vmul.f32 0.0, %v6276_v13 }
 0x134   :  { %v6280_v17 = vpop.eup %6279  ;;  %v661_v22 = vadd.f32 1.0, %v6278_v15 }
 0x135   :  { %v6998_v19 = vadd.f32 %v668_v14, %v666_v16  ;;  %v669_v20 = vmul.f32 %v6280_v17, %v6272_v11  ;;  %v6282_v21 = vpop.eup %6281 }
 0x136   :  { %v667_v24 = vmul.f32 0.0, %v6282_v21  ;;  %v6284_v26 = vpop.eup %6283 }
 0x137   :  { %6285 = vtanh.f32 %v6998_v19 }
 0x138   :  { %v7001_v25 = vadd.f32 %v669_v20, %v667_v24  ;;  %6287 = vrcp.f32 %v661_v22 }
 0x13a   :  { %6289 = vtanh.f32 %v7001_v25 }
 0x141   :  { %v6286_v28 = vpop.eup %6285 }
 0x142   :  { %v6288_v29 = vpop.eup %6287  ;;  %v674_v31 = vmul.f32 %v6286_v28, %v6284_v26 }
 0x144   :  { %v6290_v30 = vpop.eup %6289 }
 0x145   :  { %v675_v32 = vmul.f32 %v6290_v30, %v6288_v29 }
 0x147   :  { %v676_v33 = vpack.c.bf16 %v675_v32, %v674_v31 }
 0x149   :  { %5758 = vst [vmem:[%s8571_s4] sm:$0xff] %v676_v33   ;;  %946 = vmatmul.mubr.bf16.vlgmr.msra.gmra.mrb[4].mxu0 %v676_v33  ;;  %989 = vmatmul.mubr.bf16.vlgmr.msra.gmra.mrb[4].mxu1 %v676_v33 }
 0x14a   :  { %1166 = vmatpush1.bf16.msra.mxu0 %v6757_v35  ;;  %1209 = vmatpush1.bf16.msra.mxu1 %v6762_v36  ;;  %v8605_v35 = vld [vmem:[#allocation2_spill] sm:$0xff]  ;;  %v8606_v36 = vld [vmem:[#allocation3_spill] sm:$0xff] }
 0x14b   :  { %1167 = vmatprep.subr.bf16.mxu0 %v6769_v37  ;;  %1210 = vmatprep.subr.bf16.mxu1 %v6776_v38  ;;  %v5964_v37 = vld [vmem:[%s8569_s0 + $0x8] sm:$0xff]   ;;  %v7047_v38 = vld [vmem:[%s8567_s2 + $0x4] ss:$16 sps:$4 sm:$0xff]  }
 0x14c   :  { %1197 = vmatprep.mubr.bf16.mxu0 %v8604_v63  ;;  %1240 = vmatprep.mubr.bf16.mxu1 %v8604_v63 }
 0x14e   :  { %1168 = vmatpush1.bf16.msra.mxu0 %v6781_v40  ;;  %1211 = vmatpush1.bf16.msra.mxu1 %v6786_v41  ;;  %v7052_v40 = vld [vmem:[%s8567_s2 + $0xc] ss:$16 sps:$4 sm:$0xff]   ;;  %v7062_v41 = vld [vmem:[%s8567_s2 + $0x8] ss:$16 sps:$4 sm:$0xff]  }
 0x14f   :  { %1169 = vmatprep.subr.bf16.mxu0 %v6793_v42  ;;  %1212 = vmatprep.subr.bf16.mxu1 %v6800_v43  ;;  %v7071_v42 = vld [vmem:[%s8567_s2 + $0x24] ss:$16 sps:$4 sm:$0xff]   ;;  %v7076_v43 = vld [vmem:[%s8567_s2 + $0x2c] ss:$16 sps:$4 sm:$0xff]  }
 0x152   :  { %1170 = vmatpush1.bf16.msra.mxu0 %v6807_v44  ;;  %1213 = vmatpush1.bf16.msra.mxu1 %v6812_v45  ;;  %v7081_v44 = vld [vmem:[%s8567_s2 + $0x20] ss:$16 sps:$4 sm:$0xff]   ;;  %v7086_v45 = vld [vmem:[%s8567_s2 + $0x28] ss:$16 sps:$4 sm:$0xff]  }
 0x153   :  { %1171 = vmatprep.subr.bf16.mxu0 %v6819_v46  ;;  %1214 = vmatprep.subr.bf16.mxu1 %v6826_v47  ;;  %v7095_v46 = vld [vmem:[%s8567_s2 + $0x44] ss:$16 sps:$4 sm:$0xff]   ;;  %v7100_v47 = vld [vmem:[%s8567_s2 + $0x4c] ss:$16 sps:$4 sm:$0xff]  }
 0x156   :  { %1172 = vmatpush1.bf16.msra.mxu0 %v6831_v48  ;;  %1215 = vmatpush1.bf16.msra.mxu1 %v6836_v49  ;;  %v7105_v48 = vld [vmem:[%s8567_s2 + $0x40] ss:$16 sps:$4 sm:$0xff]   ;;  %v7110_v49 = vld [vmem:[%s8567_s2 + $0x48] ss:$16 sps:$4 sm:$0xff]  }
 0x157   :  { %1173 = vmatprep.subr.bf16.mxu0 %v6841_v50  ;;  %1216 = vmatprep.subr.bf16.mxu1 %v6846_v51  ;;  %v7119_v50 = vld [vmem:[%s8567_s2 + $0x64] ss:$16 sps:$4 sm:$0xff]   ;;  %v7124_v51 = vld [vmem:[%s8567_s2 + $0x6c] ss:$16 sps:$4 sm:$0xff]  }
 0x15a   :  { %1174 = vmatpush1.bf16.msra.mxu0 %v6855_v52  ;;  %1217 = vmatpush1.bf16.msra.mxu1 %v6860_v53  ;;  %v7129_v52 = vld [vmem:[%s8567_s2 + $0x60] ss:$16 sps:$4 sm:$0xff]   ;;  %v7134_v53 = vld [vmem:[%s8567_s2 + $0x68] ss:$16 sps:$4 sm:$0xff]  }
 0x15b   :  { %1175 = vmatprep.subr.bf16.mxu0 %v6865_v54  ;;  %1218 = vmatprep.subr.bf16.mxu1 %v6870_v55  ;;  %v7143_v54 = vld [vmem:[%s8567_s2 + $0x84] ss:$16 sps:$4 sm:$0xff]   ;;  %v7148_v55 = vld [vmem:[%s8567_s2 + $0x8c] ss:$16 sps:$4 sm:$0xff]  }
 0x15e   :  { %1176 = vmatpush1.bf16.msra.mxu0 %v6879_v56  ;;  %1219 = vmatpush1.bf16.msra.mxu1 %v6884_v57  ;;  %v7153_v56 = vld [vmem:[%s8567_s2 + $0x80] ss:$16 sps:$4 sm:$0xff]   ;;  %v7158_v57 = vld [vmem:[%s8567_s2 + $0x88] ss:$16 sps:$4 sm:$0xff]  }
 0x15f   :  { %1177 = vmatprep.subr.bf16.mxu0 %v6889_v58  ;;  %1220 = vmatprep.subr.bf16.mxu1 %v8605_v35  ;;  %v7165_v58 = vld [vmem:[%s8567_s2 + $0xa4] ss:$16 sps:$4 sm:$0xff]  }
 0x162   :  { %1178 = vmatpush1.bf16.msra.mxu0 %v6903_v60  ;;  %1221 = vmatpush1.bf16.msra.mxu1 %v6908_v61  ;;  %v7172_v60 = vld [vmem:[%s8567_s2 + $0xa0] ss:$16 sps:$4 sm:$0xff]   ;;  %v7177_v61 = vld [vmem:[%s8567_s2 + $0xa8] ss:$16 sps:$4 sm:$0xff]  }
 0x163   :  { %1179 = vmatprep.subr.bf16.mxu0 %v6913_v62  ;;  %1222 = vmatprep.subr.bf16.mxu1 %v8606_v36  ;;  %v7182_v62 = vld [vmem:[%s8567_s2 + $0xac] ss:$16 sps:$4 sm:$0xff]  }
 0x166   :  { %1180 = vmatpush1.bf16.msra.mxu0 %v6927_v39  ;;  %1223 = vmatpush1.bf16.msra.mxu1 %v6932_v1  ;;  %v7057_v1 = vld [vmem:[%s8567_s2] ss:$16 sps:$4 sm:$0xff]   ;;  %v7188_v39 = vld [vmem:[%s8567_s2 + $0xc4] ss:$16 sps:$4 sm:$0xff]  }
 0x167   :  { %1545 = vmatprep.subr.bf16.mxu0 %v7047_v38  ;;  %1588 = vmatprep.subr.bf16.mxu1 %v7052_v40 }
 0x169   :  { %1198 = vmatmul.mubr.bf16.vlgmr.msra.gmra.mrb[4].mxu0 %v5964_v37  ;;  %1241 = vmatmul.mubr.bf16.vlgmr.msra.gmra.mrb[4].mxu1 %v5964_v37 }
 0x16a   :  { %1577 = vmatprep.mubr.bf16.mxu0 %v8604_v63  ;;  %1620 = vmatprep.mubr.bf16.mxu1 %v8604_v63 }
 0x16b   :  { %1546 = vmatpush1.bf16.msra.mxu0 %v7057_v1  ;;  %1589 = vmatpush1.bf16.msra.mxu1 %v7062_v41 }
 0x16c   :  { %1547 = vmatprep.subr.bf16.mxu0 %v7071_v42  ;;  %1590 = vmatprep.subr.bf16.mxu1 %v7076_v43 }
 0x16f   :  { %1548 = vmatpush1.bf16.msra.mxu0 %v7081_v44  ;;  %1591 = vmatpush1.bf16.msra.mxu1 %v7086_v45 }
 0x170   :  { %1549 = vmatprep.subr.bf16.mxu0 %v7095_v46  ;;  %1592 = vmatprep.subr.bf16.mxu1 %v7100_v47 }
 0x173   :  { %1550 = vmatpush1.bf16.msra.mxu0 %v7105_v48  ;;  %1593 = vmatpush1.bf16.msra.mxu1 %v7110_v49 }
 0x174   :  { %1551 = vmatprep.subr.bf16.mxu0 %v7119_v50  ;;  %1594 = vmatprep.subr.bf16.mxu1 %v7124_v51 }
 0x177   :  { %1552 = vmatpush1.bf16.msra.mxu0 %v7129_v52  ;;  %1595 = vmatpush1.bf16.msra.mxu1 %v7134_v53 }
 0x178   :  { %1553 = vmatprep.subr.bf16.mxu0 %v7143_v54  ;;  %1596 = vmatprep.subr.bf16.mxu1 %v7148_v55 }
 0x17b   :  { %1554 = vmatpush1.bf16.msra.mxu0 %v7153_v56  ;;  %1597 = vmatpush1.bf16.msra.mxu1 %v7158_v57 }
 0x17c   :  { %1555 = vmatprep.subr.bf16.mxu0 %v7165_v58  ;;  %1598 = vmatprep.subr.bf16.mxu1 %v7182_v62 }
 0x17f   :  { %1556 = vmatpush1.bf16.msra.mxu0 %v7172_v60  ;;  %1599 = vmatpush1.bf16.msra.mxu1 %v7177_v61 }
 0x180   :  { %1557 = vmatprep.subr.bf16.mxu0 %v7188_v39  ;;  %1600 = vmatprep.subr.bf16.mxu1 %v7193_v34 }
 0x183   :  { %1558 = vmatpush1.bf16.msra.mxu0 %v7201_v59  ;;  %1601 = vmatpush1.bf16.msra.mxu1 %v7206_v0 }
 0x184   :  { %1559 = vmatprep.subr.bf16.mxu0 %v7213_v2  ;;  %1602 = vmatprep.subr.bf16.mxu1 %v7218_v3 }
 0x187   :  { %1560 = vmatpush1.bf16.msra.mxu0 %v7225_v4  ;;  %1603 = vmatpush1.bf16.msra.mxu1 %v7230_v5 }
 0x188   :  { %1797 = vmatprep.subr.bf16.mxu0 %v7237_v8  ;;  %1840 = vmatprep.subr.bf16.mxu1 %v7242_v9 }
 0x23c   :  { %v1199_v10 = vpop.f32.mrb[4].mxu0  ;;  %v1242_v11 = vpop.f32.mrb[4].mxu1 }
 0x23d   :  { %v1251_v12 = vadd.f32 %v1199_v10, %v6982_v6  ;;  %v1201_v13 = vpop.f32.mrb[5].mxu0  ;;  %v1244_v14 = vpop.f32.mrb[5].mxu1  ;;  %v1253_v31 = vadd.f32 %v1242_v11, %v6992_v27 }
 0x23e   :  { %v1252_v15 = vadd.f32 %v1201_v13, %v6984_v7  ;;  %v1203_v16 = vpop.f32.mrb[6].mxu0  ;;  %v1246_v17 = vpop.f32.mrb[6].mxu1  ;;  %v1254_v30 = vadd.f32 %v1244_v14, %v6989_v23 }
 0x23f   :  { %v5266_v18 = vmul.f32 -1.442695, %v1251_v12  ;;  %v1255_v20 = vadd.f32 %v1203_v16, %v6982_v6  ;;  %v1205_v21 = vpop.f32.mrb[7].mxu0  ;;  %v1248_v22 = vpop.f32.mrb[7].mxu1  ;;  %v1257_v35 = vadd.f32 %v1246_v17, %v6992_v27 }
 0x240   :  { %v5268_v24 = vmul.f32 -1.442695, %v1252_v15  ;;  %v1256_v26 = vadd.f32 %v1205_v21, %v6984_v7  ;;  %v5270_v32 = vmul.f32 -1.442695, %v1254_v30  ;;  %v1258_v33 = vadd.f32 %v1248_v22, %v6989_v23 }
 0x241   :  { %6291 = vpow2.f32 %v5266_v18  ;;  %v5267_v28 = vmul.f32 -1.442695, %v1255_v20 }
 0x242   :  { %6293 = vpow2.f32 %v5268_v24  ;;  %v5269_v29 = vmul.f32 -1.442695, %v1256_v26  ;;  %v5271_v12 = vmul.f32 -1.442695, %v1258_v33 }
 0x243   :  { %6295 = vpow2.f32 %v5267_v28 }
 0x244   :  { %6297 = vpow2.f32 %v5269_v29 }
 0x245   :  { %6299 = vtanh.f32 %v1253_v31 }
 0x246   :  { %6301 = vpow2.f32 %v5270_v32 }
 0x247   :  { %6303 = vtanh.f32 %v1257_v35 }
 0x24b   :  { %v6292_v36 = vpop.eup %6291 }
 0x24c   :  { %v6294_v37 = vpop.eup %6293  ;;  %v1265_v10 = vadd.f32 1.0, %v6292_v36 }
 0x24d   :  { %v1277_v13 = vadd.f32 1.0, %v6294_v37  ;;  %v6296_v15 = vpop.eup %6295 }
 0x24e   :  { %6305 = vrcp.f32 %v1265_v10  ;;  %v1266_v14 = vadd.f32 1.0, %v6296_v15  ;;  %v6298_v16 = vpop.eup %6297 }
 0x24f   :  { %6307 = vrcp.f32 %v1277_v13  ;;  %v1278_v11 = vadd.f32 1.0, %v6298_v16  ;;  %v6300_v18 = vpop.eup %6299  ;;  %v7267_v16 = vld [vmem:[%s8568_s1] ss:$16 sps:$4 sm:$0xff]  }
 0x250   :  { %6309 = vpow2.f32 %v5271_v12  ;;  %v6302_v20 = vpop.eup %6301 }
 0x251   :  { %6311 = vrcp.f32 %v1266_v14  ;;  %v6304_v17 = vpop.eup %6303  ;;  %v1291_v30 = vadd.f32 1.0, %v6302_v20  ;;  %v7282_v20 = vld [vmem:[%s8568_s1 + $0x2c] ss:$16 sps:$4 sm:$0xff]  }
 0x252   :  { %6313 = vrcp.f32 %v1278_v11 }
 0x253   :  { %6315 = vrcp.f32 %v1291_v30  ;;  %v7335_v30 = vld [vmem:[%s8568_s1 + $0x6c] ss:$16 sps:$4 sm:$0xff]  }
 0x258   :  { %v6306_v21 = vpop.eup %6305 }
 0x259   :  { %v6308_v22 = vpop.eup %6307  ;;  %v1299_v24 = vmul.f32 %v6306_v21, %v6300_v18  ;;  %v7277_v18 = vld [vmem:[%s8568_s1 + $0x24] ss:$16 sps:$4 sm:$0xff]   ;;  %v7297_v21 = vld [vmem:[%s8568_s1 + $0x28] ss:$16 sps:$4 sm:$0xff]  }
 0x25a   :  { %v6310_v26 = vpop.eup %6309  ;;  %v1297_v28 = vmul.f32 %v6308_v22, %v6998_v19  ;;  %v7304_v22 = vld [vmem:[%s8568_s1 + $0x44] ss:$16 sps:$4 sm:$0xff]  }
 0x25b   :  { %v6312_v29 = vpop.eup %6311  ;;  %v1292_v35 = vadd.f32 1.0, %v6310_v26  ;;  %v7318_v26 = vld [vmem:[%s8568_s1 + $0x40] ss:$16 sps:$4 sm:$0xff]  }
 0x25c   :  { %v7257_v31 = vadd.f32 %v1299_v24, %v1297_v28  ;;  %v1300_v32 = vmul.f32 %v6312_v29, %v6304_v17  ;;  %v6314_v33 = vpop.eup %6313  ;;  %v7292_v17 = vld [vmem:[%s8568_s1 + $0x20] ss:$16 sps:$4 sm:$0xff]   ;;  %v7309_v24 = vld [vmem:[%s8568_s1 + $0x4c] ss:$16 sps:$4 sm:$0xff]   ;;  %v7323_v28 = vld [vmem:[%s8568_s1 + $0x48] ss:$16 sps:$4 sm:$0xff]  }
 0x25d   :  { %v1298_v36 = vmul.f32 %v6314_v33, %v7001_v25  ;;  %v6316_v10 = vpop.eup %6315  ;;  %v7272_v25 = vld [vmem:[%s8568_s1 + $0x8] ss:$16 sps:$4 sm:$0xff]   ;;  %v7330_v29 = vld [vmem:[%s8568_s1 + $0x64] ss:$16 sps:$4 sm:$0xff]  }
 0x25e   :  { %6317 = vtanh.f32 %v7257_v31  ;;  %v7347_v33 = vld [vmem:[%s8568_s1 + $0x68] ss:$16 sps:$4 sm:$0xff]  }
 0x25f   :  { %v7261_v37 = vadd.f32 %v1300_v32, %v1298_v36  ;;  %6319 = vrcp.f32 %v1292_v35  ;;  %v7342_v32 = vld [vmem:[%s8568_s1 + $0x60] ss:$16 sps:$4 sm:$0xff]   ;;  %v7354_v35 = vld [vmem:[%s8568_s1 + $0x84] ss:$16 sps:$4 sm:$0xff]   ;;  %v7359_v36 = vld [vmem:[%s8568_s1 + $0x8c] ss:$16 sps:$4 sm:$0xff]  }
 0x261   :  { %6321 = vtanh.f32 %v7261_v37 }
 0x268   :  { %v6318_v12 = vpop.eup %6317 }
 0x269   :  { %v6320_v19 = vpop.eup %6319  ;;  %v1305_v15 = vmul.f32 %v6318_v12, %v6316_v10  ;;  %v7366_v10 = vld [vmem:[%s8568_s1 + $0x80] ss:$16 sps:$4 sm:$0xff]   ;;  %v7371_v12 = vld [vmem:[%s8568_s1 + $0x88] ss:$16 sps:$4 sm:$0xff]  }
 0x26a   :  { %8607 = vst [vmem:[#allocation2_spill] sm:$0xff] %v7371_v12 }
 0x26b   :  { %v6322_v13 = vpop.eup %6321 }
 0x26c   :  { %v1306_v14 = vmul.f32 %v6322_v13, %v6320_v19  ;;  %v7378_v19 = vld [vmem:[%s8568_s1 + $0xa4] ss:$16 sps:$4 sm:$0xff]   ;;  %v7383_v13 = vld [vmem:[%s8568_s1 + $0xac] ss:$16 sps:$4 sm:$0xff]  }
 0x26d   :  { %8608 = vst [vmem:[#allocation3_spill] sm:$0xff] %v7378_v19  ;;  %8609 = vst [vmem:[#allocation4_spill] sm:$0xff] %v7383_v13 }
 0x26e   :  { %v1307_v11 = vpack.c.bf16 %v1306_v14, %v1305_v15  ;;  %v7390_v15 = vld [vmem:[%s8568_s1 + $0xa0] ss:$16 sps:$4 sm:$0xff]   ;;  %v7395_v14 = vld [vmem:[%s8568_s1 + $0xa8] ss:$16 sps:$4 sm:$0xff]  }
 0x26f   :  { %8610 = vst [vmem:[#allocation5_spill] sm:$0xff] %v7390_v15  ;;  %8611 = vst [vmem:[#allocation6_spill] sm:$0xff] %v7395_v14 }
 0x270   :  { %5794 = vst [vmem:[%s8571_s4 + $0x8] sm:$0xff] %v1307_v11   ;;  %1578 = vmatmul.mubr.bf16.vlgmr.msra.gmra.mrb[8].mxu0 %v1307_v11  ;;  %1621 = vmatmul.mubr.bf16.vlgmr.msra.gmra.mrb[8].mxu1 %v1307_v11  ;;  %v7402_v11 = vld [vmem:[%s8568_s1 + $0xc4] ss:$16 sps:$4 sm:$0xff]  }
 0x271   :  { %1798 = vmatpush1.bf16.msra.mxu0 %v7267_v16  ;;  %1841 = vmatpush1.bf16.msra.mxu1 %v7272_v25  ;;  %8612 = vst [vmem:[#allocation7_spill] sm:$0xff] %v7402_v11 }
 0x272   :  { %1799 = vmatprep.subr.bf16.mxu0 %v7277_v18  ;;  %1842 = vmatprep.subr.bf16.mxu1 %v7282_v20 }
 0x273   :  { %1829 = vmatprep.mubr.bf16.mxu0 %v8604_v63  ;;  %1872 = vmatprep.mubr.bf16.mxu1 %v8604_v63 }
 0x275   :  { %1800 = vmatpush1.bf16.msra.mxu0 %v7292_v17  ;;  %1843 = vmatpush1.bf16.msra.mxu1 %v7297_v21 }
 0x276   :  { %1801 = vmatprep.subr.bf16.mxu0 %v7304_v22  ;;  %1844 = vmatprep.subr.bf16.mxu1 %v7309_v24 }
 0x279   :  { %1802 = vmatpush1.bf16.msra.mxu0 %v7318_v26  ;;  %1845 = vmatpush1.bf16.msra.mxu1 %v7323_v28 }
 0x27a   :  { %1803 = vmatprep.subr.bf16.mxu0 %v7330_v29  ;;  %1846 = vmatprep.subr.bf16.mxu1 %v7335_v30 }
 0x27d   :  { %1804 = vmatpush1.bf16.msra.mxu0 %v7342_v32  ;;  %1847 = vmatpush1.bf16.msra.mxu1 %v7347_v33 }
 0x27e   :  { %1805 = vmatprep.subr.bf16.mxu0 %v7354_v35  ;;  %1848 = vmatprep.subr.bf16.mxu1 %v7359_v36 }
 0x281   :  { %1806 = vmatpush1.bf16.msra.mxu0 %v7366_v10  ;;  %1849 = vmatpush1.bf16.msra.mxu1 %v7371_v12  ;;  %v7407_v12 = vld [vmem:[%s8568_s1 + $0xcc] ss:$16 sps:$4 sm:$0xff]  }
 0x282   :  { %1807 = vmatprep.subr.bf16.mxu0 %v7378_v19  ;;  %1850 = vmatprep.subr.bf16.mxu1 %v7383_v13  ;;  %8613 = vst [vmem:[#allocation8_spill] sm:$0xff] %v7407_v12  ;;  %v7414_v19 = vld [vmem:[%s8568_s1 + $0xc0] ss:$16 sps:$4 sm:$0xff]   ;;  %v7419_v13 = vld [vmem:[%s8568_s1 + $0xc8] ss:$16 sps:$4 sm:$0xff]  }
 0x283   :  { %8614 = vst [vmem:[#allocation9_spill] sm:$0xff] %v7414_v19 }
 0x285   :  { %1808 = vmatpush1.bf16.msra.mxu0 %v7390_v15  ;;  %1851 = vmatpush1.bf16.msra.mxu1 %v7395_v14  ;;  %v7426_v15 = vld [vmem:[%s8568_s1 + $0xe4] ss:$16 sps:$4 sm:$0xff]   ;;  %v7431_v14 = vld [vmem:[%s8568_s1 + $0xec] ss:$16 sps:$4 sm:$0xff]  }
 0x286   :  { %1809 = vmatprep.subr.bf16.mxu0 %v7402_v11  ;;  %1852 = vmatprep.subr.bf16.mxu1 %v7407_v12  ;;  %v7438_v11 = vld [vmem:[%s8568_s1 + $0xe0] ss:$16 sps:$4 sm:$0xff]   ;;  %v7443_v12 = vld [vmem:[%s8568_s1 + $0xe8] ss:$16 sps:$4 sm:$0xff]  }
 0x289   :  { %1810 = vmatpush1.bf16.msra.mxu0 %v7414_v19  ;;  %1853 = vmatpush1.bf16.msra.mxu1 %v7419_v13  ;;  %v6061_v19 = vld [vmem:[%s8569_s0 + $0x10] sm:$0xff]  }
 0x28a   :  { %1811 = vmatprep.subr.bf16.mxu0 %v7426_v15  ;;  %1854 = vmatprep.subr.bf16.mxu1 %v7431_v14 }
 0x28d   :  { %1812 = vmatpush1.bf16.msra.mxu0 %v7438_v11  ;;  %1855 = vmatpush1.bf16.msra.mxu1 %v7443_v12 }
 0x28e   :  { %2177 = vmatprep.subr.bf16.mxu0 %v7047_v38  ;;  %2220 = vmatprep.subr.bf16.mxu1 %v7052_v40 }
 0x290   :  { %1830 = vmatmul.mubr.bf16.vlgmr.msra.gmra.mrb[8].mxu0 %v6061_v19  ;;  %1873 = vmatmul.mubr.bf16.vlgmr.msra.gmra.mrb[8].mxu1 %v6061_v19 }
 0x291   :  { %2178 = vmatpush1.bf16.msra.mxu0 %v7057_v1  ;;  %2221 = vmatpush1.bf16.msra.mxu1 %v7062_v41 }
 0x292   :  { %2179 = vmatprep.subr.bf16.mxu0 %v7071_v42  ;;  %2222 = vmatprep.subr.bf16.mxu1 %v7076_v43 }
 0x293   :  { %2209 = vmatprep.mubr.bf16.mxu0 %v8604_v63  ;;  %2252 = vmatprep.mubr.bf16.mxu1 %v8604_v63 }
 0x295   :  { %2180 = vmatpush1.bf16.msra.mxu0 %v7081_v44  ;;  %2223 = vmatpush1.bf16.msra.mxu1 %v7086_v45 }
 0x296   :  { %2181 = vmatprep.subr.bf16.mxu0 %v7095_v46  ;;  %2224 = vmatprep.subr.bf16.mxu1 %v7100_v47 }
 0x299   :  { %2182 = vmatpush1.bf16.msra.mxu0 %v7105_v48  ;;  %2225 = vmatpush1.bf16.msra.mxu1 %v7110_v49 }
 0x29a   :  { %2183 = vmatprep.subr.bf16.mxu0 %v7119_v50  ;;  %2226 = vmatprep.subr.bf16.mxu1 %v7124_v51 }
 0x29d   :  { %2184 = vmatpush1.bf16.msra.mxu0 %v7129_v52  ;;  %2227 = vmatpush1.bf16.msra.mxu1 %v7134_v53 }
 0x29e   :  { %2185 = vmatprep.subr.bf16.mxu0 %v7143_v54  ;;  %2228 = vmatprep.subr.bf16.mxu1 %v7148_v55 }
 0x2a1   :  { %2186 = vmatpush1.bf16.msra.mxu0 %v7153_v56  ;;  %2229 = vmatpush1.bf16.msra.mxu1 %v7158_v57 }
 0x2a2   :  { %2187 = vmatprep.subr.bf16.mxu0 %v7165_v58  ;;  %2230 = vmatprep.subr.bf16.mxu1 %v7182_v62 }
 0x2a5   :  { %2188 = vmatpush1.bf16.msra.mxu0 %v7172_v60  ;;  %2231 = vmatpush1.bf16.msra.mxu1 %v7177_v61 }
 0x2a6   :  { %2189 = vmatprep.subr.bf16.mxu0 %v7188_v39  ;;  %2232 = vmatprep.subr.bf16.mxu1 %v7193_v34 }
 0x2a9   :  { %2190 = vmatpush1.bf16.msra.mxu0 %v7201_v59  ;;  %2233 = vmatpush1.bf16.msra.mxu1 %v7206_v0 }
 0x2aa   :  { %2191 = vmatprep.subr.bf16.mxu0 %v7213_v2  ;;  %2234 = vmatprep.subr.bf16.mxu1 %v7218_v3 }
 0x2ad   :  { %2192 = vmatpush1.bf16.msra.mxu0 %v7225_v4  ;;  %2235 = vmatpush1.bf16.msra.mxu1 %v7230_v5 }
 0x2ae   :  { %2429 = vmatprep.subr.bf16.mxu0 %v7237_v8  ;;  %2472 = vmatprep.subr.bf16.mxu1 %v7242_v9 }
 0x363   :  { %v1831_v38 = vpop.f32.mrb[8].mxu0  ;;  %v1874_v40 = vpop.f32.mrb[8].mxu1 }
 0x364   :  { %v1883_v1 = vadd.f32 %v1831_v38, %v6982_v6  ;;  %v1833_v41 = vpop.f32.mrb[9].mxu0  ;;  %v1876_v42 = vpop.f32.mrb[9].mxu1  ;;  %v1885_v55 = vadd.f32 %v1874_v40, %v6992_v27 }
 0x365   :  { %v1884_v43 = vadd.f32 %v1833_v41, %v6984_v7  ;;  %v1835_v44 = vpop.f32.mrb[10].mxu0  ;;  %v1878_v45 = vpop.f32.mrb[10].mxu1  ;;  %v1886_v54 = vadd.f32 %v1876_v42, %v6989_v23 }
 0x366   :  { %v5343_v46 = vmul.f32 -1.442695, %v1883_v1  ;;  %v1887_v47 = vadd.f32 %v1835_v44, %v6982_v6  ;;  %v1837_v48 = vpop.f32.mrb[11].mxu0  ;;  %v1880_v49 = vpop.f32.mrb[11].mxu1  ;;  %v1889_v58 = vadd.f32 %v1878_v45, %v6992_v27 }
 0x367   :  { %v5345_v50 = vmul.f32 -1.442695, %v1884_v43  ;;  %v1888_v51 = vadd.f32 %v1837_v48, %v6984_v7  ;;  %v5347_v56 = vmul.f32 -1.442695, %v1886_v54  ;;  %v1890_v57 = vadd.f32 %v1880_v49, %v6989_v23 }
 0x368   :  { %6323 = vpow2.f32 %v5343_v46  ;;  %v5344_v52 = vmul.f32 -1.442695, %v1887_v47 }
 0x369   :  { %6325 = vpow2.f32 %v5345_v50  ;;  %v5346_v53 = vmul.f32 -1.442695, %v1888_v51  ;;  %v5348_v39 = vmul.f32 -1.442695, %v1890_v57  ;;  %v7643_v57 = vld [vmem:[%s8567_s2 + $0x84] ss:$16 sps:$4 sm:$0xff]  }
 0x36a   :  { %6327 = vpow2.f32 %v5344_v52 }
 0x36b   :  { %6329 = vpow2.f32 %v5346_v53 }
 0x36c   :  { %6331 = vtanh.f32 %v1885_v55  ;;  %v7629_v55 = vld [vmem:[%s8567_s2 + $0x60] ss:$16 sps:$4 sm:$0xff]  }
 0x36d   :  { %6333 = vpow2.f32 %v5347_v56  ;;  %v7634_v56 = vld [vmem:[%s8567_s2 + $0x68] ss:$16 sps:$4 sm:$0xff]  }
 0x36e   :  { %6335 = vtanh.f32 %v1889_v58  ;;  %v7648_v58 = vld [vmem:[%s8567_s2 + $0x8c] ss:$16 sps:$4 sm:$0xff]  }
 0x372   :  { %v6324_v60 = vpop.eup %6323 }
 0x373   :  { %v6326_v61 = vpop.eup %6325  ;;  %v1897_v62 = vadd.f32 1.0, %v6324_v60  ;;  %v7653_v60 = vld [vmem:[%s8567_s2 + $0x80] ss:$16 sps:$4 sm:$0xff]  }
 0x374   :  { %v1909_v34 = vadd.f32 1.0, %v6326_v61  ;;  %v6328_v59 = vpop.eup %6327  ;;  %v7658_v61 = vld [vmem:[%s8567_s2 + $0x88] ss:$16 sps:$4 sm:$0xff]  }
 0x375   :  { %6337 = vrcp.f32 %v1897_v62  ;;  %v1898_v0 = vadd.f32 1.0, %v6328_v59  ;;  %v6330_v2 = vpop.eup %6329  ;;  %v7665_v62 = vld [vmem:[%s8567_s2 + $0xa4] ss:$16 sps:$4 sm:$0xff]   ;;  %v7682_v59 = vld [vmem:[%s8567_s2 + $0xac] ss:$16 sps:$4 sm:$0xff]  }
 0x376   :  { %6339 = vrcp.f32 %v1909_v34  ;;  %v1910_v3 = vadd.f32 1.0, %v6330_v2  ;;  %v6332_v4 = vpop.eup %6331  ;;  %v7677_v34 = vld [vmem:[%s8567_s2 + $0xa8] ss:$16 sps:$4 sm:$0xff]   ;;  %v7693_v2 = vld [vmem:[%s8567_s2 + $0xcc] ss:$16 sps:$4 sm:$0xff]  }
 0x377   :  { %6341 = vpow2.f32 %v5348_v39  ;;  %v6334_v5 = vpop.eup %6333  ;;  %v7672_v39 = vld [vmem:[%s8567_s2 + $0xa0] ss:$16 sps:$4 sm:$0xff]  }
 0x378   :  { %6343 = vrcp.f32 %v1898_v0  ;;  %v6336_v8 = vpop.eup %6335  ;;  %v1923_v42 = vadd.f32 1.0, %v6334_v5  ;;  %v7688_v0 = vld [vmem:[%s8567_s2 + $0xc4] ss:$16 sps:$4 sm:$0xff]  }
 0x379   :  { %6345 = vrcp.f32 %v1910_v3  ;;  %v7701_v3 = vld [vmem:[%s8567_s2 + $0xc0] ss:$16 sps:$4 sm:$0xff]   ;;  %v7713_v5 = vld [vmem:[%s8567_s2 + $0xe4] ss:$16 sps:$4 sm:$0xff]  }
 0x37a   :  { %6347 = vrcp.f32 %v1923_v42 }
 0x37f   :  { %v6338_v9 = vpop.eup %6337 }
 0x380   :  { %v6340_v19 = vpop.eup %6339  ;;  %v1931_v38 = vmul.f32 %v6338_v9, %v6332_v4  ;;  %v7706_v4 = vld [vmem:[%s8567_s2 + $0xc8] ss:$16 sps:$4 sm:$0xff]   ;;  %v7725_v9 = vld [vmem:[%s8567_s2 + $0xe0] ss:$16 sps:$4 sm:$0xff]  }
 0x381   :  { %v6342_v40 = vpop.eup %6341  ;;  %v1929_v1 = vmul.f32 %v6340_v19, %v7257_v31  ;;  %v7730_v19 = vld [vmem:[%s8567_s2 + $0xe8] ss:$16 sps:$4 sm:$0xff]  }
 0x382   :  { %v6344_v41 = vpop.eup %6343  ;;  %v1924_v46 = vadd.f32 1.0, %v6342_v40  ;;  %v7742_v40 = vld [vmem:[%s8568_s1 + $0xc] ss:$16 sps:$4 sm:$0xff]  }
 0x383   :  { %v7497_v43 = vadd.f32 %v1931_v38, %v1929_v1  ;;  %v1932_v44 = vmul.f32 %v6344_v41, %v6336_v8  ;;  %v6346_v45 = vpop.eup %6345  ;;  %v7718_v8 = vld [vmem:[%s8567_s2 + $0xec] ss:$16 sps:$4 sm:$0xff]   ;;  %v7737_v38 = vld [vmem:[%s8568_s1 + $0x4] ss:$16 sps:$4 sm:$0xff]  }
 0x384   :  { %v1930_v47 = vmul.f32 %v6346_v45, %v7261_v37  ;;  %v6348_v49 = vpop.eup %6347  ;;  %v8615_v37 = vld [vmem:[#allocation2_spill] sm:$0xff] }
 0x385   :  { %6349 = vtanh.f32 %v7497_v43 }
 0x386   :  { %v7501_v48 = vadd.f32 %v1932_v44, %v1930_v47  ;;  %6351 = vrcp.f32 %v1924_v46 }
 0x388   :  { %6353 = vtanh.f32 %v7501_v48 }
 0x38f   :  { %v6350_v50 = vpop.eup %6349 }
 0x390   :  { %v6352_v31 = vpop.eup %6351  ;;  %v1937_v52 = vmul.f32 %v6350_v50, %v6348_v49 }
 0x392   :  { %v6354_v51 = vpop.eup %6353 }
 0x393   :  { %v1938_v53 = vmul.f32 %v6354_v51, %v6352_v31 }
 0x395   :  { %v1939_v54 = vpack.c.bf16 %v1938_v53, %v1937_v52 }
 0x397   :  { %5795 = vst [vmem:[%s8571_s4 + $0x10] sm:$0xff] %v1939_v54   ;;  %2210 = vmatmul.mubr.bf16.vlgmr.msra.gmra.mrb[12].mxu0 %v1939_v54  ;;  %2253 = vmatmul.mubr.bf16.vlgmr.msra.gmra.mrb[12].mxu1 %v1939_v54 }
 0x398   :  { %2430 = vmatpush1.bf16.msra.mxu0 %v7267_v16  ;;  %2473 = vmatpush1.bf16.msra.mxu1 %v7272_v25  ;;  %v8616_v16 = vld [vmem:[#allocation3_spill] sm:$0xff]  ;;  %v8617_v25 = vld [vmem:[#allocation4_spill] sm:$0xff] }
 0x399   :  { %2431 = vmatprep.subr.bf16.mxu0 %v7277_v18  ;;  %2474 = vmatprep.subr.bf16.mxu1 %v7282_v20  ;;  %v8618_v18 = vld [vmem:[#allocation5_spill] sm:$0xff]  ;;  %v8619_v20 = vld [vmem:[#allocation6_spill] sm:$0xff] }
 0x39a   :  { %2461 = vmatprep.mubr.bf16.mxu0 %v8604_v63  ;;  %2504 = vmatprep.mubr.bf16.mxu1 %v8604_v63 }
 0x39c   :  { %2432 = vmatpush1.bf16.msra.mxu0 %v7292_v17  ;;  %2475 = vmatpush1.bf16.msra.mxu1 %v7297_v21  ;;  %v8620_v17 = vld [vmem:[#allocation7_spill] sm:$0xff]  ;;  %v8621_v21 = vld [vmem:[#allocation8_spill] sm:$0xff] }
 0x39d   :  { %2433 = vmatprep.subr.bf16.mxu0 %v7304_v22  ;;  %2476 = vmatprep.subr.bf16.mxu1 %v7309_v24  ;;  %v8622_v22 = vld [vmem:[#allocation9_spill] sm:$0xff] }
 0x39e   :  { %v6062_v24 = vld [vmem:[%s8569_s0 + $0x18] sm:$0xff]  }
 0x3a0   :  { %2434 = vmatpush1.bf16.msra.mxu0 %v7318_v26  ;;  %2477 = vmatpush1.bf16.msra.mxu1 %v7323_v28  ;;  %v7547_v26 = vld [vmem:[%s8567_s2 + $0x4] ss:$16 sps:$4 sm:$0xff]   ;;  %v7552_v28 = vld [vmem:[%s8567_s2 + $0xc] ss:$16 sps:$4 sm:$0xff]  }
 0x3a1   :  { %2435 = vmatprep.subr.bf16.mxu0 %v7330_v29  ;;  %2478 = vmatprep.subr.bf16.mxu1 %v7335_v30  ;;  %v7557_v29 = vld [vmem:[%s8567_s2] ss:$16 sps:$4 sm:$0xff]   ;;  %v7562_v30 = vld [vmem:[%s8567_s2 + $0x8] ss:$16 sps:$4 sm:$0xff]  }
 0x3a4   :  { %2436 = vmatpush1.bf16.msra.mxu0 %v7342_v32  ;;  %2479 = vmatpush1.bf16.msra.mxu1 %v7347_v33  ;;  %v7571_v32 = vld [vmem:[%s8567_s2 + $0x24] ss:$16 sps:$4 sm:$0xff]   ;;  %v7576_v33 = vld [vmem:[%s8567_s2 + $0x2c] ss:$16 sps:$4 sm:$0xff]  }
 0x3a5   :  { %2437 = vmatprep.subr.bf16.mxu0 %v7354_v35  ;;  %2480 = vmatprep.subr.bf16.mxu1 %v7359_v36  ;;  %v7581_v35 = vld [vmem:[%s8567_s2 + $0x20] ss:$16 sps:$4 sm:$0xff]   ;;  %v7586_v36 = vld [vmem:[%s8567_s2 + $0x28] ss:$16 sps:$4 sm:$0xff]  }
 0x3a8   :  { %2438 = vmatpush1.bf16.msra.mxu0 %v7366_v10  ;;  %2481 = vmatpush1.bf16.msra.mxu1 %v8615_v37  ;;  %v7595_v10 = vld [vmem:[%s8567_s2 + $0x44] ss:$16 sps:$4 sm:$0xff]  }
 0x3a9   :  { %2439 = vmatprep.subr.bf16.mxu0 %v8616_v16  ;;  %2482 = vmatprep.subr.bf16.mxu1 %v8617_v25 }
 0x3ac   :  { %2440 = vmatpush1.bf16.msra.mxu0 %v8618_v18  ;;  %2483 = vmatpush1.bf16.msra.mxu1 %v8619_v20 }
 0x3ad   :  { %2441 = vmatprep.subr.bf16.mxu0 %v8620_v17  ;;  %2484 = vmatprep.subr.bf16.mxu1 %v8621_v21 }
 0x3b0   :  { %2442 = vmatpush1.bf16.msra.mxu0 %v8622_v22  ;;  %2485 = vmatpush1.bf16.msra.mxu1 %v7419_v13  ;;  %v7605_v13 = vld [vmem:[%s8567_s2 + $0x40] ss:$16 sps:$4 sm:$0xff]  }
 0x3b1   :  { %2443 = vmatprep.subr.bf16.mxu0 %v7426_v15  ;;  %2486 = vmatprep.subr.bf16.mxu1 %v7431_v14  ;;  %v7610_v15 = vld [vmem:[%s8567_s2 + $0x48] ss:$16 sps:$4 sm:$0xff]   ;;  %v7619_v14 = vld [vmem:[%s8567_s2 + $0x64] ss:$16 sps:$4 sm:$0xff]  }
 0x3b4   :  { %2444 = vmatpush1.bf16.msra.mxu0 %v7438_v11  ;;  %2487 = vmatpush1.bf16.msra.mxu1 %v7443_v12  ;;  %v7600_v12 = vld [vmem:[%s8567_s2 + $0x4c] ss:$16 sps:$4 sm:$0xff]  }
 0x3b5   :  { %2809 = vmatprep.subr.bf16.mxu0 %v7547_v26  ;;  %2852 = vmatprep.subr.bf16.mxu1 %v7552_v28  ;;  %v7624_v11 = vld [vmem:[%s8567_s2 + $0x6c] ss:$16 sps:$4 sm:$0xff]  }
 0x3b7   :  { %2462 = vmatmul.mubr.bf16.vlgmr.msra.gmra.mrb[12].mxu0 %v6062_v24  ;;  %2505 = vmatmul.mubr.bf16.vlgmr.msra.gmra.mrb[12].mxu1 %v6062_v24 }
 0x3b8   :  { %2841 = vmatprep.mubr.bf16.mxu0 %v8604_v63  ;;  %2884 = vmatprep.mubr.bf16.mxu1 %v8604_v63 }
 0x3b9   :  { %2810 = vmatpush1.bf16.msra.mxu0 %v7557_v29  ;;  %2853 = vmatpush1.bf16.msra.mxu1 %v7562_v30 }
 0x3ba   :  { %2811 = vmatprep.subr.bf16.mxu0 %v7571_v32  ;;  %2854 = vmatprep.subr.bf16.mxu1 %v7576_v33 }
 0x3bd   :  { %2812 = vmatpush1.bf16.msra.mxu0 %v7581_v35  ;;  %2855 = vmatpush1.bf16.msra.mxu1 %v7586_v36 }
 0x3be   :  { %2813 = vmatprep.subr.bf16.mxu0 %v7595_v10  ;;  %2856 = vmatprep.subr.bf16.mxu1 %v7600_v12 }
 0x3c1   :  { %2814 = vmatpush1.bf16.msra.mxu0 %v7605_v13  ;;  %2857 = vmatpush1.bf16.msra.mxu1 %v7610_v15 }
 0x3c2   :  { %2815 = vmatprep.subr.bf16.mxu0 %v7619_v14  ;;  %2858 = vmatprep.subr.bf16.mxu1 %v7624_v11 }
 0x3c5   :  { %2816 = vmatpush1.bf16.msra.mxu0 %v7629_v55  ;;  %2859 = vmatpush1.bf16.msra.mxu1 %v7634_v56 }
 0x3c6   :  { %2817 = vmatprep.subr.bf16.mxu0 %v7643_v57  ;;  %2860 = vmatprep.subr.bf16.mxu1 %v7648_v58 }
 0x3c9   :  { %2818 = vmatpush1.bf16.msra.mxu0 %v7653_v60  ;;  %2861 = vmatpush1.bf16.msra.mxu1 %v7658_v61 }
 0x3ca   :  { %2819 = vmatprep.subr.bf16.mxu0 %v7665_v62  ;;  %2862 = vmatprep.subr.bf16.mxu1 %v7682_v59 }
 0x3cd   :  { %2820 = vmatpush1.bf16.msra.mxu0 %v7672_v39  ;;  %2863 = vmatpush1.bf16.msra.mxu1 %v7677_v34 }
 0x3ce   :  { %2821 = vmatprep.subr.bf16.mxu0 %v7688_v0  ;;  %2864 = vmatprep.subr.bf16.mxu1 %v7693_v2 }
 0x3d1   :  { %2822 = vmatpush1.bf16.msra.mxu0 %v7701_v3  ;;  %2865 = vmatpush1.bf16.msra.mxu1 %v7706_v4 }
 0x3d2   :  { %2823 = vmatprep.subr.bf16.mxu0 %v7713_v5  ;;  %2866 = vmatprep.subr.bf16.mxu1 %v7718_v8 }
 0x3d5   :  { %2824 = vmatpush1.bf16.msra.mxu0 %v7725_v9  ;;  %2867 = vmatpush1.bf16.msra.mxu1 %v7730_v19 }
 0x3d6   :  { %3061 = vmatprep.subr.bf16.mxu0 %v7737_v38  ;;  %3104 = vmatprep.subr.bf16.mxu1 %v7742_v40 }
 0x48a   :  { %v2463_v1 = vpop.f32.mrb[12].mxu0  ;;  %v2506_v41 = vpop.f32.mrb[12].mxu1 }
 0x48b   :  { %v2515_v42 = vadd.f32 %v2463_v1, %v6982_v6  ;;  %v2465_v44 = vpop.f32.mrb[13].mxu0  ;;  %v2508_v45 = vpop.f32.mrb[13].mxu1  ;;  %v2517_v18 = vadd.f32 %v2506_v41, %v6992_v27 }
 0x48c   :  { %v2516_v46 = vadd.f32 %v2465_v44, %v6984_v7  ;;  %v2467_v47 = vpop.f32.mrb[14].mxu0  ;;  %v2510_v49 = vpop.f32.mrb[14].mxu1  ;;  %v2518_v25 = vadd.f32 %v2508_v45, %v6989_v23 }
 0x48d   :  { %v5420_v50 = vmul.f32 -1.442695, %v2515_v42  ;;  %v2519_v31 = vadd.f32 %v2467_v47, %v6982_v6  ;;  %v2469_v51 = vpop.f32.mrb[15].mxu0  ;;  %v2512_v52 = vpop.f32.mrb[15].mxu1  ;;  %v2521_v21 = vadd.f32 %v2510_v49, %v6992_v27 }
 0x48e   :  { %v5422_v53 = vmul.f32 -1.442695, %v2516_v46  ;;  %v2520_v54 = vadd.f32 %v2469_v51, %v6984_v7  ;;  %v5424_v20 = vmul.f32 -1.442695, %v2518_v25  ;;  %v2522_v17 = vadd.f32 %v2512_v52, %v6989_v23 }
 0x48f   :  { %6355 = vpow2.f32 %v5420_v50  ;;  %v5421_v37 = vmul.f32 -1.442695, %v2519_v31 }
 0x490   :  { %6357 = vpow2.f32 %v5422_v53  ;;  %v5423_v16 = vmul.f32 -1.442695, %v2520_v54  ;;  %v5425_v42 = vmul.f32 -1.442695, %v2522_v17 }
 0x491   :  { %6359 = vpow2.f32 %v5421_v37 }
 0x492   :  { %6361 = vpow2.f32 %v5423_v16 }
 0x493   :  { %6363 = vtanh.f32 %v2517_v18 }
 0x494   :  { %6365 = vpow2.f32 %v5424_v20 }
 0x495   :  { %6367 = vtanh.f32 %v2521_v21 }
 0x499   :  { %v6356_v22 = vpop.eup %6355 }
 0x49a   :  { %v6358_v24 = vpop.eup %6357  ;;  %v2529_v1 = vadd.f32 1.0, %v6356_v22 }
 0x49b   :  { %v2541_v44 = vadd.f32 1.0, %v6358_v24  ;;  %v6360_v46 = vpop.eup %6359 }
 0x49c   :  { %6369 = vrcp.f32 %v2529_v1  ;;  %v2530_v45 = vadd.f32 1.0, %v6360_v46  ;;  %v6362_v47 = vpop.eup %6361 }
 0x49d   :  { %6371 = vrcp.f32 %v2541_v44  ;;  %v2542_v41 = vadd.f32 1.0, %v6362_v47  ;;  %v6364_v50 = vpop.eup %6363  ;;  %v7767_v47 = vld [vmem:[%s8568_s1] ss:$16 sps:$4 sm:$0xff]  }
 0x49e   :  { %6373 = vpow2.f32 %v5425_v42  ;;  %v6366_v31 = vpop.eup %6365 }
 0x49f   :  { %6375 = vrcp.f32 %v2530_v45  ;;  %v6368_v49 = vpop.eup %6367  ;;  %v2555_v25 = vadd.f32 1.0, %v6366_v31  ;;  %v7782_v31 = vld [vmem:[%s8568_s1 + $0x2c] ss:$16 sps:$4 sm:$0xff]  }
 0x4a0   :  { %6377 = vrcp.f32 %v2542_v41 }
 0x4a1   :  { %6379 = vrcp.f32 %v2555_v25  ;;  %v7835_v25 = vld [vmem:[%s8568_s1 + $0x6c] ss:$16 sps:$4 sm:$0xff]  }
 0x4a6   :  { %v6370_v51 = vpop.eup %6369 }
 0x4a7   :  { %v6372_v52 = vpop.eup %6371  ;;  %v2563_v53 = vmul.f32 %v6370_v51, %v6364_v50  ;;  %v7777_v50 = vld [vmem:[%s8568_s1 + $0x24] ss:$16 sps:$4 sm:$0xff]   ;;  %v7797_v51 = vld [vmem:[%s8568_s1 + $0x28] ss:$16 sps:$4 sm:$0xff]  }
 0x4a8   :  { %v6374_v54 = vpop.eup %6373  ;;  %v2561_v37 = vmul.f32 %v6372_v52, %v7497_v43  ;;  %v7804_v52 = vld [vmem:[%s8568_s1 + $0x44] ss:$16 sps:$4 sm:$0xff]  }
 0x4a9   :  { %v6376_v16 = vpop.eup %6375  ;;  %v2556_v21 = vadd.f32 1.0, %v6374_v54  ;;  %v7818_v54 = vld [vmem:[%s8568_s1 + $0x40] ss:$16 sps:$4 sm:$0xff]  }
 0x4aa   :  { %v7757_v18 = vadd.f32 %v2563_v53, %v2561_v37  ;;  %v2564_v20 = vmul.f32 %v6376_v16, %v6368_v49  ;;  %v6378_v17 = vpop.eup %6377  ;;  %v7792_v49 = vld [vmem:[%s8568_s1 + $0x20] ss:$16 sps:$4 sm:$0xff]   ;;  %v7809_v53 = vld [vmem:[%s8568_s1 + $0x4c] ss:$16 sps:$4 sm:$0xff]   ;;  %v7823_v37 = vld [vmem:[%s8568_s1 + $0x48] ss:$16 sps:$4 sm:$0xff]  }
 0x4ab   :  { %v2562_v22 = vmul.f32 %v6378_v17, %v7501_v48  ;;  %v6380_v1 = vpop.eup %6379  ;;  %v7772_v48 = vld [vmem:[%s8568_s1 + $0x8] ss:$16 sps:$4 sm:$0xff]   ;;  %v7830_v16 = vld [vmem:[%s8568_s1 + $0x64] ss:$16 sps:$4 sm:$0xff]  }
 0x4ac   :  { %6381 = vtanh.f32 %v7757_v18  ;;  %v7847_v17 = vld [vmem:[%s8568_s1 + $0x68] ss:$16 sps:$4 sm:$0xff]  }
 0x4ad   :  { %v7761_v24 = vadd.f32 %v2564_v20, %v2562_v22  ;;  %6383 = vrcp.f32 %v2556_v21  ;;  %v7842_v20 = vld [vmem:[%s8568_s1 + $0x60] ss:$16 sps:$4 sm:$0xff]   ;;  %v7854_v21 = vld [vmem:[%s8568_s1 + $0x84] ss:$16 sps:$4 sm:$0xff]   ;;  %v7859_v22 = vld [vmem:[%s8568_s1 + $0x8c] ss:$16 sps:$4 sm:$0xff]  }
 0x4af   :  { %6385 = vtanh.f32 %v7761_v24 }
 0x4b6   :  { %v6382_v42 = vpop.eup %6381 }
 0x4b7   :  { %v6384_v43 = vpop.eup %6383  ;;  %v2569_v46 = vmul.f32 %v6382_v42, %v6380_v1  ;;  %v7866_v1 = vld [vmem:[%s8568_s1 + $0x80] ss:$16 sps:$4 sm:$0xff]   ;;  %v7871_v42 = vld [vmem:[%s8568_s1 + $0x88] ss:$16 sps:$4 sm:$0xff]  }
 0x4b8   :  { %8623 = vst [vmem:[#allocation2_spill] sm:$0xff] %v7871_v42 }
 0x4b9   :  { %v6386_v44 = vpop.eup %6385 }
 0x4ba   :  { %v2570_v45 = vmul.f32 %v6386_v44, %v6384_v43  ;;  %v7878_v43 = vld [vmem:[%s8568_s1 + $0xa4] ss:$16 sps:$4 sm:$0xff]   ;;  %v7883_v44 = vld [vmem:[%s8568_s1 + $0xac] ss:$16 sps:$4 sm:$0xff]  }
 0x4bb   :  { %8624 = vst [vmem:[#allocation3_spill] sm:$0xff] %v7878_v43  ;;  %8625 = vst [vmem:[#allocation4_spill] sm:$0xff] %v7883_v44 }
 0x4bc   :  { %v2571_v41 = vpack.c.bf16 %v2570_v45, %v2569_v46  ;;  %v7890_v46 = vld [vmem:[%s8568_s1 + $0xa0] ss:$16 sps:$4 sm:$0xff]   ;;  %v7895_v45 = vld [vmem:[%s8568_s1 + $0xa8] ss:$16 sps:$4 sm:$0xff]  }
 0x4bd   :  { %8626 = vst [vmem:[#allocation5_spill] sm:$0xff] %v7890_v46  ;;  %8627 = vst [vmem:[#allocation6_spill] sm:$0xff] %v7895_v45 }
 0x4be   :  { %5796 = vst [vmem:[%s8571_s4 + $0x18] sm:$0xff] %v2571_v41   ;;  %2842 = vmatmul.mubr.bf16.vlgmr.msra.gmra.mrb[16].mxu0 %v2571_v41  ;;  %2885 = vmatmul.mubr.bf16.vlgmr.msra.gmra.mrb[16].mxu1 %v2571_v41  ;;  %v7902_v41 = vld [vmem:[%s8568_s1 + $0xc4] ss:$16 sps:$4 sm:$0xff]  }
 0x4bf   :  { %3062 = vmatpush1.bf16.msra.mxu0 %v7767_v47  ;;  %3105 = vmatpush1.bf16.msra.mxu1 %v7772_v48  ;;  %8628 = vst [vmem:[#allocation7_spill] sm:$0xff] %v7902_v41 }
 0x4c0   :  { %3063 = vmatprep.subr.bf16.mxu0 %v7777_v50  ;;  %3106 = vmatprep.subr.bf16.mxu1 %v7782_v31 }
 0x4c1   :  { %3093 = vmatprep.mubr.bf16.mxu0 %v8604_v63  ;;  %3136 = vmatprep.mubr.bf16.mxu1 %v8604_v63 }
 0x4c3   :  { %3064 = vmatpush1.bf16.msra.mxu0 %v7792_v49  ;;  %3107 = vmatpush1.bf16.msra.mxu1 %v7797_v51 }
 0x4c4   :  { %3065 = vmatprep.subr.bf16.mxu0 %v7804_v52  ;;  %3108 = vmatprep.subr.bf16.mxu1 %v7809_v53 }
 0x4c7   :  { %3066 = vmatpush1.bf16.msra.mxu0 %v7818_v54  ;;  %3109 = vmatpush1.bf16.msra.mxu1 %v7823_v37 }
 0x4c8   :  { %3067 = vmatprep.subr.bf16.mxu0 %v7830_v16  ;;  %3110 = vmatprep.subr.bf16.mxu1 %v7835_v25 }
 0x4cb   :  { %3068 = vmatpush1.bf16.msra.mxu0 %v7842_v20  ;;  %3111 = vmatpush1.bf16.msra.mxu1 %v7847_v17 }
 0x4cc   :  { %3069 = vmatprep.subr.bf16.mxu0 %v7854_v21  ;;  %3112 = vmatprep.subr.bf16.mxu1 %v7859_v22 }
 0x4cf   :  { %3070 = vmatpush1.bf16.msra.mxu0 %v7866_v1  ;;  %3113 = vmatpush1.bf16.msra.mxu1 %v7871_v42  ;;  %v7907_v42 = vld [vmem:[%s8568_s1 + $0xcc] ss:$16 sps:$4 sm:$0xff]  }
 0x4d0   :  { %3071 = vmatprep.subr.bf16.mxu0 %v7878_v43  ;;  %3114 = vmatprep.subr.bf16.mxu1 %v7883_v44  ;;  %8629 = vst [vmem:[#allocation8_spill] sm:$0xff] %v7907_v42  ;;  %v7914_v43 = vld [vmem:[%s8568_s1 + $0xc0] ss:$16 sps:$4 sm:$0xff]   ;;  %v7919_v44 = vld [vmem:[%s8568_s1 + $0xc8] ss:$16 sps:$4 sm:$0xff]  }
 0x4d1   :  { %8630 = vst [vmem:[#allocation9_spill] sm:$0xff] %v7914_v43 }
 0x4d3   :  { %3072 = vmatpush1.bf16.msra.mxu0 %v7890_v46  ;;  %3115 = vmatpush1.bf16.msra.mxu1 %v7895_v45  ;;  %v7926_v46 = vld [vmem:[%s8568_s1 + $0xe4] ss:$16 sps:$4 sm:$0xff]   ;;  %v7931_v45 = vld [vmem:[%s8568_s1 + $0xec] ss:$16 sps:$4 sm:$0xff]  }
 0x4d4   :  { %3073 = vmatprep.subr.bf16.mxu0 %v7902_v41  ;;  %3116 = vmatprep.subr.bf16.mxu1 %v7907_v42  ;;  %v7938_v41 = vld [vmem:[%s8568_s1 + $0xe0] ss:$16 sps:$4 sm:$0xff]   ;;  %v7943_v42 = vld [vmem:[%s8568_s1 + $0xe8] ss:$16 sps:$4 sm:$0xff]  }
 0x4d7   :  { %3074 = vmatpush1.bf16.msra.mxu0 %v7914_v43  ;;  %3117 = vmatpush1.bf16.msra.mxu1 %v7919_v44  ;;  %v6159_v43 = vld [vmem:[%s8569_s0 + $0x20] sm:$0xff]  }
 0x4d8   :  { %3075 = vmatprep.subr.bf16.mxu0 %v7926_v46  ;;  %3118 = vmatprep.subr.bf16.mxu1 %v7931_v45 }
 0x4db   :  { %3076 = vmatpush1.bf16.msra.mxu0 %v7938_v41  ;;  %3119 = vmatpush1.bf16.msra.mxu1 %v7943_v42 }
 0x4dc   :  { %3441 = vmatprep.subr.bf16.mxu0 %v7547_v26  ;;  %3484 = vmatprep.subr.bf16.mxu1 %v7552_v28 }
 0x4de   :  { %3094 = vmatmul.mubr.bf16.vlgmr.msra.gmra.mrb[16].mxu0 %v6159_v43  ;;  %3137 = vmatmul.mubr.bf16.vlgmr.msra.gmra.mrb[16].mxu1 %v6159_v43 }
 0x4df   :  { %3442 = vmatpush1.bf16.msra.mxu0 %v7557_v29  ;;  %3485 = vmatpush1.bf16.msra.mxu1 %v7562_v30 }
 0x4e0   :  { %3443 = vmatprep.subr.bf16.mxu0 %v7571_v32  ;;  %3486 = vmatprep.subr.bf16.mxu1 %v7576_v33 }
 0x4e1   :  { %3473 = vmatprep.mubr.bf16.mxu0 %v8604_v63  ;;  %3516 = vmatprep.mubr.bf16.mxu1 %v8604_v63 }
 0x4e3   :  { %3444 = vmatpush1.bf16.msra.mxu0 %v7581_v35  ;;  %3487 = vmatpush1.bf16.msra.mxu1 %v7586_v36 }
 0x4e4   :  { %3445 = vmatprep.subr.bf16.mxu0 %v7595_v10  ;;  %3488 = vmatprep.subr.bf16.mxu1 %v7600_v12 }
 0x4e7   :  { %3446 = vmatpush1.bf16.msra.mxu0 %v7605_v13  ;;  %3489 = vmatpush1.bf16.msra.mxu1 %v7610_v15 }
 0x4e8   :  { %3447 = vmatprep.subr.bf16.mxu0 %v7619_v14  ;;  %3490 = vmatprep.subr.bf16.mxu1 %v7624_v11 }
 0x4eb   :  { %3448 = vmatpush1.bf16.msra.mxu0 %v7629_v55  ;;  %3491 = vmatpush1.bf16.msra.mxu1 %v7634_v56 }
 0x4ec   :  { %3449 = vmatprep.subr.bf16.mxu0 %v7643_v57  ;;  %3492 = vmatprep.subr.bf16.mxu1 %v7648_v58 }
 0x4ef   :  { %3450 = vmatpush1.bf16.msra.mxu0 %v7653_v60  ;;  %3493 = vmatpush1.bf16.msra.mxu1 %v7658_v61 }
 0x4f0   :  { %3451 = vmatprep.subr.bf16.mxu0 %v7665_v62  ;;  %3494 = vmatprep.subr.bf16.mxu1 %v7682_v59 }
 0x4f3   :  { %3452 = vmatpush1.bf16.msra.mxu0 %v7672_v39  ;;  %3495 = vmatpush1.bf16.msra.mxu1 %v7677_v34 }
 0x4f4   :  { %3453 = vmatprep.subr.bf16.mxu0 %v7688_v0  ;;  %3496 = vmatprep.subr.bf16.mxu1 %v7693_v2 }
 0x4f7   :  { %3454 = vmatpush1.bf16.msra.mxu0 %v7701_v3  ;;  %3497 = vmatpush1.bf16.msra.mxu1 %v7706_v4 }
 0x4f8   :  { %3455 = vmatprep.subr.bf16.mxu0 %v7713_v5  ;;  %3498 = vmatprep.subr.bf16.mxu1 %v7718_v8 }
 0x4fb   :  { %3456 = vmatpush1.bf16.msra.mxu0 %v7725_v9  ;;  %3499 = vmatpush1.bf16.msra.mxu1 %v7730_v19 }
 0x4fc   :  { %3693 = vmatprep.subr.bf16.mxu0 %v7737_v38  ;;  %3736 = vmatprep.subr.bf16.mxu1 %v7742_v40 }
 0x5b1   :  { %v3095_v26 = vpop.f32.mrb[16].mxu0  ;;  %v3138_v28 = vpop.f32.mrb[16].mxu1 }
 0x5b2   :  { %v3147_v29 = vadd.f32 %v3095_v26, %v6982_v6  ;;  %v3097_v30 = vpop.f32.mrb[17].mxu0  ;;  %v3140_v32 = vpop.f32.mrb[17].mxu1  ;;  %v3149_v58 = vadd.f32 %v3138_v28, %v6992_v27 }
 0x5b3   :  { %v3148_v33 = vadd.f32 %v3097_v30, %v6984_v7  ;;  %v3099_v35 = vpop.f32.mrb[18].mxu0  ;;  %v3142_v36 = vpop.f32.mrb[18].mxu1  ;;  %v3150_v57 = vadd.f32 %v3140_v32, %v6989_v23 }
 0x5b4   :  { %v5497_v10 = vmul.f32 -1.442695, %v3147_v29  ;;  %v3151_v12 = vadd.f32 %v3099_v35, %v6982_v6  ;;  %v3101_v13 = vpop.f32.mrb[19].mxu0  ;;  %v3144_v15 = vpop.f32.mrb[19].mxu1  ;;  %v3153_v62 = vadd.f32 %v3142_v36, %v6992_v27 }
 0x5b5   :  { %v5499_v14 = vmul.f32 -1.442695, %v3148_v33  ;;  %v3152_v11 = vadd.f32 %v3101_v13, %v6984_v7  ;;  %v5501_v60 = vmul.f32 -1.442695, %v3150_v57  ;;  %v3154_v61 = vadd.f32 %v3144_v15, %v6989_v23 }
 0x5b6   :  { %6387 = vpow2.f32 %v5497_v10  ;;  %v5498_v55 = vmul.f32 -1.442695, %v3151_v12 }
 0x5b7   :  { %6389 = vpow2.f32 %v5499_v14  ;;  %v5500_v56 = vmul.f32 -1.442695, %v3152_v11  ;;  %v5502_v0 = vmul.f32 -1.442695, %v3154_v61  ;;  %v8143_v61 = vld [vmem:[%s8567_s2 + $0x84] ss:$16 sps:$4 sm:$0xff]  }
 0x5b8   :  { %6391 = vpow2.f32 %v5498_v55 }
 0x5b9   :  { %6393 = vpow2.f32 %v5500_v56 }
 0x5ba   :  { %6395 = vtanh.f32 %v3149_v58  ;;  %v8129_v58 = vld [vmem:[%s8567_s2 + $0x60] ss:$16 sps:$4 sm:$0xff]  }
 0x5bb   :  { %6397 = vpow2.f32 %v5501_v60  ;;  %v8134_v60 = vld [vmem:[%s8567_s2 + $0x68] ss:$16 sps:$4 sm:$0xff]  }
 0x5bc   :  { %6399 = vtanh.f32 %v3153_v62  ;;  %v8148_v62 = vld [vmem:[%s8567_s2 + $0x8c] ss:$16 sps:$4 sm:$0xff]  }
 0x5c0   :  { %v6388_v39 = vpop.eup %6387 }
 0x5c1   :  { %v6390_v34 = vpop.eup %6389  ;;  %v3161_v59 = vadd.f32 1.0, %v6388_v39  ;;  %v8153_v39 = vld [vmem:[%s8567_s2 + $0x80] ss:$16 sps:$4 sm:$0xff]  }
 0x5c2   :  { %v3173_v2 = vadd.f32 1.0, %v6390_v34  ;;  %v6392_v3 = vpop.eup %6391  ;;  %v8158_v34 = vld [vmem:[%s8567_s2 + $0x88] ss:$16 sps:$4 sm:$0xff]  }
 0x5c3   :  { %6401 = vrcp.f32 %v3161_v59  ;;  %v3162_v4 = vadd.f32 1.0, %v6392_v3  ;;  %v6394_v5 = vpop.eup %6393  ;;  %v8165_v59 = vld [vmem:[%s8567_s2 + $0xa4] ss:$16 sps:$4 sm:$0xff]   ;;  %v8182_v3 = vld [vmem:[%s8567_s2 + $0xac] ss:$16 sps:$4 sm:$0xff]  }
 0x5c4   :  { %6403 = vrcp.f32 %v3173_v2  ;;  %v3174_v8 = vadd.f32 1.0, %v6394_v5  ;;  %v6396_v9 = vpop.eup %6395  ;;  %v8177_v2 = vld [vmem:[%s8567_s2 + $0xa8] ss:$16 sps:$4 sm:$0xff]   ;;  %v8193_v5 = vld [vmem:[%s8567_s2 + $0xcc] ss:$16 sps:$4 sm:$0xff]  }
 0x5c5   :  { %6405 = vpow2.f32 %v5502_v0  ;;  %v6398_v19 = vpop.eup %6397  ;;  %v8172_v0 = vld [vmem:[%s8567_s2 + $0xa0] ss:$16 sps:$4 sm:$0xff]  }
 0x5c6   :  { %6407 = vrcp.f32 %v3162_v4  ;;  %v6400_v38 = vpop.eup %6399  ;;  %v3187_v32 = vadd.f32 1.0, %v6398_v19  ;;  %v8188_v4 = vld [vmem:[%s8567_s2 + $0xc4] ss:$16 sps:$4 sm:$0xff]  }
 0x5c7   :  { %6409 = vrcp.f32 %v3174_v8  ;;  %v8201_v8 = vld [vmem:[%s8567_s2 + $0xc0] ss:$16 sps:$4 sm:$0xff]   ;;  %v8213_v19 = vld [vmem:[%s8567_s2 + $0xe4] ss:$16 sps:$4 sm:$0xff]  }
 0x5c8   :  { %6411 = vrcp.f32 %v3187_v32 }
 0x5cd   :  { %v6402_v40 = vpop.eup %6401 }
 0x5ce   :  { %v6404_v43 = vpop.eup %6403  ;;  %v3195_v26 = vmul.f32 %v6402_v40, %v6396_v9  ;;  %v8206_v9 = vld [vmem:[%s8567_s2 + $0xc8] ss:$16 sps:$4 sm:$0xff]   ;;  %v8225_v40 = vld [vmem:[%s8567_s2 + $0xe0] ss:$16 sps:$4 sm:$0xff]  }
 0x5cf   :  { %v6406_v28 = vpop.eup %6405  ;;  %v3193_v29 = vmul.f32 %v6404_v43, %v7757_v18  ;;  %v8230_v43 = vld [vmem:[%s8567_s2 + $0xe8] ss:$16 sps:$4 sm:$0xff]  }
 0x5d0   :  { %v6408_v30 = vpop.eup %6407  ;;  %v3188_v10 = vadd.f32 1.0, %v6406_v28  ;;  %v8242_v28 = vld [vmem:[%s8568_s1 + $0xc] ss:$16 sps:$4 sm:$0xff]  }
 0x5d1   :  { %v7997_v33 = vadd.f32 %v3195_v26, %v3193_v29  ;;  %v3196_v35 = vmul.f32 %v6408_v30, %v6400_v38  ;;  %v6410_v36 = vpop.eup %6409  ;;  %v8218_v38 = vld [vmem:[%s8567_s2 + $0xec] ss:$16 sps:$4 sm:$0xff]   ;;  %v8237_v26 = vld [vmem:[%s8568_s1 + $0x4] ss:$16 sps:$4 sm:$0xff]  }
 0x5d2   :  { %v3194_v12 = vmul.f32 %v6410_v36, %v7761_v24  ;;  %v6412_v15 = vpop.eup %6411  ;;  %v8631_v24 = vld [vmem:[#allocation2_spill] sm:$0xff] }
 0x5d3   :  { %6413 = vtanh.f32 %v7997_v33 }
 0x5d4   :  { %v8001_v13 = vadd.f32 %v3196_v35, %v3194_v12  ;;  %6415 = vrcp.f32 %v3188_v10 }
 0x5d6   :  { %6417 = vtanh.f32 %v8001_v13 }
 0x5dd   :  { %v6414_v14 = vpop.eup %6413 }
 0x5de   :  { %v6416_v18 = vpop.eup %6415  ;;  %v3201_v55 = vmul.f32 %v6414_v14, %v6412_v15 }
 0x5e0   :  { %v6418_v11 = vpop.eup %6417 }
 0x5e1   :  { %v3202_v56 = vmul.f32 %v6418_v11, %v6416_v18 }
 0x5e3   :  { %v3203_v57 = vpack.c.bf16 %v3202_v56, %v3201_v55 }
 0x5e5   :  { %5797 = vst [vmem:[%s8571_s4 + $0x20] sm:$0xff] %v3203_v57   ;;  %3474 = vmatmul.mubr.bf16.vlgmr.msra.gmra.mrb[20].mxu0 %v3203_v57  ;;  %3517 = vmatmul.mubr.bf16.vlgmr.msra.gmra.mrb[20].mxu1 %v3203_v57 }
 0x5e6   :  { %3694 = vmatpush1.bf16.msra.mxu0 %v7767_v47  ;;  %3737 = vmatpush1.bf16.msra.mxu1 %v7772_v48  ;;  %v8632_v47 = vld [vmem:[#allocation3_spill] sm:$0xff]  ;;  %v8633_v48 = vld [vmem:[#allocation4_spill] sm:$0xff] }
 0x5e7   :  { %3695 = vmatprep.subr.bf16.mxu0 %v7777_v50  ;;  %3738 = vmatprep.subr.bf16.mxu1 %v7782_v31  ;;  %v8634_v50 = vld [vmem:[#allocation5_spill] sm:$0xff]  ;;  %v8635_v31 = vld [vmem:[#allocation6_spill] sm:$0xff] }
 0x5e8   :  { %3725 = vmatprep.mubr.bf16.mxu0 %v8604_v63  ;;  %3768 = vmatprep.mubr.bf16.mxu1 %v8604_v63 }
 0x5ea   :  { %3696 = vmatpush1.bf16.msra.mxu0 %v7792_v49  ;;  %3739 = vmatpush1.bf16.msra.mxu1 %v7797_v51  ;;  %v8636_v49 = vld [vmem:[#allocation7_spill] sm:$0xff]  ;;  %v8637_v51 = vld [vmem:[#allocation8_spill] sm:$0xff] }
 0x5eb   :  { %3697 = vmatprep.subr.bf16.mxu0 %v7804_v52  ;;  %3740 = vmatprep.subr.bf16.mxu1 %v7809_v53  ;;  %v8638_v52 = vld [vmem:[#allocation9_spill] sm:$0xff]  ;;  %v6160_v53 = vld [vmem:[%s8569_s0 + $0x28] sm:$0xff]  }
 0x5ee   :  { %3698 = vmatpush1.bf16.msra.mxu0 %v7818_v54  ;;  %3741 = vmatpush1.bf16.msra.mxu1 %v7823_v37  ;;  %v8047_v54 = vld [vmem:[%s8567_s2 + $0x4] ss:$16 sps:$4 sm:$0xff]   ;;  %v8052_v37 = vld [vmem:[%s8567_s2 + $0xc] ss:$16 sps:$4 sm:$0xff]  }
 0x5ef   :  { %3699 = vmatprep.subr.bf16.mxu0 %v7830_v16  ;;  %3742 = vmatprep.subr.bf16.mxu1 %v7835_v25  ;;  %v8057_v16 = vld [vmem:[%s8567_s2] ss:$16 sps:$4 sm:$0xff]   ;;  %v8062_v25 = vld [vmem:[%s8567_s2 + $0x8] ss:$16 sps:$4 sm:$0xff]  }
 0x5f2   :  { %3700 = vmatpush1.bf16.msra.mxu0 %v7842_v20  ;;  %3743 = vmatpush1.bf16.msra.mxu1 %v7847_v17  ;;  %v8071_v20 = vld [vmem:[%s8567_s2 + $0x24] ss:$16 sps:$4 sm:$0xff]   ;;  %v8076_v17 = vld [vmem:[%s8567_s2 + $0x2c] ss:$16 sps:$4 sm:$0xff]  }
 0x5f3   :  { %3701 = vmatprep.subr.bf16.mxu0 %v7854_v21  ;;  %3744 = vmatprep.subr.bf16.mxu1 %v7859_v22  ;;  %v8081_v21 = vld [vmem:[%s8567_s2 + $0x20] ss:$16 sps:$4 sm:$0xff]   ;;  %v8086_v22 = vld [vmem:[%s8567_s2 + $0x28] ss:$16 sps:$4 sm:$0xff]  }
 0x5f6   :  { %3702 = vmatpush1.bf16.msra.mxu0 %v7866_v1  ;;  %3745 = vmatpush1.bf16.msra.mxu1 %v8631_v24  ;;  %v8095_v1 = vld [vmem:[%s8567_s2 + $0x44] ss:$16 sps:$4 sm:$0xff]  }
 0x5f7   :  { %3703 = vmatprep.subr.bf16.mxu0 %v8632_v47  ;;  %3746 = vmatprep.subr.bf16.mxu1 %v8633_v48 }
 0x5fa   :  { %3704 = vmatpush1.bf16.msra.mxu0 %v8634_v50  ;;  %3747 = vmatpush1.bf16.msra.mxu1 %v8635_v31 }
 0x5fb   :  { %3705 = vmatprep.subr.bf16.mxu0 %v8636_v49  ;;  %3748 = vmatprep.subr.bf16.mxu1 %v8637_v51 }
 0x5fe   :  { %3706 = vmatpush1.bf16.msra.mxu0 %v8638_v52  ;;  %3749 = vmatpush1.bf16.msra.mxu1 %v7919_v44  ;;  %v8105_v44 = vld [vmem:[%s8567_s2 + $0x40] ss:$16 sps:$4 sm:$0xff]  }
 0x5ff   :  { %3707 = vmatprep.subr.bf16.mxu0 %v7926_v46  ;;  %3750 = vmatprep.subr.bf16.mxu1 %v7931_v45  ;;  %v8110_v46 = vld [vmem:[%s8567_s2 + $0x48] ss:$16 sps:$4 sm:$0xff]   ;;  %v8119_v45 = vld [vmem:[%s8567_s2 + $0x64] ss:$16 sps:$4 sm:$0xff]  }
 0x602   :  { %3708 = vmatpush1.bf16.msra.mxu0 %v7938_v41  ;;  %3751 = vmatpush1.bf16.msra.mxu1 %v7943_v42  ;;  %v8100_v42 = vld [vmem:[%s8567_s2 + $0x4c] ss:$16 sps:$4 sm:$0xff]  }
 0x603   :  { %4073 = vmatprep.subr.bf16.mxu0 %v8047_v54  ;;  %4116 = vmatprep.subr.bf16.mxu1 %v8052_v37  ;;  %v8124_v41 = vld [vmem:[%s8567_s2 + $0x6c] ss:$16 sps:$4 sm:$0xff]  }
 0x605   :  { %3726 = vmatmul.mubr.bf16.vlgmr.msra.gmra.mrb[20].mxu0 %v6160_v53  ;;  %3769 = vmatmul.mubr.bf16.vlgmr.msra.gmra.mrb[20].mxu1 %v6160_v53 }
 0x606   :  { %4105 = vmatprep.mubr.bf16.mxu0 %v8604_v63  ;;  %4148 = vmatprep.mubr.bf16.mxu1 %v8604_v63 }
 0x607   :  { %4074 = vmatpush1.bf16.msra.mxu0 %v8057_v16  ;;  %4117 = vmatpush1.bf16.msra.mxu1 %v8062_v25 }
 0x608   :  { %4075 = vmatprep.subr.bf16.mxu0 %v8071_v20  ;;  %4118 = vmatprep.subr.bf16.mxu1 %v8076_v17 }
 0x60b   :  { %4076 = vmatpush1.bf16.msra.mxu0 %v8081_v21  ;;  %4119 = vmatpush1.bf16.msra.mxu1 %v8086_v22 }
 0x60c   :  { %4077 = vmatprep.subr.bf16.mxu0 %v8095_v1  ;;  %4120 = vmatprep.subr.bf16.mxu1 %v8100_v42 }
 0x60f   :  { %4078 = vmatpush1.bf16.msra.mxu0 %v8105_v44  ;;  %4121 = vmatpush1.bf16.msra.mxu1 %v8110_v46 }
 0x610   :  { %4079 = vmatprep.subr.bf16.mxu0 %v8119_v45  ;;  %4122 = vmatprep.subr.bf16.mxu1 %v8124_v41 }
 0x613   :  { %4080 = vmatpush1.bf16.msra.mxu0 %v8129_v58  ;;  %4123 = vmatpush1.bf16.msra.mxu1 %v8134_v60 }
 0x614   :  { %4081 = vmatprep.subr.bf16.mxu0 %v8143_v61  ;;  %4124 = vmatprep.subr.bf16.mxu1 %v8148_v62 }
 0x617   :  { %4082 = vmatpush1.bf16.msra.mxu0 %v8153_v39  ;;  %4125 = vmatpush1.bf16.msra.mxu1 %v8158_v34 }
 0x618   :  { %4083 = vmatprep.subr.bf16.mxu0 %v8165_v59  ;;  %4126 = vmatprep.subr.bf16.mxu1 %v8182_v3 }
 0x61b   :  { %4084 = vmatpush1.bf16.msra.mxu0 %v8172_v0  ;;  %4127 = vmatpush1.bf16.msra.mxu1 %v8177_v2 }
 0x61c   :  { %4085 = vmatprep.subr.bf16.mxu0 %v8188_v4  ;;  %4128 = vmatprep.subr.bf16.mxu1 %v8193_v5 }
 0x61f   :  { %4086 = vmatpush1.bf16.msra.mxu0 %v8201_v8  ;;  %4129 = vmatpush1.bf16.msra.mxu1 %v8206_v9 }
 0x620   :  { %4087 = vmatprep.subr.bf16.mxu0 %v8213_v19  ;;  %4130 = vmatprep.subr.bf16.mxu1 %v8218_v38 }
 0x623   :  { %4088 = vmatpush1.bf16.msra.mxu0 %v8225_v40  ;;  %4131 = vmatpush1.bf16.msra.mxu1 %v8230_v43 }
 0x624   :  { %4325 = vmatprep.subr.bf16.mxu0 %v8237_v26  ;;  %4368 = vmatprep.subr.bf16.mxu1 %v8242_v28 }
 0x6d8   :  { %v3727_v29 = vpop.f32.mrb[20].mxu0  ;;  %v3770_v30 = vpop.f32.mrb[20].mxu1 }
 0x6d9   :  { %v3779_v32 = vadd.f32 %v3727_v29, %v6982_v6  ;;  %v3729_v35 = vpop.f32.mrb[21].mxu0  ;;  %v3772_v36 = vpop.f32.mrb[21].mxu1  ;;  %v3781_v50 = vadd.f32 %v3770_v30, %v6992_v27 }
 0x6da   :  { %v3780_v10 = vadd.f32 %v3729_v35, %v6984_v7  ;;  %v3731_v12 = vpop.f32.mrb[22].mxu0  ;;  %v3774_v15 = vpop.f32.mrb[22].mxu1  ;;  %v3782_v48 = vadd.f32 %v3772_v36, %v6989_v23 }
 0x6db   :  { %v5574_v14 = vmul.f32 -1.442695, %v3779_v32  ;;  %v3783_v18 = vadd.f32 %v3731_v12, %v6982_v6  ;;  %v3733_v11 = vpop.f32.mrb[23].mxu0  ;;  %v3776_v55 = vpop.f32.mrb[23].mxu1  ;;  %v3785_v51 = vadd.f32 %v3774_v15, %v6992_v27 }
 0x6dc   :  { %v5576_v56 = vmul.f32 -1.442695, %v3780_v10  ;;  %v3784_v57 = vadd.f32 %v3733_v11, %v6984_v7  ;;  %v5578_v31 = vmul.f32 -1.442695, %v3782_v48  ;;  %v3786_v49 = vadd.f32 %v3776_v55, %v6989_v23 }
 0x6dd   :  { %6419 = vpow2.f32 %v5574_v14  ;;  %v5575_v24 = vmul.f32 -1.442695, %v3783_v18 }
 0x6de   :  { %6421 = vpow2.f32 %v5576_v56  ;;  %v5577_v47 = vmul.f32 -1.442695, %v3784_v57  ;;  %v5579_v32 = vmul.f32 -1.442695, %v3786_v49 }
 0x6df   :  { %6423 = vpow2.f32 %v5575_v24 }
 0x6e0   :  { %6425 = vpow2.f32 %v5577_v47 }
 0x6e1   :  { %6427 = vtanh.f32 %v3781_v50 }
 0x6e2   :  { %6429 = vpow2.f32 %v5578_v31 }
 0x6e3   :  { %6431 = vtanh.f32 %v3785_v51 }
 0x6e7   :  { %v6420_v52 = vpop.eup %6419 }
 0x6e8   :  { %v6422_v53 = vpop.eup %6421  ;;  %v3793_v29 = vadd.f32 1.0, %v6420_v52 }
 0x6e9   :  { %v3805_v35 = vadd.f32 1.0, %v6422_v53  ;;  %v6424_v10 = vpop.eup %6423 }
 0x6ea   :  { %6433 = vrcp.f32 %v3793_v29  ;;  %v3794_v36 = vadd.f32 1.0, %v6424_v10  ;;  %v6426_v12 = vpop.eup %6425 }
 0x6eb   :  { %6435 = vrcp.f32 %v3805_v35  ;;  %v3806_v30 = vadd.f32 1.0, %v6426_v12  ;;  %v6428_v14 = vpop.eup %6427  ;;  %v8267_v12 = vld [vmem:[%s8568_s1] ss:$16 sps:$4 sm:$0xff]  }
 0x6ec   :  { %6437 = vpow2.f32 %v5579_v32  ;;  %v6430_v18 = vpop.eup %6429 }
 0x6ed   :  { %6439 = vrcp.f32 %v3794_v36  ;;  %v6432_v15 = vpop.eup %6431  ;;  %v3819_v48 = vadd.f32 1.0, %v6430_v18  ;;  %v8282_v18 = vld [vmem:[%s8568_s1 + $0x2c] ss:$16 sps:$4 sm:$0xff]  }
 0x6ee   :  { %6441 = vrcp.f32 %v3806_v30 }
 0x6ef   :  { %6443 = vrcp.f32 %v3819_v48  ;;  %v8335_v48 = vld [vmem:[%s8568_s1 + $0x6c] ss:$16 sps:$4 sm:$0xff]  }
 0x6f4   :  { %v6434_v11 = vpop.eup %6433 }
 0x6f5   :  { %v6436_v55 = vpop.eup %6435  ;;  %v3827_v56 = vmul.f32 %v6434_v11, %v6428_v14  ;;  %v8277_v14 = vld [vmem:[%s8568_s1 + $0x24] ss:$16 sps:$4 sm:$0xff]   ;;  %v8297_v11 = vld [vmem:[%s8568_s1 + $0x28] ss:$16 sps:$4 sm:$0xff]  }
 0x6f6   :  { %v6438_v57 = vpop.eup %6437  ;;  %v3825_v24 = vmul.f32 %v6436_v55, %v7997_v33  ;;  %v8304_v55 = vld [vmem:[%s8568_s1 + $0x44] ss:$16 sps:$4 sm:$0xff]  }
 0x6f7   :  { %v6440_v47 = vpop.eup %6439  ;;  %v3820_v51 = vadd.f32 1.0, %v6438_v57  ;;  %v8318_v57 = vld [vmem:[%s8568_s1 + $0x40] ss:$16 sps:$4 sm:$0xff]  }
 0x6f8   :  { %v8257_v50 = vadd.f32 %v3827_v56, %v3825_v24  ;;  %v3828_v31 = vmul.f32 %v6440_v47, %v6432_v15  ;;  %v6442_v49 = vpop.eup %6441  ;;  %v8292_v15 = vld [vmem:[%s8568_s1 + $0x20] ss:$16 sps:$4 sm:$0xff]   ;;  %v8309_v56 = vld [vmem:[%s8568_s1 + $0x4c] ss:$16 sps:$4 sm:$0xff]   ;;  %v8323_v24 = vld [vmem:[%s8568_s1 + $0x48] ss:$16 sps:$4 sm:$0xff]  }
 0x6f9   :  { %v3826_v52 = vmul.f32 %v6442_v49, %v8001_v13  ;;  %v6444_v29 = vpop.eup %6443  ;;  %v8272_v13 = vld [vmem:[%s8568_s1 + $0x8] ss:$16 sps:$4 sm:$0xff]   ;;  %v8330_v47 = vld [vmem:[%s8568_s1 + $0x64] ss:$16 sps:$4 sm:$0xff]  }
 0x6fa   :  { %6445 = vtanh.f32 %v8257_v50  ;;  %v8347_v49 = vld [vmem:[%s8568_s1 + $0x68] ss:$16 sps:$4 sm:$0xff]  }
 0x6fb   :  { %v8261_v53 = vadd.f32 %v3828_v31, %v3826_v52  ;;  %6447 = vrcp.f32 %v3820_v51  ;;  %v8342_v31 = vld [vmem:[%s8568_s1 + $0x60] ss:$16 sps:$4 sm:$0xff]   ;;  %v8354_v51 = vld [vmem:[%s8568_s1 + $0x84] ss:$16 sps:$4 sm:$0xff]   ;;  %v8359_v52 = vld [vmem:[%s8568_s1 + $0x8c] ss:$16 sps:$4 sm:$0xff]  }
 0x6fd   :  { %6449 = vtanh.f32 %v8261_v53 }
 0x704   :  { %v6446_v32 = vpop.eup %6445 }
 0x705   :  { %v6448_v33 = vpop.eup %6447  ;;  %v3833_v10 = vmul.f32 %v6446_v32, %v6444_v29  ;;  %v8366_v29 = vld [vmem:[%s8568_s1 + $0x80] ss:$16 sps:$4 sm:$0xff]   ;;  %v8371_v32 = vld [vmem:[%s8568_s1 + $0x88] ss:$16 sps:$4 sm:$0xff]  }
 0x706   :  { %8639 = vst [vmem:[#allocation2_spill] sm:$0xff] %v8371_v32 }
 0x707   :  { %v6450_v35 = vpop.eup %6449 }
 0x708   :  { %v3834_v36 = vmul.f32 %v6450_v35, %v6448_v33  ;;  %v8378_v33 = vld [vmem:[%s8568_s1 + $0xa4] ss:$16 sps:$4 sm:$0xff]   ;;  %v8383_v35 = vld [vmem:[%s8568_s1 + $0xac] ss:$16 sps:$4 sm:$0xff]  }
 0x709   :  { %8640 = vst [vmem:[#allocation3_spill] sm:$0xff] %v8378_v33  ;;  %8641 = vst [vmem:[#allocation4_spill] sm:$0xff] %v8383_v35 }
 0x70a   :  { %v3835_v30 = vpack.c.bf16 %v3834_v36, %v3833_v10  ;;  %v8390_v10 = vld [vmem:[%s8568_s1 + $0xa0] ss:$16 sps:$4 sm:$0xff]   ;;  %v8395_v36 = vld [vmem:[%s8568_s1 + $0xa8] ss:$16 sps:$4 sm:$0xff]  }
 0x70b   :  { %8642 = vst [vmem:[#allocation5_spill] sm:$0xff] %v8390_v10  ;;  %8643 = vst [vmem:[#allocation6_spill] sm:$0xff] %v8395_v36 }
 0x70c   :  { %5798 = vst [vmem:[%s8571_s4 + $0x28] sm:$0xff] %v3835_v30   ;;  %4106 = vmatmul.mubr.bf16.vlgmr.msra.gmra.mrb[24].mxu0 %v3835_v30  ;;  %4149 = vmatmul.mubr.bf16.vlgmr.msra.gmra.mrb[24].mxu1 %v3835_v30  ;;  %v8402_v30 = vld [vmem:[%s8568_s1 + $0xc4] ss:$16 sps:$4 sm:$0xff]  }
 0x70d   :  { %4326 = vmatpush1.bf16.msra.mxu0 %v8267_v12  ;;  %4369 = vmatpush1.bf16.msra.mxu1 %v8272_v13  ;;  %8644 = vst [vmem:[#allocation7_spill] sm:$0xff] %v8402_v30 }
 0x70e   :  { %4327 = vmatprep.subr.bf16.mxu0 %v8277_v14  ;;  %4370 = vmatprep.subr.bf16.mxu1 %v8282_v18 }
 0x70f   :  { %4357 = vmatprep.mubr.bf16.mxu0 %v8604_v63  ;;  %4400 = vmatprep.mubr.bf16.mxu1 %v8604_v63 }
 0x711   :  { %4328 = vmatpush1.bf16.msra.mxu0 %v8292_v15  ;;  %4371 = vmatpush1.bf16.msra.mxu1 %v8297_v11 }
 0x712   :  { %4329 = vmatprep.subr.bf16.mxu0 %v8304_v55  ;;  %4372 = vmatprep.subr.bf16.mxu1 %v8309_v56 }
 0x715   :  { %4330 = vmatpush1.bf16.msra.mxu0 %v8318_v57  ;;  %4373 = vmatpush1.bf16.msra.mxu1 %v8323_v24 }
 0x716   :  { %4331 = vmatprep.subr.bf16.mxu0 %v8330_v47  ;;  %4374 = vmatprep.subr.bf16.mxu1 %v8335_v48 }
 0x719   :  { %4332 = vmatpush1.bf16.msra.mxu0 %v8342_v31  ;;  %4375 = vmatpush1.bf16.msra.mxu1 %v8347_v49 }
 0x71a   :  { %4333 = vmatprep.subr.bf16.mxu0 %v8354_v51  ;;  %4376 = vmatprep.subr.bf16.mxu1 %v8359_v52 }
 0x71d   :  { %4334 = vmatpush1.bf16.msra.mxu0 %v8366_v29  ;;  %4377 = vmatpush1.bf16.msra.mxu1 %v8371_v32  ;;  %v8407_v32 = vld [vmem:[%s8568_s1 + $0xcc] ss:$16 sps:$4 sm:$0xff]  }
 0x71e   :  { %4335 = vmatprep.subr.bf16.mxu0 %v8378_v33  ;;  %4378 = vmatprep.subr.bf16.mxu1 %v8383_v35  ;;  %8645 = vst [vmem:[#allocation8_spill] sm:$0xff] %v8407_v32  ;;  %v8414_v33 = vld [vmem:[%s8568_s1 + $0xc0] ss:$16 sps:$4 sm:$0xff]   ;;  %v8419_v35 = vld [vmem:[%s8568_s1 + $0xc8] ss:$16 sps:$4 sm:$0xff]  }
 0x71f   :  { %8646 = vst [vmem:[#allocation9_spill] sm:$0xff] %v8414_v33 }
 0x721   :  { %4336 = vmatpush1.bf16.msra.mxu0 %v8390_v10  ;;  %4379 = vmatpush1.bf16.msra.mxu1 %v8395_v36  ;;  %v8426_v10 = vld [vmem:[%s8568_s1 + $0xe4] ss:$16 sps:$4 sm:$0xff]   ;;  %v8431_v36 = vld [vmem:[%s8568_s1 + $0xec] ss:$16 sps:$4 sm:$0xff]  }
 0x722   :  { %4337 = vmatprep.subr.bf16.mxu0 %v8402_v30  ;;  %4380 = vmatprep.subr.bf16.mxu1 %v8407_v32  ;;  %v8438_v30 = vld [vmem:[%s8568_s1 + $0xe0] ss:$16 sps:$4 sm:$0xff]   ;;  %v8443_v32 = vld [vmem:[%s8568_s1 + $0xe8] ss:$16 sps:$4 sm:$0xff]  }
 0x725   :  { %4338 = vmatpush1.bf16.msra.mxu0 %v8414_v33  ;;  %4381 = vmatpush1.bf16.msra.mxu1 %v8419_v35  ;;  %v6257_v33 = vld [vmem:[%s8569_s0 + $0x30] sm:$0xff]  }
 0x726   :  { %4339 = vmatprep.subr.bf16.mxu0 %v8426_v10  ;;  %4382 = vmatprep.subr.bf16.mxu1 %v8431_v36 }
 0x729   :  { %4340 = vmatpush1.bf16.msra.mxu0 %v8438_v30  ;;  %4383 = vmatpush1.bf16.msra.mxu1 %v8443_v32 }
 0x72a   :  { %4705 = vmatprep.subr.bf16.mxu0 %v8047_v54  ;;  %4748 = vmatprep.subr.bf16.mxu1 %v8052_v37 }
 0x72c   :  { %4358 = vmatmul.mubr.bf16.vlgmr.msra.gmra.mrb[24].mxu0 %v6257_v33  ;;  %4401 = vmatmul.mubr.bf16.vlgmr.msra.gmra.mrb[24].mxu1 %v6257_v33 }
 0x72d   :  { %4706 = vmatpush1.bf16.msra.mxu0 %v8057_v16  ;;  %4749 = vmatpush1.bf16.msra.mxu1 %v8062_v25 }
 0x72e   :  { %4707 = vmatprep.subr.bf16.mxu0 %v8071_v20  ;;  %4750 = vmatprep.subr.bf16.mxu1 %v8076_v17 }
 0x72f   :  { %4737 = vmatprep.mubr.bf16.mxu0 %v8604_v63  ;;  %4780 = vmatprep.mubr.bf16.mxu1 %v8604_v63 }
 0x731   :  { %4708 = vmatpush1.bf16.msra.mxu0 %v8081_v21  ;;  %4751 = vmatpush1.bf16.msra.mxu1 %v8086_v22 }
 0x732   :  { %4709 = vmatprep.subr.bf16.mxu0 %v8095_v1  ;;  %4752 = vmatprep.subr.bf16.mxu1 %v8100_v42 }
 0x735   :  { %4710 = vmatpush1.bf16.msra.mxu0 %v8105_v44  ;;  %4753 = vmatpush1.bf16.msra.mxu1 %v8110_v46 }
 0x736   :  { %4711 = vmatprep.subr.bf16.mxu0 %v8119_v45  ;;  %4754 = vmatprep.subr.bf16.mxu1 %v8124_v41 }
 0x739   :  { %4712 = vmatpush1.bf16.msra.mxu0 %v8129_v58  ;;  %4755 = vmatpush1.bf16.msra.mxu1 %v8134_v60 }
 0x73a   :  { %4713 = vmatprep.subr.bf16.mxu0 %v8143_v61  ;;  %4756 = vmatprep.subr.bf16.mxu1 %v8148_v62 }
 0x73d   :  { %4714 = vmatpush1.bf16.msra.mxu0 %v8153_v39  ;;  %4757 = vmatpush1.bf16.msra.mxu1 %v8158_v34 }
 0x73e   :  { %4715 = vmatprep.subr.bf16.mxu0 %v8165_v59  ;;  %4758 = vmatprep.subr.bf16.mxu1 %v8182_v3 }
 0x741   :  { %4716 = vmatpush1.bf16.msra.mxu0 %v8172_v0  ;;  %4759 = vmatpush1.bf16.msra.mxu1 %v8177_v2 }
 0x742   :  { %4717 = vmatprep.subr.bf16.mxu0 %v8188_v4  ;;  %4760 = vmatprep.subr.bf16.mxu1 %v8193_v5 }
 0x745   :  { %4718 = vmatpush1.bf16.msra.mxu0 %v8201_v8  ;;  %4761 = vmatpush1.bf16.msra.mxu1 %v8206_v9 }
 0x746   :  { %4719 = vmatprep.subr.bf16.mxu0 %v8213_v19  ;;  %4762 = vmatprep.subr.bf16.mxu1 %v8218_v38 }
 0x749   :  { %4720 = vmatpush1.bf16.msra.mxu0 %v8225_v40  ;;  %4763 = vmatpush1.bf16.msra.mxu1 %v8230_v43 }
 0x74a   :  { %4957 = vmatprep.subr.bf16.mxu0 %v8237_v26  ;;  %5000 = vmatprep.subr.bf16.mxu1 %v8242_v28 }
 0x7ff   :  { %v4359_v54 = vpop.f32.mrb[24].mxu0  ;;  %v4402_v37 = vpop.f32.mrb[24].mxu1 }
 0x800   :  { %v4411_v16 = vadd.f32 %v4359_v54, %v6982_v6  ;;  %v4361_v25 = vpop.f32.mrb[25].mxu0  ;;  %v4404_v20 = vpop.f32.mrb[25].mxu1  ;;  %v4413_v62 = vadd.f32 %v4402_v37, %v6992_v27 }
 0x801   :  { %v4412_v17 = vadd.f32 %v4361_v25, %v6984_v7  ;;  %v4363_v21 = vpop.f32.mrb[26].mxu0  ;;  %v4406_v22 = vpop.f32.mrb[26].mxu1  ;;  %v4414_v61 = vadd.f32 %v4404_v20, %v6989_v23 }
 0x802   :  { %v5651_v1 = vmul.f32 -1.442695, %v4411_v16  ;;  %v4415_v42 = vadd.f32 %v4363_v21, %v6982_v6  ;;  %v4365_v44 = vpop.f32.mrb[27].mxu0  ;;  %v4408_v46 = vpop.f32.mrb[27].mxu1  ;;  %v4417_v59 = vadd.f32 %v4406_v22, %v6992_v27 }
 0x803   :  { %v5653_v45 = vmul.f32 -1.442695, %v4412_v17  ;;  %v4416_v41 = vadd.f32 %v4365_v44, %v6984_v7  ;;  %v5655_v39 = vmul.f32 -1.442695, %v4414_v61  ;;  %v4418_v34 = vadd.f32 %v4408_v46, %v6989_v23 }
 0x804   :  { %6451 = vpow2.f32 %v5651_v1  ;;  %v5652_v58 = vmul.f32 -1.442695, %v4415_v42 }
 0x805   :  { %6453 = vpow2.f32 %v5653_v45  ;;  %v5654_v60 = vmul.f32 -1.442695, %v4416_v41  ;;  %v5656_v4 = vmul.f32 -1.442695, %v4418_v34 }
 0x806   :  { %6455 = vpow2.f32 %v5652_v58 }
 0x807   :  { %6457 = vpow2.f32 %v5654_v60 }
 0x808   :  { %6459 = vtanh.f32 %v4413_v62 }
 0x809   :  { %6461 = vpow2.f32 %v5655_v39 }
 0x80a   :  { %6463 = vtanh.f32 %v4417_v59 }
 0x80e   :  { %v6452_v0 = vpop.eup %6451 }
 0x80f   :  { %v6454_v2 = vpop.eup %6453  ;;  %v4425_v3 = vadd.f32 1.0, %v6452_v0 }
 0x810   :  { %v4437_v5 = vadd.f32 1.0, %v6454_v2  ;;  %v6456_v8 = vpop.eup %6455 }
 0x811   :  { %6465 = vrcp.f32 %v4425_v3  ;;  %v4426_v9 = vadd.f32 1.0, %v6456_v8  ;;  %v6458_v19 = vpop.eup %6457 }
 0x812   :  { %6467 = vrcp.f32 %v4437_v5  ;;  %v4438_v38 = vadd.f32 1.0, %v6458_v19  ;;  %v6460_v40 = vpop.eup %6459 }
 0x813   :  { %6469 = vpow2.f32 %v5656_v4  ;;  %v6462_v43 = vpop.eup %6461 }
 0x814   :  { %6471 = vrcp.f32 %v4426_v9  ;;  %v6464_v26 = vpop.eup %6463  ;;  %v4451_v20 = vadd.f32 1.0, %v6462_v43 }
 0x815   :  { %6473 = vrcp.f32 %v4438_v38 }
 0x816   :  { %6475 = vrcp.f32 %v4451_v20 }
 0x81b   :  { %v6466_v28 = vpop.eup %6465 }
 0x81c   :  { %v6468_v33 = vpop.eup %6467  ;;  %v4459_v54 = vmul.f32 %v6466_v28, %v6460_v40 }
 0x81d   :  { %v6470_v37 = vpop.eup %6469  ;;  %v4457_v16 = vmul.f32 %v6468_v33, %v8257_v50 }
 0x81e   :  { %v6472_v25 = vpop.eup %6471  ;;  %v4452_v1 = vadd.f32 1.0, %v6470_v37 }
 0x81f   :  { %v8497_v17 = vadd.f32 %v4459_v54, %v4457_v16  ;;  %v4460_v21 = vmul.f32 %v6472_v25, %v6464_v26  ;;  %v6474_v22 = vpop.eup %6473 }
 0x820   :  { %v4458_v42 = vmul.f32 %v6474_v22, %v8261_v53  ;;  %v6476_v46 = vpop.eup %6475  ;;  %v8648_v53 = vld [vmem:[#allocation3_spill] sm:$0xff] }
 0x821   :  { %6477 = vtanh.f32 %v8497_v17 }
 0x822   :  { %v8501_v44 = vadd.f32 %v4460_v21, %v4458_v42  ;;  %6479 = vrcp.f32 %v4452_v1 }
 0x824   :  { %6481 = vtanh.f32 %v8501_v44 }
 0x82b   :  { %v6478_v45 = vpop.eup %6477 }
 0x82c   :  { %v6480_v50 = vpop.eup %6479  ;;  %v4465_v58 = vmul.f32 %v6478_v45, %v6476_v46 }
 0x82e   :  { %v6482_v41 = vpop.eup %6481 }
 0x82f   :  { %v4466_v60 = vmul.f32 %v6482_v41, %v6480_v50 }
 0x831   :  { %v4467_v61 = vpack.c.bf16 %v4466_v60, %v4465_v58 }
 0x833   :  { %5799 = vst [vmem:[%s8571_s4 + $0x30] sm:$0xff] %v4467_v61   ;;  %4738 = vmatmul.mubr.bf16.vlgmr.msra.gmra.mrb[28].mxu0 %v4467_v61  ;;  %4781 = vmatmul.mubr.bf16.vlgmr.msra.gmra.mrb[28].mxu1 %v4467_v61 }
 0x834   :  { %4958 = vmatpush1.bf16.msra.mxu0 %v8267_v12  ;;  %5001 = vmatpush1.bf16.msra.mxu1 %v8272_v13  ;;  %v8649_v12 = vld [vmem:[#allocation4_spill] sm:$0xff]  ;;  %v8650_v13 = vld [vmem:[#allocation5_spill] sm:$0xff] }
 0x835   :  { %4959 = vmatprep.subr.bf16.mxu0 %v8277_v14  ;;  %5002 = vmatprep.subr.bf16.mxu1 %v8282_v18  ;;  %v8651_v14 = vld [vmem:[#allocation6_spill] sm:$0xff]  ;;  %v8652_v18 = vld [vmem:[#allocation7_spill] sm:$0xff] }
 0x836   :  { %4989 = vmatprep.mubr.bf16.mxu0 %v8604_v63  ;;  %5032 = vmatprep.mubr.bf16.mxu1 %v8604_v63  ;;  %v8647_v63 = vld [vmem:[#allocation2_spill] sm:$0xff] }
 0x838   :  { %4960 = vmatpush1.bf16.msra.mxu0 %v8292_v15  ;;  %5003 = vmatpush1.bf16.msra.mxu1 %v8297_v11  ;;  %v8653_v15 = vld [vmem:[#allocation8_spill] sm:$0xff]  ;;  %v8654_v11 = vld [vmem:[#allocation9_spill] sm:$0xff] }
 0x839   :  { %4961 = vmatprep.subr.bf16.mxu0 %v8304_v55  ;;  %5004 = vmatprep.subr.bf16.mxu1 %v8309_v56  ;;  %v6258_v55 = vld [vmem:[%s8569_s0 + $0x38] sm:$0xff]  }
 0x83c   :  { %4962 = vmatpush1.bf16.msra.mxu0 %v8318_v57  ;;  %5005 = vmatpush1.bf16.msra.mxu1 %v8323_v24 }
 0x83d   :  { %4963 = vmatprep.subr.bf16.mxu0 %v8330_v47  ;;  %5006 = vmatprep.subr.bf16.mxu1 %v8335_v48 }
 0x840   :  { %4964 = vmatpush1.bf16.msra.mxu0 %v8342_v31  ;;  %5007 = vmatpush1.bf16.msra.mxu1 %v8347_v49 }
 0x841   :  { %4965 = vmatprep.subr.bf16.mxu0 %v8354_v51  ;;  %5008 = vmatprep.subr.bf16.mxu1 %v8359_v52 }
 0x844   :  { %4966 = vmatpush1.bf16.msra.mxu0 %v8366_v29  ;;  %5009 = vmatpush1.bf16.msra.mxu1 %v8647_v63 }
 0x845   :  { %4967 = vmatprep.subr.bf16.mxu0 %v8648_v53  ;;  %5010 = vmatprep.subr.bf16.mxu1 %v8649_v12 }
 0x848   :  { %4968 = vmatpush1.bf16.msra.mxu0 %v8650_v13  ;;  %5011 = vmatpush1.bf16.msra.mxu1 %v8651_v14 }
 0x849   :  { %4969 = vmatprep.subr.bf16.mxu0 %v8652_v18  ;;  %5012 = vmatprep.subr.bf16.mxu1 %v8653_v15 }
 0x84c   :  { %4970 = vmatpush1.bf16.msra.mxu0 %v8654_v11  ;;  %5013 = vmatpush1.bf16.msra.mxu1 %v8419_v35 }
 0x84d   :  { %4971 = vmatprep.subr.bf16.mxu0 %v8426_v10  ;;  %5014 = vmatprep.subr.bf16.mxu1 %v8431_v36 }
 0x850   :  { %4972 = vmatpush1.bf16.msra.mxu0 %v8438_v30  ;;  %5015 = vmatpush1.bf16.msra.mxu1 %v8443_v32 }
 0x853   :  { %4990 = vmatmul.mubr.bf16.vlgmr.msra.gmra.mrb[28].mxu0 %v6258_v55  ;;  %5033 = vmatmul.mubr.bf16.vlgmr.msra.gmra.mrb[28].mxu1 %v6258_v55 }
 0x926   :  { %v4991_v56 = vpop.f32.mrb[28].mxu0  ;;  %v5034_v57 = vpop.f32.mrb[28].mxu1 }
 0x927   :  { %v5043_v24 = vadd.f32 %v4991_v56, %v6982_v6  ;;  %v4993_v47 = vpop.f32.mrb[29].mxu0  ;;  %v5036_v48 = vpop.f32.mrb[29].mxu1  ;;  %v5045_v34 = vadd.f32 %v5034_v57, %v6992_v27 }
 0x928   :  { %v5044_v31 = vadd.f32 %v4993_v47, %v6984_v7  ;;  %v4995_v49 = vpop.f32.mrb[30].mxu0  ;;  %v5038_v51 = vpop.f32.mrb[30].mxu1  ;;  %v5046_v39 = vadd.f32 %v5036_v48, %v6989_v23 }
 0x929   :  { %v5728_v52 = vmul.f32 -1.442695, %v5043_v24  ;;  %v5047_v29 = vadd.f32 %v4995_v49, %v6982_v6  ;;  %v4997_v35 = vpop.f32.mrb[31].mxu0  ;;  %v5040_v10 = vpop.f32.mrb[31].mxu1  ;;  %v5049_v6 = vadd.f32 %v5038_v51, %v6992_v27 }
 0x92a   :  { %v5730_v36 = vmul.f32 -1.442695, %v5044_v31  ;;  %v5048_v32 = vadd.f32 %v4997_v35, %v6984_v7  ;;  %v5732_v59 = vmul.f32 -1.442695, %v5046_v39  ;;  %v5050_v0 = vadd.f32 %v5040_v10, %v6989_v23 }
 0x92b   :  { %6483 = vpow2.f32 %v5728_v52  ;;  %v5729_v30 = vmul.f32 -1.442695, %v5047_v29 }
 0x92c   :  { %6485 = vpow2.f32 %v5730_v36  ;;  %v5731_v62 = vmul.f32 -1.442695, %v5048_v32  ;;  %v5733_v7 = vmul.f32 -1.442695, %v5050_v0 }
 0x92d   :  { %6487 = vpow2.f32 %v5729_v30 }
 0x92e   :  { %6489 = vpow2.f32 %v5731_v62 }
 0x92f   :  { %6491 = vtanh.f32 %v5045_v34 }
 0x930   :  { %6493 = vpow2.f32 %v5732_v59 }
 0x931   :  { %6495 = vtanh.f32 %v5049_v6 }
 0x935   :  { %v6484_v2 = vpop.eup %6483 }
 0x936   :  { %v6486_v3 = vpop.eup %6485  ;;  %v5057_v4 = vadd.f32 1.0, %v6484_v2 }
 0x937   :  { %v5069_v5 = vadd.f32 1.0, %v6486_v3  ;;  %v6488_v8 = vpop.eup %6487 }
 0x938   :  { %6497 = vrcp.f32 %v5057_v4  ;;  %v5058_v9 = vadd.f32 1.0, %v6488_v8  ;;  %v6490_v19 = vpop.eup %6489 }
 0x939   :  { %6499 = vrcp.f32 %v5069_v5  ;;  %v5070_v38 = vadd.f32 1.0, %v6490_v19  ;;  %v6492_v23 = vpop.eup %6491 }
 0x93a   :  { %6501 = vpow2.f32 %v5733_v7  ;;  %v6494_v40 = vpop.eup %6493 }
 0x93b   :  { %6503 = vrcp.f32 %v5058_v9  ;;  %v6496_v27 = vpop.eup %6495  ;;  %v5083_v33 = vadd.f32 1.0, %v6494_v40 }
 0x93c   :  { %6505 = vrcp.f32 %v5070_v38 }
 0x93d   :  { %6507 = vrcp.f32 %v5083_v33 }
 0x942   :  { %v6498_v43 = vpop.eup %6497 }
 0x943   :  { %v6500_v26 = vpop.eup %6499  ;;  %v5091_v28 = vmul.f32 %v6498_v43, %v6492_v23 }
 0x944   :  { %v6502_v54 = vpop.eup %6501  ;;  %v5089_v37 = vmul.f32 %v6500_v26, %v8497_v17 }
 0x945   :  { %v6504_v16 = vpop.eup %6503  ;;  %v5084_v22 = vadd.f32 1.0, %v6502_v54 }
 0x946   :  { %v5093_v25 = vadd.f32 %v5091_v28, %v5089_v37  ;;  %v5092_v20 = vmul.f32 %v6504_v16, %v6496_v27  ;;  %v6506_v21 = vpop.eup %6505 }
 0x947   :  { %v5090_v1 = vmul.f32 %v6506_v21, %v8501_v44  ;;  %v6508_v17 = vpop.eup %6507 }
 0x948   :  { %6509 = vtanh.f32 %v5093_v25  ;;  %5112 = vst [vmem:[%s8572_s6] sm:$0xff] %v5093_v25 }
 0x949   :  { %v5094_v42 = vadd.f32 %v5092_v20, %v5090_v1  ;;  %6511 = vrcp.f32 %v5084_v22 }
 0x94b   :  { %6513 = vtanh.f32 %v5094_v42  ;;  %5113 = vst [vmem:[%s8572_s6 + $0x8] sm:$0xff] %v5094_v42 }
 0x952   :  { %v6510_v46 = vpop.eup %6509 }
 0x953   :  { %v5097_v45 = vmul.f32 %v6510_v46, %v6508_v17  ;;  %v6512_v50 = vpop.eup %6511 }
 0x955   :  { %5110 = vst [vmem:[%s8573_s5] sm:$0xff] %v5097_v45  ;;  %v6514_v41 = vpop.eup %6513 }
 0x956   :  { %v5098_v58 = vmul.f32 %v6514_v41, %v6512_v50 }
 0x958   :  { %v5792_v60 = vpack.c.bf16 %v5098_v58, %v5097_v45  ;;  %5111 = vst [vmem:[%s8573_s5 + $0x8] sm:$0xff] %v5098_v58 }
 0x95a   :  { %5800 = vst [vmem:[%s8571_s4 + $0x38] sm:$0xff] %v5792_v60  }

</bundles_post_ra>
